<compile_context>
chip_gen: v7x
topology: tpu7x:2x2x1
jax: 0.10.0
libtpu: 0.0.40
codegen_flags: <defaults>
</compile_context>

<pallas_src>
import functools

import jax
import jax.numpy as jnp
import numpy as np
from jax.experimental import pallas as pl
from jax.experimental.pallas import tpu as pltpu


def _round_up(x, m):
    return ((x + m - 1) // m) * m


def sparsemax_loss_kernel(x_ref, tgt_ref, loss_ref, *, n_bisect):
    x = x_ref[...].astype(jnp.float32)           # (tm, C)
    tm, C = x.shape
    tgt = tgt_ref[...]                           # (tm, 1) int32

    # --- Fixed-iteration bisection for the sparsemax threshold -------------
    # f(t) = sum_j relu(x_j - t) is continuous, piecewise linear and strictly
    # decreasing wherever it is positive; the sparsemax threshold tau is the
    # unique root of f(t) = 1 and is bracketed by [max(x) - 1, max(x)]
    # (width exactly 1).  One VPU compare/select + one lane reduction (XLU)
    # per iteration, independent of C.
    x_max = jnp.max(x, axis=1, keepdims=True)    # (tm, 1)

    def body(_, carry):
        lo, hi = carry
        mid = 0.5 * (lo + hi)                    # stays within [lo, hi]
        f = jnp.sum(jnp.maximum(x - mid, 0.0), axis=1, keepdims=True)
        go_right = f >= 1.0                      # root is at or above mid
        return (jnp.where(go_right, mid, lo), jnp.where(go_right, hi, mid))

    lo, hi = jax.lax.fori_loop(0, n_bisect, body, (x_max - 1.0, x_max),
                               unroll=True)
    tau0 = 0.5 * (lo + hi)                       # tau up to ~2^-n_bisect

    # --- Exact threshold + loss from the (tie-robust) support set ----------
    # Any set A with {x_j > tau} <= A <= {x_j >= tau} satisfies
    # (sum_A x - 1)/|A| == tau, so counting against tau0 (">=" keeps |A| >= 1
    # since tau0 <= max(x)) reproduces torch's sort-based tau up to the float
    # resolution of near-ties.  The same mask gives the loss term: elements
    # with x == tau contribute x^2 - tau^2 == 0, hence
    #   sum_{x > tau}(x^2 - tau^2) == s2 - k * tau^2  with s2, k taken over A.
    sel = x >= tau0
    xs = jnp.where(sel, x, 0.0)
    k = jnp.sum(sel.astype(jnp.float32), axis=1, keepdims=True)   # (tm, 1)
    s = jnp.sum(xs, axis=1, keepdims=True)                        # (tm, 1)
    s2 = jnp.sum(xs * x, axis=1, keepdims=True)                   # (tm, 1)
    tau = (s - 1.0) / k                                           # exact div
    xsum = s2 - k * tau * tau                                     # (tm, 1)

    # z_k = x[i, target[i]]  (one-hot gather along lanes)
    col = jax.lax.broadcasted_iota(jnp.int32, (tm, C), 1)
    z_k = jnp.sum(jnp.where(col == tgt, x, 0.0), axis=1, keepdims=True)

    loss_ref[...] = jnp.maximum(0.5 * xsum - z_k + 0.5, 0.0)


@functools.partial(jax.jit,
                   static_argnames=("ignore_index", "reduction", "tm",
                                    "n_bisect"))
def sparsemax_loss(inputs, target, *, ignore_index=-100,
                   reduction="elementwise_mean", tm=None, n_bisect=26):
    n, num_classes = inputs.shape
    assert target.shape == (n,)

    # Adaptive row tile: as large as possible (<= 1024) while keeping a
    # double-buffered input tile comfortably inside scoped VMEM on all
    # generations (v5e 16 MiB default, v7x 64 MiB physical).
    if tm is None:
        itemsize = jnp.dtype(inputs.dtype).itemsize
        rows_budget = (4 * 1024 * 1024) // max(1, num_classes * itemsize)
        tm = min(1024, max(8, rows_budget), _round_up(n, 8))
        tm = max(8, (tm // 8) * 8)

    n_pad = _round_up(n, tm)
    num_tiles = n_pad // tm

    x = inputs                                   # native dtype, no up-cast
    tgt = target.astype(jnp.int32)
    if n_pad != n:
        # Pad with zeros: padded rows compute a finite dummy loss (no NaN/inf)
        # and are sliced away below before any reduction.
        x = jnp.pad(x, ((0, n_pad - n), (0, 0)))
        tgt = jnp.pad(tgt, (0, n_pad - n))
    tgt2d = tgt.reshape(n_pad, 1)

    kernel = functools.partial(sparsemax_loss_kernel, n_bisect=n_bisect)
    per_example = pl.pallas_call(
        kernel,
        out_shape=jax.ShapeDtypeStruct((n_pad, 1), jnp.float32),
        grid_spec=pltpu.PrefetchScalarGridSpec(
            num_scalar_prefetch=0,
            grid=(num_tiles,),
            in_specs=[
                pl.BlockSpec((tm, num_classes), lambda i: (i, 0)),
                pl.BlockSpec((tm, 1), lambda i: (i, 0)),
            ],
            out_specs=pl.BlockSpec((tm, 1), lambda i: (i, 0)),
        ),
        compiler_params=pltpu.CompilerParams(
            dimension_semantics=("parallel",),
            vmem_limit_bytes=32 * 1024 * 1024,
        ),
    )(x, tgt2d)

    loss = per_example[:n, 0]                    # (n,)

    # Glue: ignore_index masking + reduction (mirrors SparsemaxLoss.forward;
    # weight is unused by the torch module's forward as well).
    if ignore_index >= 0:
        ignored = target == ignore_index
        size = (n - jnp.sum(ignored)).astype(jnp.float32)
        loss = jnp.where(ignored, 0.0, loss)
    else:
        size = jnp.float32(n)

    if reduction == "sum":
        return jnp.sum(loss)
    elif reduction == "elementwise_mean":
        return jnp.sum(loss) / size
    return loss


def sparsemax_loss_reference(inputs, target):
    """Pure-JAX (sort-based) reference, matching the torch code line by line."""
    x = inputs.astype(jnp.float32)
    n, C = x.shape
    srt = -jnp.sort(-x, axis=1)                  # descending sort
    cumsum = jnp.cumsum(srt, axis=1) - 1.0
    rhos = jnp.arange(1, C + 1, dtype=jnp.float32)[None, :]
    support = rhos * srt > cumsum
    support_size = jnp.sum(support, axis=1)
    tau = jnp.take_along_axis(cumsum, (support_size - 1)[:, None], axis=1)
    tau = tau / support_size[:, None].astype(jnp.float32)
    z_k = jnp.take_along_axis(x, target[:, None], axis=1)[:, 0]
    sup = x > tau
    xsum = jnp.sum(jnp.where(sup, x * x - tau * tau, 0.0), axis=1)
    loss = jnp.maximum(xsum / 2.0 - z_k + 0.5, 0.0)
    return jnp.sum(loss) / n                     # elementwise_mean, no ignore


if __name__ == "__main__":
    key = jax.random.PRNGKey(0)
    k1, k2 = jax.random.split(key)

    # Small shapes consistent with the module: (n, num_classes) logits,
    # (n,) integer targets.  n is deliberately not a multiple of 8 so the
    # row-padding path is exercised.
    n, num_classes = 67, 40
    logits = jax.random.normal(k1, (n, num_classes), dtype=jnp.float32) * 2.0
    target = jax.random.randint(k2, (n,), 0, num_classes, dtype=jnp.int32)

    out = jax.block_until_ready(sparsemax_loss(logits, target))
    ref = jax.block_until_ready(sparsemax_loss_reference(logits, target))
    np.testing.assert_allclose(np.asarray(out), np.asarray(ref),
                               rtol=1e-5, atol=1e-5)

    print("KERNEL_OK")
</pallas_src>

<mosaic_0001>
module attributes {stable_mosaic.version = 11 : i64} {
  func.func @sparsemax_loss_kernel(%arg0: i32, %arg1: memref<72x40xf32, #tpu.memory_space<vmem>>, %arg2: memref<72x1xi32, #tpu.memory_space<vmem>>, %arg3: memref<72x1xf32, #tpu.memory_space<vmem>>) attributes {dimension_semantics = [#tpu.dimension_semantics<parallel>], iteration_bounds = array<i64: 1>, scalar_prefetch = 0 : i64, scratch_operands = 0 : i64, tpu.core_type = #tpu.core_type<tc>, window_params = [{transform_indices = @transform_0, window_bounds = array<i64: 72, 40>}, {transform_indices = @transform_1, window_bounds = array<i64: 72, 1>}, {transform_indices = @transform_2, window_bounds = array<i64: 72, 1>}]} {
    %c0 = arith.constant 0 : index
    %c0_0 = arith.constant 0 : index
    %0 = vector.load %arg1[%c0, %c0_0] : memref<72x40xf32, #tpu.memory_space<vmem>>, vector<72x40xf32>
    %c0_1 = arith.constant 0 : index
    %c0_2 = arith.constant 0 : index
    %1 = vector.load %arg2[%c0_1, %c0_2] : memref<72x1xi32, #tpu.memory_space<vmem>>, vector<72x1xi32>
    %cst = arith.constant dense<0xFF800000> : vector<72xf32>
    %2 = vector.multi_reduction <maximumf>, %0, %cst [1] : vector<72x40xf32> to vector<72xf32>
    %3 = vector.shape_cast %2 : vector<72xf32> to vector<72x1xf32>
    %cst_3 = arith.constant 1.000000e+00 : f32
    %4 = vector.broadcast %cst_3 : f32 to vector<72x1xf32>
    %5 = arith.subf %3, %4 : vector<72x1xf32>
    %c0_i32 = arith.constant 0 : i32
    %6 = arith.addf %5, %3 : vector<72x1xf32>
    %cst_4 = arith.constant 5.000000e-01 : f32
    %7 = vector.broadcast %cst_4 : f32 to vector<72x1xf32>
    %8 = arith.mulf %7, %6 : vector<72x1xf32>
    %9 = vector.broadcast %8 : vector<72x1xf32> to vector<72x40xf32>
    %10 = arith.subf %0, %9 : vector<72x40xf32>
    %cst_5 = arith.constant 0.000000e+00 : f32
    %11 = vector.broadcast %cst_5 : f32 to vector<72x40xf32>
    %12 = arith.maximumf %10, %11 : vector<72x40xf32>
    %cst_6 = arith.constant dense<0.000000e+00> : vector<72xf32>
    %13 = vector.multi_reduction <add>, %12, %cst_6 [1] : vector<72x40xf32> to vector<72xf32>
    %14 = vector.shape_cast %13 : vector<72xf32> to vector<72x1xf32>
    %cst_7 = arith.constant 1.000000e+00 : f32
    %15 = vector.broadcast %cst_7 : f32 to vector<72x1xf32>
    %16 = arith.cmpf oge, %14, %15 : vector<72x1xf32>
    %17 = arith.select %16, %8, %5 : vector<72x1xi1>, vector<72x1xf32>
    %18 = arith.select %16, %3, %8 : vector<72x1xi1>, vector<72x1xf32>
    %c1_i32 = arith.constant 1 : i32
    %19 = arith.addf %17, %18 : vector<72x1xf32>
    %cst_8 = arith.constant 5.000000e-01 : f32
    %20 = vector.broadcast %cst_8 : f32 to vector<72x1xf32>
    %21 = arith.mulf %20, %19 : vector<72x1xf32>
    %22 = vector.broadcast %21 : vector<72x1xf32> to vector<72x40xf32>
    %23 = arith.subf %0, %22 : vector<72x40xf32>
    %cst_9 = arith.constant 0.000000e+00 : f32
    %24 = vector.broadcast %cst_9 : f32 to vector<72x40xf32>
    %25 = arith.maximumf %23, %24 : vector<72x40xf32>
    %cst_10 = arith.constant dense<0.000000e+00> : vector<72xf32>
    %26 = vector.multi_reduction <add>, %25, %cst_10 [1] : vector<72x40xf32> to vector<72xf32>
    %27 = vector.shape_cast %26 : vector<72xf32> to vector<72x1xf32>
    %cst_11 = arith.constant 1.000000e+00 : f32
    %28 = vector.broadcast %cst_11 : f32 to vector<72x1xf32>
    %29 = arith.cmpf oge, %27, %28 : vector<72x1xf32>
    %30 = arith.select %29, %21, %17 : vector<72x1xi1>, vector<72x1xf32>
    %31 = arith.select %29, %18, %21 : vector<72x1xi1>, vector<72x1xf32>
    %c2_i32 = arith.constant 2 : i32
    %32 = arith.addf %30, %31 : vector<72x1xf32>
    %cst_12 = arith.constant 5.000000e-01 : f32
    %33 = vector.broadcast %cst_12 : f32 to vector<72x1xf32>
    %34 = arith.mulf %33, %32 : vector<72x1xf32>
    %35 = vector.broadcast %34 : vector<72x1xf32> to vector<72x40xf32>
    %36 = arith.subf %0, %35 : vector<72x40xf32>
    %cst_13 = arith.constant 0.000000e+00 : f32
    %37 = vector.broadcast %cst_13 : f32 to vector<72x40xf32>
    %38 = arith.maximumf %36, %37 : vector<72x40xf32>
    %cst_14 = arith.constant dense<0.000000e+00> : vector<72xf32>
    %39 = vector.multi_reduction <add>, %38, %cst_14 [1] : vector<72x40xf32> to vector<72xf32>
    %40 = vector.shape_cast %39 : vector<72xf32> to vector<72x1xf32>
    %cst_15 = arith.constant 1.000000e+00 : f32
    %41 = vector.broadcast %cst_15 : f32 to vector<72x1xf32>
    %42 = arith.cmpf oge, %40, %41 : vector<72x1xf32>
    %43 = arith.select %42, %34, %30 : vector<72x1xi1>, vector<72x1xf32>
    %44 = arith.select %42, %31, %34 : vector<72x1xi1>, vector<72x1xf32>
    %c3_i32 = arith.constant 3 : i32
    %45 = arith.addf %43, %44 : vector<72x1xf32>
    %cst_16 = arith.constant 5.000000e-01 : f32
    %46 = vector.broadcast %cst_16 : f32 to vector<72x1xf32>
    %47 = arith.mulf %46, %45 : vector<72x1xf32>
    %48 = vector.broadcast %47 : vector<72x1xf32> to vector<72x40xf32>
    %49 = arith.subf %0, %48 : vector<72x40xf32>
    %cst_17 = arith.constant 0.000000e+00 : f32
    %50 = vector.broadcast %cst_17 : f32 to vector<72x40xf32>
    %51 = arith.maximumf %49, %50 : vector<72x40xf32>
    %cst_18 = arith.constant dense<0.000000e+00> : vector<72xf32>
    %52 = vector.multi_reduction <add>, %51, %cst_18 [1] : vector<72x40xf32> to vector<72xf32>
    %53 = vector.shape_cast %52 : vector<72xf32> to vector<72x1xf32>
    %cst_19 = arith.constant 1.000000e+00 : f32
    %54 = vector.broadcast %cst_19 : f32 to vector<72x1xf32>
    %55 = arith.cmpf oge, %53, %54 : vector<72x1xf32>
    %56 = arith.select %55, %47, %43 : vector<72x1xi1>, vector<72x1xf32>
    %57 = arith.select %55, %44, %47 : vector<72x1xi1>, vector<72x1xf32>
    %c4_i32 = arith.constant 4 : i32
    %58 = arith.addf %56, %57 : vector<72x1xf32>
    %cst_20 = arith.constant 5.000000e-01 : f32
    %59 = vector.broadcast %cst_20 : f32 to vector<72x1xf32>
    %60 = arith.mulf %59, %58 : vector<72x1xf32>
    %61 = vector.broadcast %60 : vector<72x1xf32> to vector<72x40xf32>
    %62 = arith.subf %0, %61 : vector<72x40xf32>
    %cst_21 = arith.constant 0.000000e+00 : f32
    %63 = vector.broadcast %cst_21 : f32 to vector<72x40xf32>
    %64 = arith.maximumf %62, %63 : vector<72x40xf32>
    %cst_22 = arith.constant dense<0.000000e+00> : vector<72xf32>
    %65 = vector.multi_reduction <add>, %64, %cst_22 [1] : vector<72x40xf32> to vector<72xf32>
    %66 = vector.shape_cast %65 : vector<72xf32> to vector<72x1xf32>
    %cst_23 = arith.constant 1.000000e+00 : f32
    %67 = vector.broadcast %cst_23 : f32 to vector<72x1xf32>
    %68 = arith.cmpf oge, %66, %67 : vector<72x1xf32>
    %69 = arith.select %68, %60, %56 : vector<72x1xi1>, vector<72x1xf32>
    %70 = arith.select %68, %57, %60 : vector<72x1xi1>, vector<72x1xf32>
    %c5_i32 = arith.constant 5 : i32
    %71 = arith.addf %69, %70 : vector<72x1xf32>
    %cst_24 = arith.constant 5.000000e-01 : f32
    %72 = vector.broadcast %cst_24 : f32 to vector<72x1xf32>
    %73 = arith.mulf %72, %71 : vector<72x1xf32>
    %74 = vector.broadcast %73 : vector<72x1xf32> to vector<72x40xf32>
    %75 = arith.subf %0, %74 : vector<72x40xf32>
    %cst_25 = arith.constant 0.000000e+00 : f32
    %76 = vector.broadcast %cst_25 : f32 to vector<72x40xf32>
    %77 = arith.maximumf %75, %76 : vector<72x40xf32>
    %cst_26 = arith.constant dense<0.000000e+00> : vector<72xf32>
    %78 = vector.multi_reduction <add>, %77, %cst_26 [1] : vector<72x40xf32> to vector<72xf32>
    %79 = vector.shape_cast %78 : vector<72xf32> to vector<72x1xf32>
    %cst_27 = arith.constant 1.000000e+00 : f32
    %80 = vector.broadcast %cst_27 : f32 to vector<72x1xf32>
    %81 = arith.cmpf oge, %79, %80 : vector<72x1xf32>
    %82 = arith.select %81, %73, %69 : vector<72x1xi1>, vector<72x1xf32>
    %83 = arith.select %81, %70, %73 : vector<72x1xi1>, vector<72x1xf32>
    %c6_i32 = arith.constant 6 : i32
    %84 = arith.addf %82, %83 : vector<72x1xf32>
    %cst_28 = arith.constant 5.000000e-01 : f32
    %85 = vector.broadcast %cst_28 : f32 to vector<72x1xf32>
    %86 = arith.mulf %85, %84 : vector<72x1xf32>
    %87 = vector.broadcast %86 : vector<72x1xf32> to vector<72x40xf32>
    %88 = arith.subf %0, %87 : vector<72x40xf32>
    %cst_29 = arith.constant 0.000000e+00 : f32
    %89 = vector.broadcast %cst_29 : f32 to vector<72x40xf32>
    %90 = arith.maximumf %88, %89 : vector<72x40xf32>
    %cst_30 = arith.constant dense<0.000000e+00> : vector<72xf32>
    %91 = vector.multi_reduction <add>, %90, %cst_30 [1] : vector<72x40xf32> to vector<72xf32>
    %92 = vector.shape_cast %91 : vector<72xf32> to vector<72x1xf32>
    %cst_31 = arith.constant 1.000000e+00 : f32
    %93 = vector.broadcast %cst_31 : f32 to vector<72x1xf32>
    %94 = arith.cmpf oge, %92, %93 : vector<72x1xf32>
    %95 = arith.select %94, %86, %82 : vector<72x1xi1>, vector<72x1xf32>
    %96 = arith.select %94, %83, %86 : vector<72x1xi1>, vector<72x1xf32>
    %c7_i32 = arith.constant 7 : i32
    %97 = arith.addf %95, %96 : vector<72x1xf32>
    %cst_32 = arith.constant 5.000000e-01 : f32
    %98 = vector.broadcast %cst_32 : f32 to vector<72x1xf32>
    %99 = arith.mulf %98, %97 : vector<72x1xf32>
    %100 = vector.broadcast %99 : vector<72x1xf32> to vector<72x40xf32>
    %101 = arith.subf %0, %100 : vector<72x40xf32>
    %cst_33 = arith.constant 0.000000e+00 : f32
    %102 = vector.broadcast %cst_33 : f32 to vector<72x40xf32>
    %103 = arith.maximumf %101, %102 : vector<72x40xf32>
    %cst_34 = arith.constant dense<0.000000e+00> : vector<72xf32>
    %104 = vector.multi_reduction <add>, %103, %cst_34 [1] : vector<72x40xf32> to vector<72xf32>
    %105 = vector.shape_cast %104 : vector<72xf32> to vector<72x1xf32>
    %cst_35 = arith.constant 1.000000e+00 : f32
    %106 = vector.broadcast %cst_35 : f32 to vector<72x1xf32>
    %107 = arith.cmpf oge, %105, %106 : vector<72x1xf32>
    %108 = arith.select %107, %99, %95 : vector<72x1xi1>, vector<72x1xf32>
    %109 = arith.select %107, %96, %99 : vector<72x1xi1>, vector<72x1xf32>
    %c8_i32 = arith.constant 8 : i32
    %110 = arith.addf %108, %109 : vector<72x1xf32>
    %cst_36 = arith.constant 5.000000e-01 : f32
    %111 = vector.broadcast %cst_36 : f32 to vector<72x1xf32>
    %112 = arith.mulf %111, %110 : vector<72x1xf32>
    %113 = vector.broadcast %112 : vector<72x1xf32> to vector<72x40xf32>
    %114 = arith.subf %0, %113 : vector<72x40xf32>
    %cst_37 = arith.constant 0.000000e+00 : f32
    %115 = vector.broadcast %cst_37 : f32 to vector<72x40xf32>
    %116 = arith.maximumf %114, %115 : vector<72x40xf32>
    %cst_38 = arith.constant dense<0.000000e+00> : vector<72xf32>
    %117 = vector.multi_reduction <add>, %116, %cst_38 [1] : vector<72x40xf32> to vector<72xf32>
    %118 = vector.shape_cast %117 : vector<72xf32> to vector<72x1xf32>
    %cst_39 = arith.constant 1.000000e+00 : f32
    %119 = vector.broadcast %cst_39 : f32 to vector<72x1xf32>
    %120 = arith.cmpf oge, %118, %119 : vector<72x1xf32>
    %121 = arith.select %120, %112, %108 : vector<72x1xi1>, vector<72x1xf32>
    %122 = arith.select %120, %109, %112 : vector<72x1xi1>, vector<72x1xf32>
    %c9_i32 = arith.constant 9 : i32
    %123 = arith.addf %121, %122 : vector<72x1xf32>
    %cst_40 = arith.constant 5.000000e-01 : f32
    %124 = vector.broadcast %cst_40 : f32 to vector<72x1xf32>
    %125 = arith.mulf %124, %123 : vector<72x1xf32>
    %126 = vector.broadcast %125 : vector<72x1xf32> to vector<72x40xf32>
    %127 = arith.subf %0, %126 : vector<72x40xf32>
    %cst_41 = arith.constant 0.000000e+00 : f32
    %128 = vector.broadcast %cst_41 : f32 to vector<72x40xf32>
    %129 = arith.maximumf %127, %128 : vector<72x40xf32>
    %cst_42 = arith.constant dense<0.000000e+00> : vector<72xf32>
    %130 = vector.multi_reduction <add>, %129, %cst_42 [1] : vector<72x40xf32> to vector<72xf32>
    %131 = vector.shape_cast %130 : vector<72xf32> to vector<72x1xf32>
    %cst_43 = arith.constant 1.000000e+00 : f32
    %132 = vector.broadcast %cst_43 : f32 to vector<72x1xf32>
    %133 = arith.cmpf oge, %131, %132 : vector<72x1xf32>
    %134 = arith.select %133, %125, %121 : vector<72x1xi1>, vector<72x1xf32>
    %135 = arith.select %133, %122, %125 : vector<72x1xi1>, vector<72x1xf32>
    %c10_i32 = arith.constant 10 : i32
    %136 = arith.addf %134, %135 : vector<72x1xf32>
    %cst_44 = arith.constant 5.000000e-01 : f32
    %137 = vector.broadcast %cst_44 : f32 to vector<72x1xf32>
    %138 = arith.mulf %137, %136 : vector<72x1xf32>
    %139 = vector.broadcast %138 : vector<72x1xf32> to vector<72x40xf32>
    %140 = arith.subf %0, %139 : vector<72x40xf32>
    %cst_45 = arith.constant 0.000000e+00 : f32
    %141 = vector.broadcast %cst_45 : f32 to vector<72x40xf32>
    %142 = arith.maximumf %140, %141 : vector<72x40xf32>
    %cst_46 = arith.constant dense<0.000000e+00> : vector<72xf32>
    %143 = vector.multi_reduction <add>, %142, %cst_46 [1] : vector<72x40xf32> to vector<72xf32>
    %144 = vector.shape_cast %143 : vector<72xf32> to vector<72x1xf32>
    %cst_47 = arith.constant 1.000000e+00 : f32
    %145 = vector.broadcast %cst_47 : f32 to vector<72x1xf32>
    %146 = arith.cmpf oge, %144, %145 : vector<72x1xf32>
    %147 = arith.select %146, %138, %134 : vector<72x1xi1>, vector<72x1xf32>
    %148 = arith.select %146, %135, %138 : vector<72x1xi1>, vector<72x1xf32>
    %c11_i32 = arith.constant 11 : i32
    %149 = arith.addf %147, %148 : vector<72x1xf32>
    %cst_48 = arith.constant 5.000000e-01 : f32
    %150 = vector.broadcast %cst_48 : f32 to vector<72x1xf32>
    %151 = arith.mulf %150, %149 : vector<72x1xf32>
    %152 = vector.broadcast %151 : vector<72x1xf32> to vector<72x40xf32>
    %153 = arith.subf %0, %152 : vector<72x40xf32>
    %cst_49 = arith.constant 0.000000e+00 : f32
    %154 = vector.broadcast %cst_49 : f32 to vector<72x40xf32>
    %155 = arith.maximumf %153, %154 : vector<72x40xf32>
    %cst_50 = arith.constant dense<0.000000e+00> : vector<72xf32>
    %156 = vector.multi_reduction <add>, %155, %cst_50 [1] : vector<72x40xf32> to vector<72xf32>
    %157 = vector.shape_cast %156 : vector<72xf32> to vector<72x1xf32>
    %cst_51 = arith.constant 1.000000e+00 : f32
    %158 = vector.broadcast %cst_51 : f32 to vector<72x1xf32>
    %159 = arith.cmpf oge, %157, %158 : vector<72x1xf32>
    %160 = arith.select %159, %151, %147 : vector<72x1xi1>, vector<72x1xf32>
    %161 = arith.select %159, %148, %151 : vector<72x1xi1>, vector<72x1xf32>
    %c12_i32 = arith.constant 12 : i32
    %162 = arith.addf %160, %161 : vector<72x1xf32>
    %cst_52 = arith.constant 5.000000e-01 : f32
    %163 = vector.broadcast %cst_52 : f32 to vector<72x1xf32>
    %164 = arith.mulf %163, %162 : vector<72x1xf32>
    %165 = vector.broadcast %164 : vector<72x1xf32> to vector<72x40xf32>
    %166 = arith.subf %0, %165 : vector<72x40xf32>
    %cst_53 = arith.constant 0.000000e+00 : f32
    %167 = vector.broadcast %cst_53 : f32 to vector<72x40xf32>
    %168 = arith.maximumf %166, %167 : vector<72x40xf32>
    %cst_54 = arith.constant dense<0.000000e+00> : vector<72xf32>
    %169 = vector.multi_reduction <add>, %168, %cst_54 [1] : vector<72x40xf32> to vector<72xf32>
    %170 = vector.shape_cast %169 : vector<72xf32> to vector<72x1xf32>
    %cst_55 = arith.constant 1.000000e+00 : f32
    %171 = vector.broadcast %cst_55 : f32 to vector<72x1xf32>
    %172 = arith.cmpf oge, %170, %171 : vector<72x1xf32>
    %173 = arith.select %172, %164, %160 : vector<72x1xi1>, vector<72x1xf32>
    %174 = arith.select %172, %161, %164 : vector<72x1xi1>, vector<72x1xf32>
    %c13_i32 = arith.constant 13 : i32
    %175 = arith.addf %173, %174 : vector<72x1xf32>
    %cst_56 = arith.constant 5.000000e-01 : f32
    %176 = vector.broadcast %cst_56 : f32 to vector<72x1xf32>
    %177 = arith.mulf %176, %175 : vector<72x1xf32>
    %178 = vector.broadcast %177 : vector<72x1xf32> to vector<72x40xf32>
    %179 = arith.subf %0, %178 : vector<72x40xf32>
    %cst_57 = arith.constant 0.000000e+00 : f32
    %180 = vector.broadcast %cst_57 : f32 to vector<72x40xf32>
    %181 = arith.maximumf %179, %180 : vector<72x40xf32>
    %cst_58 = arith.constant dense<0.000000e+00> : vector<72xf32>
    %182 = vector.multi_reduction <add>, %181, %cst_58 [1] : vector<72x40xf32> to vector<72xf32>
    %183 = vector.shape_cast %182 : vector<72xf32> to vector<72x1xf32>
    %cst_59 = arith.constant 1.000000e+00 : f32
    %184 = vector.broadcast %cst_59 : f32 to vector<72x1xf32>
    %185 = arith.cmpf oge, %183, %184 : vector<72x1xf32>
    %186 = arith.select %185, %177, %173 : vector<72x1xi1>, vector<72x1xf32>
    %187 = arith.select %185, %174, %177 : vector<72x1xi1>, vector<72x1xf32>
    %c14_i32 = arith.constant 14 : i32
    %188 = arith.addf %186, %187 : vector<72x1xf32>
    %cst_60 = arith.constant 5.000000e-01 : f32
    %189 = vector.broadcast %cst_60 : f32 to vector<72x1xf32>
    %190 = arith.mulf %189, %188 : vector<72x1xf32>
    %191 = vector.broadcast %190 : vector<72x1xf32> to vector<72x40xf32>
    %192 = arith.subf %0, %191 : vector<72x40xf32>
    %cst_61 = arith.constant 0.000000e+00 : f32
    %193 = vector.broadcast %cst_61 : f32 to vector<72x40xf32>
    %194 = arith.maximumf %192, %193 : vector<72x40xf32>
    %cst_62 = arith.constant dense<0.000000e+00> : vector<72xf32>
    %195 = vector.multi_reduction <add>, %194, %cst_62 [1] : vector<72x40xf32> to vector<72xf32>
    %196 = vector.shape_cast %195 : vector<72xf32> to vector<72x1xf32>
    %cst_63 = arith.constant 1.000000e+00 : f32
    %197 = vector.broadcast %cst_63 : f32 to vector<72x1xf32>
    %198 = arith.cmpf oge, %196, %197 : vector<72x1xf32>
    %199 = arith.select %198, %190, %186 : vector<72x1xi1>, vector<72x1xf32>
    %200 = arith.select %198, %187, %190 : vector<72x1xi1>, vector<72x1xf32>
    %c15_i32 = arith.constant 15 : i32
    %201 = arith.addf %199, %200 : vector<72x1xf32>
    %cst_64 = arith.constant 5.000000e-01 : f32
    %202 = vector.broadcast %cst_64 : f32 to vector<72x1xf32>
    %203 = arith.mulf %202, %201 : vector<72x1xf32>
    %204 = vector.broadcast %203 : vector<72x1xf32> to vector<72x40xf32>
    %205 = arith.subf %0, %204 : vector<72x40xf32>
    %cst_65 = arith.constant 0.000000e+00 : f32
    %206 = vector.broadcast %cst_65 : f32 to vector<72x40xf32>
    %207 = arith.maximumf %205, %206 : vector<72x40xf32>
    %cst_66 = arith.constant dense<0.000000e+00> : vector<72xf32>
    %208 = vector.multi_reduction <add>, %207, %cst_66 [1] : vector<72x40xf32> to vector<72xf32>
    %209 = vector.shape_cast %208 : vector<72xf32> to vector<72x1xf32>
    %cst_67 = arith.constant 1.000000e+00 : f32
    %210 = vector.broadcast %cst_67 : f32 to vector<72x1xf32>
    %211 = arith.cmpf oge, %209, %210 : vector<72x1xf32>
    %212 = arith.select %211, %203, %199 : vector<72x1xi1>, vector<72x1xf32>
    %213 = arith.select %211, %200, %203 : vector<72x1xi1>, vector<72x1xf32>
    %c16_i32 = arith.constant 16 : i32
    %214 = arith.addf %212, %213 : vector<72x1xf32>
    %cst_68 = arith.constant 5.000000e-01 : f32
    %215 = vector.broadcast %cst_68 : f32 to vector<72x1xf32>
    %216 = arith.mulf %215, %214 : vector<72x1xf32>
    %217 = vector.broadcast %216 : vector<72x1xf32> to vector<72x40xf32>
    %218 = arith.subf %0, %217 : vector<72x40xf32>
    %cst_69 = arith.constant 0.000000e+00 : f32
    %219 = vector.broadcast %cst_69 : f32 to vector<72x40xf32>
    %220 = arith.maximumf %218, %219 : vector<72x40xf32>
    %cst_70 = arith.constant dense<0.000000e+00> : vector<72xf32>
    %221 = vector.multi_reduction <add>, %220, %cst_70 [1] : vector<72x40xf32> to vector<72xf32>
    %222 = vector.shape_cast %221 : vector<72xf32> to vector<72x1xf32>
    %cst_71 = arith.constant 1.000000e+00 : f32
    %223 = vector.broadcast %cst_71 : f32 to vector<72x1xf32>
    %224 = arith.cmpf oge, %222, %223 : vector<72x1xf32>
    %225 = arith.select %224, %216, %212 : vector<72x1xi1>, vector<72x1xf32>
    %226 = arith.select %224, %213, %216 : vector<72x1xi1>, vector<72x1xf32>
    %c17_i32 = arith.constant 17 : i32
    %227 = arith.addf %225, %226 : vector<72x1xf32>
    %cst_72 = arith.constant 5.000000e-01 : f32
    %228 = vector.broadcast %cst_72 : f32 to vector<72x1xf32>
    %229 = arith.mulf %228, %227 : vector<72x1xf32>
    %230 = vector.broadcast %229 : vector<72x1xf32> to vector<72x40xf32>
    %231 = arith.subf %0, %230 : vector<72x40xf32>
    %cst_73 = arith.constant 0.000000e+00 : f32
    %232 = vector.broadcast %cst_73 : f32 to vector<72x40xf32>
    %233 = arith.maximumf %231, %232 : vector<72x40xf32>
    %cst_74 = arith.constant dense<0.000000e+00> : vector<72xf32>
    %234 = vector.multi_reduction <add>, %233, %cst_74 [1] : vector<72x40xf32> to vector<72xf32>
    %235 = vector.shape_cast %234 : vector<72xf32> to vector<72x1xf32>
    %cst_75 = arith.constant 1.000000e+00 : f32
    %236 = vector.broadcast %cst_75 : f32 to vector<72x1xf32>
    %237 = arith.cmpf oge, %235, %236 : vector<72x1xf32>
    %238 = arith.select %237, %229, %225 : vector<72x1xi1>, vector<72x1xf32>
    %239 = arith.select %237, %226, %229 : vector<72x1xi1>, vector<72x1xf32>
    %c18_i32 = arith.constant 18 : i32
    %240 = arith.addf %238, %239 : vector<72x1xf32>
    %cst_76 = arith.constant 5.000000e-01 : f32
    %241 = vector.broadcast %cst_76 : f32 to vector<72x1xf32>
    %242 = arith.mulf %241, %240 : vector<72x1xf32>
    %243 = vector.broadcast %242 : vector<72x1xf32> to vector<72x40xf32>
    %244 = arith.subf %0, %243 : vector<72x40xf32>
    %cst_77 = arith.constant 0.000000e+00 : f32
    %245 = vector.broadcast %cst_77 : f32 to vector<72x40xf32>
    %246 = arith.maximumf %244, %245 : vector<72x40xf32>
    %cst_78 = arith.constant dense<0.000000e+00> : vector<72xf32>
    %247 = vector.multi_reduction <add>, %246, %cst_78 [1] : vector<72x40xf32> to vector<72xf32>
    %248 = vector.shape_cast %247 : vector<72xf32> to vector<72x1xf32>
    %cst_79 = arith.constant 1.000000e+00 : f32
    %249 = vector.broadcast %cst_79 : f32 to vector<72x1xf32>
    %250 = arith.cmpf oge, %248, %249 : vector<72x1xf32>
    %251 = arith.select %250, %242, %238 : vector<72x1xi1>, vector<72x1xf32>
    %252 = arith.select %250, %239, %242 : vector<72x1xi1>, vector<72x1xf32>
    %c19_i32 = arith.constant 19 : i32
    %253 = arith.addf %251, %252 : vector<72x1xf32>
    %cst_80 = arith.constant 5.000000e-01 : f32
    %254 = vector.broadcast %cst_80 : f32 to vector<72x1xf32>
    %255 = arith.mulf %254, %253 : vector<72x1xf32>
    %256 = vector.broadcast %255 : vector<72x1xf32> to vector<72x40xf32>
    %257 = arith.subf %0, %256 : vector<72x40xf32>
    %cst_81 = arith.constant 0.000000e+00 : f32
    %258 = vector.broadcast %cst_81 : f32 to vector<72x40xf32>
    %259 = arith.maximumf %257, %258 : vector<72x40xf32>
    %cst_82 = arith.constant dense<0.000000e+00> : vector<72xf32>
    %260 = vector.multi_reduction <add>, %259, %cst_82 [1] : vector<72x40xf32> to vector<72xf32>
    %261 = vector.shape_cast %260 : vector<72xf32> to vector<72x1xf32>
    %cst_83 = arith.constant 1.000000e+00 : f32
    %262 = vector.broadcast %cst_83 : f32 to vector<72x1xf32>
    %263 = arith.cmpf oge, %261, %262 : vector<72x1xf32>
    %264 = arith.select %263, %255, %251 : vector<72x1xi1>, vector<72x1xf32>
    %265 = arith.select %263, %252, %255 : vector<72x1xi1>, vector<72x1xf32>
    %c20_i32 = arith.constant 20 : i32
    %266 = arith.addf %264, %265 : vector<72x1xf32>
    %cst_84 = arith.constant 5.000000e-01 : f32
    %267 = vector.broadcast %cst_84 : f32 to vector<72x1xf32>
    %268 = arith.mulf %267, %266 : vector<72x1xf32>
    %269 = vector.broadcast %268 : vector<72x1xf32> to vector<72x40xf32>
    %270 = arith.subf %0, %269 : vector<72x40xf32>
    %cst_85 = arith.constant 0.000000e+00 : f32
    %271 = vector.broadcast %cst_85 : f32 to vector<72x40xf32>
    %272 = arith.maximumf %270, %271 : vector<72x40xf32>
    %cst_86 = arith.constant dense<0.000000e+00> : vector<72xf32>
    %273 = vector.multi_reduction <add>, %272, %cst_86 [1] : vector<72x40xf32> to vector<72xf32>
    %274 = vector.shape_cast %273 : vector<72xf32> to vector<72x1xf32>
    %cst_87 = arith.constant 1.000000e+00 : f32
    %275 = vector.broadcast %cst_87 : f32 to vector<72x1xf32>
    %276 = arith.cmpf oge, %274, %275 : vector<72x1xf32>
    %277 = arith.select %276, %268, %264 : vector<72x1xi1>, vector<72x1xf32>
    %278 = arith.select %276, %265, %268 : vector<72x1xi1>, vector<72x1xf32>
    %c21_i32 = arith.constant 21 : i32
    %279 = arith.addf %277, %278 : vector<72x1xf32>
    %cst_88 = arith.constant 5.000000e-01 : f32
    %280 = vector.broadcast %cst_88 : f32 to vector<72x1xf32>
    %281 = arith.mulf %280, %279 : vector<72x1xf32>
    %282 = vector.broadcast %281 : vector<72x1xf32> to vector<72x40xf32>
    %283 = arith.subf %0, %282 : vector<72x40xf32>
    %cst_89 = arith.constant 0.000000e+00 : f32
    %284 = vector.broadcast %cst_89 : f32 to vector<72x40xf32>
    %285 = arith.maximumf %283, %284 : vector<72x40xf32>
    %cst_90 = arith.constant dense<0.000000e+00> : vector<72xf32>
    %286 = vector.multi_reduction <add>, %285, %cst_90 [1] : vector<72x40xf32> to vector<72xf32>
    %287 = vector.shape_cast %286 : vector<72xf32> to vector<72x1xf32>
    %cst_91 = arith.constant 1.000000e+00 : f32
    %288 = vector.broadcast %cst_91 : f32 to vector<72x1xf32>
    %289 = arith.cmpf oge, %287, %288 : vector<72x1xf32>
    %290 = arith.select %289, %281, %277 : vector<72x1xi1>, vector<72x1xf32>
    %291 = arith.select %289, %278, %281 : vector<72x1xi1>, vector<72x1xf32>
    %c22_i32 = arith.constant 22 : i32
    %292 = arith.addf %290, %291 : vector<72x1xf32>
    %cst_92 = arith.constant 5.000000e-01 : f32
    %293 = vector.broadcast %cst_92 : f32 to vector<72x1xf32>
    %294 = arith.mulf %293, %292 : vector<72x1xf32>
    %295 = vector.broadcast %294 : vector<72x1xf32> to vector<72x40xf32>
    %296 = arith.subf %0, %295 : vector<72x40xf32>
    %cst_93 = arith.constant 0.000000e+00 : f32
    %297 = vector.broadcast %cst_93 : f32 to vector<72x40xf32>
    %298 = arith.maximumf %296, %297 : vector<72x40xf32>
    %cst_94 = arith.constant dense<0.000000e+00> : vector<72xf32>
    %299 = vector.multi_reduction <add>, %298, %cst_94 [1] : vector<72x40xf32> to vector<72xf32>
    %300 = vector.shape_cast %299 : vector<72xf32> to vector<72x1xf32>
    %cst_95 = arith.constant 1.000000e+00 : f32
    %301 = vector.broadcast %cst_95 : f32 to vector<72x1xf32>
    %302 = arith.cmpf oge, %300, %301 : vector<72x1xf32>
    %303 = arith.select %302, %294, %290 : vector<72x1xi1>, vector<72x1xf32>
    %304 = arith.select %302, %291, %294 : vector<72x1xi1>, vector<72x1xf32>
    %c23_i32 = arith.constant 23 : i32
    %305 = arith.addf %303, %304 : vector<72x1xf32>
    %cst_96 = arith.constant 5.000000e-01 : f32
    %306 = vector.broadcast %cst_96 : f32 to vector<72x1xf32>
    %307 = arith.mulf %306, %305 : vector<72x1xf32>
    %308 = vector.broadcast %307 : vector<72x1xf32> to vector<72x40xf32>
    %309 = arith.subf %0, %308 : vector<72x40xf32>
    %cst_97 = arith.constant 0.000000e+00 : f32
    %310 = vector.broadcast %cst_97 : f32 to vector<72x40xf32>
    %311 = arith.maximumf %309, %310 : vector<72x40xf32>
    %cst_98 = arith.constant dense<0.000000e+00> : vector<72xf32>
    %312 = vector.multi_reduction <add>, %311, %cst_98 [1] : vector<72x40xf32> to vector<72xf32>
    %313 = vector.shape_cast %312 : vector<72xf32> to vector<72x1xf32>
    %cst_99 = arith.constant 1.000000e+00 : f32
    %314 = vector.broadcast %cst_99 : f32 to vector<72x1xf32>
    %315 = arith.cmpf oge, %313, %314 : vector<72x1xf32>
    %316 = arith.select %315, %307, %303 : vector<72x1xi1>, vector<72x1xf32>
    %317 = arith.select %315, %304, %307 : vector<72x1xi1>, vector<72x1xf32>
    %c24_i32 = arith.constant 24 : i32
    %318 = arith.addf %316, %317 : vector<72x1xf32>
    %cst_100 = arith.constant 5.000000e-01 : f32
    %319 = vector.broadcast %cst_100 : f32 to vector<72x1xf32>
    %320 = arith.mulf %319, %318 : vector<72x1xf32>
    %321 = vector.broadcast %320 : vector<72x1xf32> to vector<72x40xf32>
    %322 = arith.subf %0, %321 : vector<72x40xf32>
    %cst_101 = arith.constant 0.000000e+00 : f32
    %323 = vector.broadcast %cst_101 : f32 to vector<72x40xf32>
    %324 = arith.maximumf %322, %323 : vector<72x40xf32>
    %cst_102 = arith.constant dense<0.000000e+00> : vector<72xf32>
    %325 = vector.multi_reduction <add>, %324, %cst_102 [1] : vector<72x40xf32> to vector<72xf32>
    %326 = vector.shape_cast %325 : vector<72xf32> to vector<72x1xf32>
    %cst_103 = arith.constant 1.000000e+00 : f32
    %327 = vector.broadcast %cst_103 : f32 to vector<72x1xf32>
    %328 = arith.cmpf oge, %326, %327 : vector<72x1xf32>
    %329 = arith.select %328, %320, %316 : vector<72x1xi1>, vector<72x1xf32>
    %330 = arith.select %328, %317, %320 : vector<72x1xi1>, vector<72x1xf32>
    %c25_i32 = arith.constant 25 : i32
    %331 = arith.addf %329, %330 : vector<72x1xf32>
    %cst_104 = arith.constant 5.000000e-01 : f32
    %332 = vector.broadcast %cst_104 : f32 to vector<72x1xf32>
    %333 = arith.mulf %332, %331 : vector<72x1xf32>
    %334 = vector.broadcast %333 : vector<72x1xf32> to vector<72x40xf32>
    %335 = arith.subf %0, %334 : vector<72x40xf32>
    %cst_105 = arith.constant 0.000000e+00 : f32
    %336 = vector.broadcast %cst_105 : f32 to vector<72x40xf32>
    %337 = arith.maximumf %335, %336 : vector<72x40xf32>
    %cst_106 = arith.constant dense<0.000000e+00> : vector<72xf32>
    %338 = vector.multi_reduction <add>, %337, %cst_106 [1] : vector<72x40xf32> to vector<72xf32>
    %339 = vector.shape_cast %338 : vector<72xf32> to vector<72x1xf32>
    %cst_107 = arith.constant 1.000000e+00 : f32
    %340 = vector.broadcast %cst_107 : f32 to vector<72x1xf32>
    %341 = arith.cmpf oge, %339, %340 : vector<72x1xf32>
    %342 = arith.select %341, %333, %329 : vector<72x1xi1>, vector<72x1xf32>
    %343 = arith.select %341, %330, %333 : vector<72x1xi1>, vector<72x1xf32>
    %344 = arith.addf %342, %343 : vector<72x1xf32>
    %cst_108 = arith.constant 5.000000e-01 : f32
    %345 = vector.broadcast %cst_108 : f32 to vector<72x1xf32>
    %346 = arith.mulf %345, %344 : vector<72x1xf32>
    %347 = vector.broadcast %346 : vector<72x1xf32> to vector<72x40xf32>
    %348 = arith.cmpf oge, %0, %347 : vector<72x40xf32>
    %cst_109 = arith.constant 0.000000e+00 : f32
    %349 = vector.broadcast %cst_109 : f32 to vector<72x40xf32>
    %350 = arith.select %348, %0, %349 : vector<72x40xi1>, vector<72x40xf32>
    %351 = arith.extui %348 : vector<72x40xi1> to vector<72x40xi32>
    %352 = arith.sitofp %351 : vector<72x40xi32> to vector<72x40xf32>
    %cst_110 = arith.constant dense<0.000000e+00> : vector<72xf32>
    %353 = vector.multi_reduction <add>, %352, %cst_110 [1] : vector<72x40xf32> to vector<72xf32>
    %354 = vector.shape_cast %353 : vector<72xf32> to vector<72x1xf32>
    %cst_111 = arith.constant dense<0.000000e+00> : vector<72xf32>
    %355 = vector.multi_reduction <add>, %350, %cst_111 [1] : vector<72x40xf32> to vector<72xf32>
    %356 = vector.shape_cast %355 : vector<72xf32> to vector<72x1xf32>
    %357 = arith.mulf %350, %0 : vector<72x40xf32>
    %cst_112 = arith.constant dense<0.000000e+00> : vector<72xf32>
    %358 = vector.multi_reduction <add>, %357, %cst_112 [1] : vector<72x40xf32> to vector<72xf32>
    %359 = vector.shape_cast %358 : vector<72xf32> to vector<72x1xf32>
    %cst_113 = arith.constant 1.000000e+00 : f32
    %360 = vector.broadcast %cst_113 : f32 to vector<72x1xf32>
    %361 = arith.subf %356, %360 : vector<72x1xf32>
    %362 = arith.divf %361, %354 : vector<72x1xf32>
    %363 = arith.mulf %354, %362 : vector<72x1xf32>
    %364 = arith.mulf %363, %362 : vector<72x1xf32>
    %365 = arith.subf %359, %364 : vector<72x1xf32>
    %366 = tpu.iota {dimensions = array<i32: 1>} : vector<72x40xi32>
    %367 = vector.broadcast %1 : vector<72x1xi32> to vector<72x40xi32>
    %368 = arith.cmpi eq, %366, %367 : vector<72x40xi32>
    %cst_114 = arith.constant 0.000000e+00 : f32
    %369 = vector.broadcast %cst_114 : f32 to vector<72x40xf32>
    %370 = arith.select %368, %0, %369 : vector<72x40xi1>, vector<72x40xf32>
    %cst_115 = arith.constant dense<0.000000e+00> : vector<72xf32>
    %371 = vector.multi_reduction <add>, %370, %cst_115 [1] : vector<72x40xf32> to vector<72xf32>
    %372 = vector.shape_cast %371 : vector<72xf32> to vector<72x1xf32>
    %cst_116 = arith.constant 5.000000e-01 : f32
    %373 = vector.broadcast %cst_116 : f32 to vector<72x1xf32>
    %374 = arith.mulf %373, %365 : vector<72x1xf32>
    %375 = arith.subf %374, %372 : vector<72x1xf32>
    %cst_117 = arith.constant 5.000000e-01 : f32
    %376 = vector.broadcast %cst_117 : f32 to vector<72x1xf32>
    %377 = arith.addf %375, %376 : vector<72x1xf32>
    %cst_118 = arith.constant 0.000000e+00 : f32
    %378 = vector.broadcast %cst_118 : f32 to vector<72x1xf32>
    %379 = arith.maximumf %377, %378 : vector<72x1xf32>
    %c0_119 = arith.constant 0 : index
    %c0_120 = arith.constant 0 : index
    %380 = vector.load %arg3[%c0_119, %c0_120] : memref<72x1xf32, #tpu.memory_space<vmem>>, vector<72x1xf32>
    tpu.vector_store %arg3[%c0_119, %c0_120], %379 {strides = array<i32>} : memref<72x1xf32, #tpu.memory_space<vmem>>, vector<72x1xf32>,
    return
  }
  func.func @transform_0(%arg0: i32) -> (i32, i32) {
    %c0_i32 = arith.constant 0 : i32
    %c0_i32_0 = arith.constant 0 : i32
    return %arg0, %c0_i32 : i32, i32
  }
  func.func @transform_1(%arg0: i32) -> (i32, i32) {
    %c0_i32 = arith.constant 0 : i32
    %c0_i32_0 = arith.constant 0 : i32
    return %arg0, %c0_i32 : i32, i32
  }
  func.func @transform_2(%arg0: i32) -> (i32, i32) {
    %c0_i32 = arith.constant 0 : i32
    %c0_i32_0 = arith.constant 0 : i32
    return %arg0, %c0_i32 : i32, i32
  }
}

</mosaic_0001>

<bundles_post_ra>
// kernel: sparsemax_loss.1
= control target key start
LH: loop header
LB: loop body
LE: loop exit
PB: predicated region body
PF: predicated region fallthrough
CT: control target
= control target key end

     0   :  { %vm29_vm0 = vcmask 326656   ;;  %s6846_s0 = inlined_call_operand.vmem [shape: f32[72,40], index: 0, kind: input, shape index: {}]   ;;  %s6847_s1 = inlined_call_operand.vmem [shape: s32[72,1], index: 1, kind: input, shape index: {}]   ;;  %s6848_s2 = inlined_call_operand.vmem [shape: f32[72,1], index: 2, kind: output, shape index: {}]  }
   0x1   :  { %v2833_v0 = vld [vmem:[%s6846_s0] sm:$0xff]  ;;  %v2838_v1 = vld [vmem:[%s6846_s0 + $0x10] sm:$0xff]  ;;  %v2843_v2 = vld [vmem:[%s6846_s0 + $0x8] sm:$0xff] }
   0x2   :  { %v30_v3 = vsel %vm29_vm0, %v2833_v0, -inf  ;;  %v36_v4 = vsel %vm29_vm0, %v2838_v1, -inf  ;;  %v2852_v5 = vld [vmem:[%s6846_s0 + $0x18] sm:$0xff]  ;;  %v33_v6 = vsel %vm29_vm0, %v2843_v2, -inf  ;;  %v2861_v8 = vld [vmem:[%s6846_s0 + $0x20] sm:$0xff]  ;;  %v2866_v9 = vld [vmem:[%s6846_s0 + $0x28] sm:$0xff] }
   0x3   :  { %31 = vmax.xlane.f32.xlu0 %v30_v3  ;;  %37 = vmax.xlane.f32.xlu1 %v36_v4  ;;  %v39_v7 = vsel %vm29_vm0, %v2852_v5, -inf  ;;  %v42_v10 = vsel %vm29_vm0, %v2861_v8, -inf  ;;  %v45_v11 = vsel %vm29_vm0, %v2866_v9, -inf  ;;  %v2875_v12 = vld [vmem:[%s6846_s0 + $0x30] sm:$0xff]  ;;  %v2880_v13 = vld [vmem:[%s6846_s0 + $0x38] sm:$0xff]  ;;  %v2889_v16 = vld [vmem:[%s6846_s0 + $0x40] sm:$0xff] }
   0x4   :  { %v48_v14 = vsel %vm29_vm0, %v2875_v12, -inf  ;;  %v51_v15 = vsel %vm29_vm0, %v2880_v13, -inf  ;;  %v54_v17 = vsel %vm29_vm0, %v2889_v16, -inf }
   0x7   :  { %34 = vmax.xlane.f32.xlu0 %v33_v6  ;;  %40 = vmax.xlane.f32.xlu1 %v39_v7 }
   0xb   :  { %43 = vmax.xlane.f32.xlu0 %v42_v10  ;;  %46 = vmax.xlane.f32.xlu1 %v45_v11 }
   0xf   :  { %49 = vmax.xlane.f32.xlu0 %v48_v14  ;;  %52 = vmax.xlane.f32.xlu1 %v51_v15 }
  0x13   :  { %55 = vmax.xlane.f32.xlu0 %v54_v17 }
  0x90   :  { %v2893_v18 = vpop.xlane.xlu0 %31  ;;  %v2895_v19 = vpop.xlane.xlu1 %37 }
  0x91   :  { %v2898_v20 = vadd.f32 -1.0, %v2893_v18  ;;  %v2901_v21 = vadd.f32 -1.0, %v2895_v19 }
  0x93   :  { %v66_v22 = vadd.f32 %v2898_v20, %v2893_v18  ;;  %v68_v23 = vadd.f32 %v2901_v21, %v2895_v19 }
  0x94   :  { %v2907_v24 = vpop.xlane.xlu0 %34  ;;  %v2909_v25 = vpop.xlane.xlu1 %40 }
  0x95   :  { %v2911_v26 = vmul.f32 0.5, %v66_v22  ;;  %v2913_v27 = vmul.f32 0.5, %v68_v23  ;;  %v2916_v28 = vadd.f32 -1.0, %v2907_v24  ;;  %v2919_v29 = vadd.f32 -1.0, %v2909_v25 }
  0x97   :  { %v67_v30 = vadd.f32 %v2916_v28, %v2907_v24  ;;  %v69_v31 = vadd.f32 %v2919_v29, %v2909_v25  ;;  %v84_v32 = vsub.f32 %v2833_v0, %v2911_v26  ;;  %v86_v35 = vsub.f32 %v2838_v1, %v2913_v27 }
  0x98   :  { %v2927_v33 = vpop.xlane.xlu0 %43  ;;  %v2929_v34 = vpop.xlane.xlu1 %46 }
  0x99   :  { %v2933_v36 = vmul.f32 0.5, %v67_v30  ;;  %v2935_v37 = vmul.f32 0.5, %v69_v31  ;;  %v2938_v38 = vadd.f32 -1.0, %v2927_v33  ;;  %v2941_v39 = vadd.f32 -1.0, %v2929_v34 }
  0x9a   :  { %v93_v40 = vmax.f32 %v84_v32, 0.0  ;;  %v95_v47 = vmax.f32 %v86_v35, 0.0 }
  0x9b   :  { %v70_v41 = vadd.f32 %v2938_v38, %v2927_v33  ;;  %v71_v42 = vadd.f32 %v2941_v39, %v2929_v34  ;;  %v85_v43 = vsub.f32 %v2843_v2, %v2933_v36  ;;  %v87_v48 = vsub.f32 %v2852_v5, %v2935_v37 }
  0x9c   :  { %v102_v44 = vsel %vm29_vm0, %v93_v40, 0.0  ;;  %v2950_v45 = vpop.xlane.xlu0 %49  ;;  %v2952_v46 = vpop.xlane.xlu1 %52  ;;  %v108_v57 = vsel %vm29_vm0, %v95_v47, 0.0 }
  0x9d   :  { %v2956_v49 = vmul.f32 0.5, %v70_v41  ;;  %v2958_v50 = vmul.f32 0.5, %v71_v42  ;;  %103 = vadd.xlane.f32.xlu1 %v102_v44  ;;  %v2961_v51 = vadd.f32 -1.0, %v2950_v45  ;;  %v2964_v52 = vadd.f32 -1.0, %v2952_v46 }
  0x9e   :  { %v94_v53 = vmax.f32 %v85_v43, 0.0  ;;  %v96_v60 = vmax.f32 %v87_v48, 0.0 }
  0x9f   :  { %v72_v54 = vadd.f32 %v2961_v51, %v2950_v45  ;;  %v73_v55 = vadd.f32 %v2964_v52, %v2952_v46  ;;  %v88_v56 = vsub.f32 %v2861_v8, %v2956_v49  ;;  %v89_v61 = vsub.f32 %v2866_v9, %v2958_v50 }
  0xa0   :  { %v105_v58 = vsel %vm29_vm0, %v94_v53, 0.0  ;;  %v2974_v59 = vpop.xlane.xlu0 %55  ;;  %v111_v11 = vsel %vm29_vm0, %v96_v60, 0.0 }
  0xa1   :  { %v2978_v62 = vmul.f32 0.5, %v72_v54  ;;  %v2980_v63 = vmul.f32 0.5, %v73_v55  ;;  %109 = vadd.xlane.f32.xlu1 %v108_v57  ;;  %106 = vadd.xlane.f32.xlu0 %v105_v58  ;;  %v2983_v3 = vadd.f32 -1.0, %v2974_v59  ;;  %v97_v4 = vmax.f32 %v88_v56, 0.0 }
  0xa2   :  { %v98_v14 = vmax.f32 %v89_v61, 0.0 }
  0xa3   :  { %v74_v6 = vadd.f32 %v2983_v3, %v2974_v59  ;;  %v114_v7 = vsel %vm29_vm0, %v97_v4, 0.0  ;;  %v90_v10 = vsub.f32 %v2875_v12, %v2978_v62  ;;  %v91_v15 = vsub.f32 %v2880_v13, %v2980_v63 }
  0xa4   :  { %v117_v31 = vsel %vm29_vm0, %v98_v14, 0.0 }
  0xa5   :  { %v2993_v17 = vmul.f32 0.5, %v74_v6  ;;  %112 = vadd.xlane.f32.xlu0 %v111_v11  ;;  %115 = vadd.xlane.f32.xlu1 %v114_v7  ;;  %v99_v22 = vmax.f32 %v90_v10, 0.0  ;;  %v100_v32 = vmax.f32 %v91_v15, 0.0 }
  0xa7   :  { %v120_v23 = vsel %vm29_vm0, %v99_v22, 0.0  ;;  %v92_v30 = vsub.f32 %v2889_v16, %v2993_v17  ;;  %v123_v41 = vsel %vm29_vm0, %v100_v32, 0.0 }
  0xa9   :  { %118 = vadd.xlane.f32.xlu0 %v117_v31  ;;  %121 = vadd.xlane.f32.xlu1 %v120_v23  ;;  %v101_v35 = vmax.f32 %v92_v30, 0.0 }
  0xab   :  { %v126_v40 = vsel %vm29_vm0, %v101_v35, 0.0 }
  0xad   :  { %124 = vadd.xlane.f32.xlu0 %v123_v41  ;;  %127 = vadd.xlane.f32.xlu1 %v126_v40 }
 0x12a   :  { %v104_v42 = vpop.xlane.xlu1 %103 }
 0x12b   :  { %vm129_vm1 = vcmp.ge.f32.partialorder %v104_v42, 1.0 }
 0x12c   :  { %v3003_v43 = vsel %vm129_vm1, %v2911_v26, %v2898_v20  ;;  %v3007_v44 = vsel %vm129_vm1, %v2893_v18, %v2911_v26 }
 0x12d   :  { %v156_v47 = vadd.f32 %v3007_v44, %v3003_v43 }
 0x12e   :  { %v110_v48 = vpop.xlane.xlu1 %109  ;;  %v107_v53 = vpop.xlane.xlu0 %106 }
 0x12f   :  { %v3011_v54 = vmul.f32 0.5, %v156_v47  ;;  %vm131_vm2 = vcmp.ge.f32.partialorder %v110_v48, 1.0  ;;  %vm130_vm3 = vcmp.ge.f32.partialorder %v107_v53, 1.0 }
 0x130   :  { %v3015_v55 = vsel %vm131_vm2, %v2913_v27, %v2901_v21  ;;  %v3019_v20 = vsel %vm131_vm2, %v2895_v19, %v2913_v27  ;;  %v3023_v18 = vsel %vm130_vm3, %v2933_v36, %v2916_v28  ;;  %v3027_v26 = vsel %vm130_vm3, %v2907_v24, %v2933_v36 }
 0x131   :  { %v158_v56 = vadd.f32 %v3019_v20, %v3015_v55  ;;  %v157_v57 = vadd.f32 %v3027_v26, %v3023_v18  ;;  %v174_v21 = vsub.f32 %v2833_v0, %v3011_v54 }
 0x132   :  { %v116_v58 = vpop.xlane.xlu1 %115  ;;  %v113_v19 = vpop.xlane.xlu0 %112 }
 0x133   :  { %v3035_v27 = vmul.f32 0.5, %v158_v56  ;;  %v3037_v60 = vmul.f32 0.5, %v157_v57  ;;  %vm133_vm4 = vcmp.ge.f32.partialorder %v116_v58, 1.0  ;;  %vm132_vm5 = vcmp.ge.f32.partialorder %v113_v19, 1.0 }
 0x134   :  { %v3041_v24 = vsel %vm133_vm4, %v2956_v49, %v2938_v38  ;;  %v3045_v28 = vsel %vm133_vm4, %v2927_v33, %v2956_v49  ;;  %v3049_v36 = vsel %vm132_vm5, %v2935_v37, %v2919_v29  ;;  %v3053_v61 = vsel %vm132_vm5, %v2909_v25, %v2935_v37 }
 0x135   :  { %v160_v4 = vadd.f32 %v3045_v28, %v3041_v24  ;;  %v159_v6 = vadd.f32 %v3053_v61, %v3049_v36  ;;  %v183_v38 = vmax.f32 %v174_v21, 0.0  ;;  %v176_v7 = vsub.f32 %v2838_v1, %v3035_v27 }
 0x136   :  { %v122_v33 = vpop.xlane.xlu1 %121  ;;  %v119_v49 = vpop.xlane.xlu0 %118  ;;  %v175_v29 = vsub.f32 %v2843_v2, %v3037_v60 }
 0x137   :  { %v3063_v10 = vmul.f32 0.5, %v160_v4  ;;  %v3065_v11 = vmul.f32 0.5, %v159_v6  ;;  %v192_v25 = vsel %vm29_vm0, %v183_v38, 0.0  ;;  %vm135_vm6 = vcmp.ge.f32.partialorder %v122_v33, 1.0 }
 0x138   :  { %193 = vadd.xlane.f32.xlu0 %v192_v25  ;;  %v3070_v37 = vsel %vm135_vm6, %v2978_v62, %v2961_v51  ;;  %v3074_v14 = vsel %vm135_vm6, %v2950_v45, %v2978_v62  ;;  %vm134_vm7 = vcmp.ge.f32.partialorder %v119_v49, 1.0  ;;  %v185_v15 = vmax.f32 %v176_v7, 0.0 }
 0x139   :  { %v162_v22 = vadd.f32 %v3074_v14, %v3070_v37  ;;  %v3080_v23 = vsel %vm134_vm7, %v2958_v50, %v2941_v39  ;;  %v3084_v30 = vsel %vm134_vm7, %v2929_v34, %v2958_v50  ;;  %v184_v31 = vmax.f32 %v175_v29, 0.0 }
 0x13a   :  { %v161_v51 = vadd.f32 %v3084_v30, %v3080_v23  ;;  %v198_v45 = vsel %vm29_vm0, %v185_v15, 0.0  ;;  %v128_v62 = vpop.xlane.xlu1 %127  ;;  %v125_v32 = vpop.xlane.xlu0 %124  ;;  %v178_v35 = vsub.f32 %v2861_v8, %v3063_v10  ;;  %v177_v40 = vsub.f32 %v2852_v5, %v3065_v11 }
 0x13b   :  { %v3093_v39 = vmul.f32 0.5, %v162_v22  ;;  %vm137_vm8 = vcmp.ge.f32.partialorder %v128_v62, 1.0  ;;  %v195_v34 = vsel %vm29_vm0, %v184_v31, 0.0  ;;  %vm136_vm9 = vcmp.ge.f32.partialorder %v125_v32, 1.0 }
 0x13c   :  { %v3096_v50 = vmul.f32 0.5, %v161_v51  ;;  %199 = vadd.xlane.f32.xlu0 %v198_v45  ;;  %v3100_v41 = vsel %vm137_vm8, %v2993_v17, %v2983_v3  ;;  %v3104_v42 = vsel %vm137_vm8, %v2974_v59, %v2993_v17  ;;  %196 = vadd.xlane.f32.xlu1 %v195_v34  ;;  %v3108_v47 = vsel %vm136_vm9, %v2980_v63, %v2964_v52 }
 0x13d   :  { %v164_v48 = vadd.f32 %v3104_v42, %v3100_v41  ;;  %v3114_v53 = vsel %vm136_vm9, %v2952_v46, %v2980_v63  ;;  %v187_v56 = vmax.f32 %v178_v35, 0.0  ;;  %v186_v57 = vmax.f32 %v177_v40, 0.0 }
 0x13e   :  { %v163_v3 = vadd.f32 %v3114_v53, %v3108_v47  ;;  %v180_v59 = vsub.f32 %v2875_v12, %v3093_v39  ;;  %v179_v17 = vsub.f32 %v2866_v9, %v3096_v50 }
 0x13f   :  { %v3122_v52 = vmul.f32 0.5, %v164_v48  ;;  %v204_v21 = vsel %vm29_vm0, %v187_v56, 0.0  ;;  %v201_v58 = vsel %vm29_vm0, %v186_v57, 0.0 }
 0x140   :  { %v3126_v19 = vmul.f32 0.5, %v163_v3  ;;  %205 = vadd.xlane.f32.xlu0 %v204_v21  ;;  %202 = vadd.xlane.f32.xlu1 %v201_v58  ;;  %v189_v46 = vmax.f32 %v180_v59, 0.0  ;;  %v188_v63 = vmax.f32 %v179_v17, 0.0 }
 0x141   :  { %v182_v4 = vsub.f32 %v2889_v16, %v3122_v52 }
 0x142   :  { %v210_v6 = vsel %vm29_vm0, %v189_v46, 0.0  ;;  %v207_v38 = vsel %vm29_vm0, %v188_v63, 0.0  ;;  %v181_v7 = vsub.f32 %v2880_v13, %v3126_v19 }
 0x143   :  { %v191_v33 = vmax.f32 %v182_v4, 0.0 }
 0x144   :  { %211 = vadd.xlane.f32.xlu0 %v210_v6  ;;  %208 = vadd.xlane.f32.xlu1 %v207_v38  ;;  %v190_v49 = vmax.f32 %v181_v7, 0.0 }
 0x145   :  { %v216_v29 = vsel %vm29_vm0, %v191_v33, 0.0 }
 0x146   :  { %v213_v25 = vsel %vm29_vm0, %v190_v49, 0.0 }
 0x148   :  { %217 = vadd.xlane.f32.xlu0 %v216_v29  ;;  %214 = vadd.xlane.f32.xlu1 %v213_v25 }
 0x1c5   :  { %v194_v15 = vpop.xlane.xlu0 %193 }
 0x1c6   :  { %vm219_vm10 = vcmp.ge.f32.partialorder %v194_v15, 1.0 }
 0x1c7   :  { %v3138_v22 = vsel %vm219_vm10, %v3011_v54, %v3003_v43  ;;  %v3142_v31 = vsel %vm219_vm10, %v3007_v44, %v3011_v54 }
 0x1c8   :  { %v246_v51 = vadd.f32 %v3142_v31, %v3138_v22 }
 0x1c9   :  { %v197_v45 = vpop.xlane.xlu1 %196  ;;  %v200_v62 = vpop.xlane.xlu0 %199 }
 0x1ca   :  { %v3146_v32 = vmul.f32 0.5, %v246_v51  ;;  %vm220_vm11 = vcmp.ge.f32.partialorder %v197_v45, 1.0  ;;  %vm221_vm12 = vcmp.ge.f32.partialorder %v200_v62, 1.0 }
 0x1cb   :  { %v3150_v35 = vsel %vm220_vm11, %v3037_v60, %v3023_v18  ;;  %v3154_v43 = vsel %vm220_vm11, %v3027_v26, %v3037_v60  ;;  %v3158_v44 = vsel %vm221_vm12, %v3035_v27, %v3015_v55  ;;  %v3162_v54 = vsel %vm221_vm12, %v3019_v20, %v3035_v27 }
 0x1cc   :  { %v247_v40 = vadd.f32 %v3154_v43, %v3150_v35  ;;  %v248_v34 = vadd.f32 %v3162_v54, %v3158_v44  ;;  %v264_v18 = vsub.f32 %v2833_v0, %v3146_v32 }
 0x1cd   :  { %v203_v48 = vpop.xlane.xlu1 %202  ;;  %v206_v26 = vpop.xlane.xlu0 %205 }
 0x1ce   :  { %v3170_v60 = vmul.f32 0.5, %v247_v40  ;;  %v3172_v56 = vmul.f32 0.5, %v248_v34  ;;  %vm222_vm13 = vcmp.ge.f32.partialorder %v203_v48, 1.0  ;;  %vm223_vm14 = vcmp.ge.f32.partialorder %v206_v26, 1.0 }
 0x1cf   :  { %v3176_v55 = vsel %vm222_vm13, %v3065_v11, %v3049_v36  ;;  %v3180_v20 = vsel %vm222_vm13, %v3053_v61, %v3065_v11  ;;  %v3184_v27 = vsel %vm223_vm14, %v3063_v10, %v3041_v24  ;;  %v3188_v57 = vsel %vm223_vm14, %v3045_v28, %v3063_v10 }
 0x1d0   :  { %v249_v3 = vadd.f32 %v3180_v20, %v3176_v55  ;;  %v250_v59 = vadd.f32 %v3188_v57, %v3184_v27  ;;  %v273_v36 = vmax.f32 %v264_v18, 0.0  ;;  %v265_v17 = vsub.f32 %v2843_v2, %v3170_v60 }
 0x1d1   :  { %v209_v61 = vpop.xlane.xlu1 %208  ;;  %v212_v11 = vpop.xlane.xlu0 %211  ;;  %v266_v24 = vsub.f32 %v2838_v1, %v3172_v56 }
 0x1d2   :  { %v3198_v21 = vmul.f32 0.5, %v249_v3  ;;  %v3200_v58 = vmul.f32 0.5, %v250_v59  ;;  %vm224_vm15 = vcmp.ge.f32.partialorder %v209_v61, 1.0  ;;  %v282_v28 = vsel %vm29_vm0, %v273_v36, 0.0 }
 0x1d3   :  { %v3205_v10 = vsel %vm224_vm15, %v3096_v50, %v3080_v23  ;;  %v3209_v46 = vsel %vm224_vm15, %v3084_v30, %v3096_v50  ;;  %283 = vadd.xlane.f32.xlu1 %v282_v28  ;;  %vm225_vm1 = vcmp.ge.f32.partialorder %v212_v11, 1.0  ;;  %v274_v63 = vmax.f32 %v265_v17, 0.0 }
 0x1d4   :  { %v251_v4 = vadd.f32 %v3209_v46, %v3205_v10  ;;  %v3215_v6 = vsel %vm225_vm1, %v3093_v39, %v3070_v37  ;;  %v3219_v38 = vsel %vm225_vm1, %v3074_v14, %v3093_v39  ;;  %v275_v23 = vmax.f32 %v266_v24, 0.0 }
 0x1d5   :  { %v252_v7 = vadd.f32 %v3219_v38, %v3215_v6  ;;  %v285_v30 = vsel %vm29_vm0, %v274_v63, 0.0  ;;  %v215_v50 = vpop.xlane.xlu1 %214  ;;  %v218_v33 = vpop.xlane.xlu0 %217  ;;  %v267_v49 = vsub.f32 %v2852_v5, %v3198_v21  ;;  %v268_v29 = vsub.f32 %v2861_v8, %v3200_v58 }
 0x1d6   :  { %v3228_v37 = vmul.f32 0.5, %v251_v4  ;;  %286 = vadd.xlane.f32.xlu0 %v285_v30  ;;  %vm226_vm2 = vcmp.ge.f32.partialorder %v215_v50, 1.0  ;;  %v288_v14 = vsel %vm29_vm0, %v275_v23, 0.0  ;;  %vm227_vm3 = vcmp.ge.f32.partialorder %v218_v33, 1.0 }
 0x1d7   :  { %v3231_v39 = vmul.f32 0.5, %v252_v7  ;;  %v3235_v25 = vsel %vm226_vm2, %v3126_v19, %v3108_v47  ;;  %v3239_v15 = vsel %vm226_vm2, %v3114_v53, %v3126_v19  ;;  %289 = vadd.xlane.f32.xlu1 %v288_v14  ;;  %v3243_v51 = vsel %vm227_vm3, %v3122_v52, %v3100_v41 }
 0x1d8   :  { %v253_v45 = vadd.f32 %v3239_v15, %v3235_v25  ;;  %v3249_v62 = vsel %vm227_vm3, %v3104_v42, %v3122_v52  ;;  %v276_v40 = vmax.f32 %v267_v49, 0.0  ;;  %v277_v34 = vmax.f32 %v268_v29, 0.0 }
 0x1d9   :  { %v254_v47 = vadd.f32 %v3249_v62, %v3243_v51  ;;  %v269_v53 = vsub.f32 %v2866_v9, %v3228_v37  ;;  %v270_v19 = vsub.f32 %v2875_v12, %v3231_v39 }
 0x1da   :  { %v3257_v41 = vmul.f32 0.5, %v253_v45  ;;  %v291_v18 = vsel %vm29_vm0, %v276_v40, 0.0  ;;  %v294_v48 = vsel %vm29_vm0, %v277_v34, 0.0 }
 0x1db   :  { %v3261_v26 = vmul.f32 0.5, %v254_v47  ;;  %292 = vadd.xlane.f32.xlu0 %v291_v18  ;;  %295 = vadd.xlane.f32.xlu1 %v294_v48  ;;  %v278_v42 = vmax.f32 %v269_v53, 0.0  ;;  %v279_v52 = vmax.f32 %v270_v19, 0.0 }
 0x1dc   :  { %v271_v3 = vsub.f32 %v2880_v13, %v3257_v41 }
 0x1dd   :  { %v297_v59 = vsel %vm29_vm0, %v278_v42, 0.0  ;;  %v300_v36 = vsel %vm29_vm0, %v279_v52, 0.0  ;;  %v272_v17 = vsub.f32 %v2889_v16, %v3261_v26 }
 0x1de   :  { %v280_v61 = vmax.f32 %v271_v3, 0.0 }
 0x1df   :  { %298 = vadd.xlane.f32.xlu0 %v297_v59  ;;  %301 = vadd.xlane.f32.xlu1 %v300_v36  ;;  %v281_v11 = vmax.f32 %v272_v17, 0.0 }
 0x1e0   :  { %v303_v24 = vsel %vm29_vm0, %v280_v61, 0.0 }
 0x1e1   :  { %v306_v28 = vsel %vm29_vm0, %v281_v11, 0.0 }
 0x1e3   :  { %304 = vadd.xlane.f32.xlu0 %v303_v24  ;;  %307 = vadd.xlane.f32.xlu1 %v306_v28 }
 0x260   :  { %v284_v63 = vpop.xlane.xlu1 %283 }
 0x261   :  { %vm309_vm4 = vcmp.ge.f32.partialorder %v284_v63, 1.0 }
 0x262   :  { %v3273_v4 = vsel %vm309_vm4, %v3146_v32, %v3138_v22  ;;  %v3277_v23 = vsel %vm309_vm4, %v3142_v31, %v3146_v32 }
 0x263   :  { %v336_v7 = vadd.f32 %v3277_v23, %v3273_v4  ;;  %v287_v30 = vpop.xlane.xlu0 %286 }
 0x264   :  { %v290_v50 = vpop.xlane.xlu1 %289  ;;  %vm310_vm5 = vcmp.ge.f32.partialorder %v287_v30, 1.0 }
 0x265   :  { %v3281_v33 = vmul.f32 0.5, %v336_v7  ;;  %vm311_vm6 = vcmp.ge.f32.partialorder %v290_v50, 1.0  ;;  %v3285_v49 = vsel %vm310_vm5, %v3170_v60, %v3150_v35  ;;  %v3289_v22 = vsel %vm310_vm5, %v3154_v43, %v3170_v60 }
 0x266   :  { %v3293_v31 = vsel %vm311_vm6, %v3172_v56, %v3158_v44  ;;  %v3297_v32 = vsel %vm311_vm6, %v3162_v54, %v3172_v56  ;;  %v337_v29 = vadd.f32 %v3289_v22, %v3285_v49 }
 0x267   :  { %v338_v14 = vadd.f32 %v3297_v32, %v3293_v31  ;;  %v354_v35 = vsub.f32 %v2833_v0, %v3281_v33 }
 0x268   :  { %v3305_v45 = vmul.f32 0.5, %v337_v29  ;;  %v296_v43 = vpop.xlane.xlu1 %295  ;;  %v293_v60 = vpop.xlane.xlu0 %292 }
 0x269   :  { %v3307_v40 = vmul.f32 0.5, %v338_v14  ;;  %vm313_vm7 = vcmp.ge.f32.partialorder %v296_v43, 1.0  ;;  %vm312_vm8 = vcmp.ge.f32.partialorder %v293_v60, 1.0  ;;  %v363_v44 = vmax.f32 %v354_v35, 0.0 }
 0x26a   :  { %v3311_v54 = vsel %vm313_vm7, %v3200_v58, %v3184_v27  ;;  %v3315_v56 = vsel %vm313_vm7, %v3188_v57, %v3200_v58  ;;  %v3319_v34 = vsel %vm312_vm8, %v3198_v21, %v3176_v55  ;;  %v3323_v47 = vsel %vm312_vm8, %v3180_v20, %v3198_v21 }
 0x26b   :  { %v340_v53 = vadd.f32 %v3315_v56, %v3311_v54  ;;  %v339_v19 = vadd.f32 %v3323_v47, %v3319_v34  ;;  %v372_v27 = vsel %vm29_vm0, %v363_v44, 0.0  ;;  %v356_v57 = vsub.f32 %v2838_v1, %v3307_v40 }
 0x26c   :  { %373 = vadd.xlane.f32.xlu0 %v372_v27  ;;  %v302_v58 = vpop.xlane.xlu1 %301  ;;  %v299_v18 = vpop.xlane.xlu0 %298  ;;  %v355_v55 = vsub.f32 %v2843_v2, %v3305_v45 }
 0x26d   :  { %v3334_v48 = vmul.f32 0.5, %v340_v53  ;;  %v3336_v20 = vmul.f32 0.5, %v339_v19  ;;  %vm315_vm9 = vcmp.ge.f32.partialorder %v302_v58, 1.0  ;;  %vm314_vm10 = vcmp.ge.f32.partialorder %v299_v18, 1.0 }
 0x26e   :  { %v3340_v21 = vsel %vm315_vm9, %v3231_v39, %v3215_v6  ;;  %v3344_v42 = vsel %vm315_vm9, %v3219_v38, %v3231_v39  ;;  %v3348_v52 = vsel %vm314_vm10, %v3228_v37, %v3205_v10  ;;  %v3352_v3 = vsel %vm314_vm10, %v3209_v46, %v3228_v37 }
 0x26f   :  { %v342_v59 = vadd.f32 %v3344_v42, %v3340_v21  ;;  %v341_v36 = vadd.f32 %v3352_v3, %v3348_v52  ;;  %v365_v6 = vmax.f32 %v356_v57, 0.0  ;;  %v364_v17 = vmax.f32 %v355_v55, 0.0 }
 0x270   :  { %v308_v61 = vpop.xlane.xlu1 %307  ;;  %v305_v11 = vpop.xlane.xlu0 %304  ;;  %v358_v38 = vsub.f32 %v2861_v8, %v3334_v48  ;;  %v357_v10 = vsub.f32 %v2852_v5, %v3336_v20 }
 0x271   :  { %v3362_v39 = vmul.f32 0.5, %v342_v59  ;;  %v3364_v46 = vmul.f32 0.5, %v341_v36  ;;  %v378_v37 = vsel %vm29_vm0, %v365_v6, 0.0  ;;  %vm317_vm11 = vcmp.ge.f32.partialorder %v308_v61, 1.0 }
 0x272   :  { %379 = vadd.xlane.f32.xlu0 %v378_v37  ;;  %v3369_v24 = vsel %vm317_vm11, %v3261_v26, %v3243_v51  ;;  %v3373_v28 = vsel %vm317_vm11, %v3249_v62, %v3261_v26  ;;  %v375_v63 = vsel %vm29_vm0, %v364_v17, 0.0  ;;  %vm316_vm12 = vcmp.ge.f32.partialorder %v305_v11, 1.0 }
 0x273   :  { %v344_v7 = vadd.f32 %v3373_v28, %v3369_v24  ;;  %376 = vadd.xlane.f32.xlu1 %v375_v63  ;;  %v3380_v30 = vsel %vm316_vm12, %v3257_v41, %v3235_v25  ;;  %v3384_v50 = vsel %vm316_vm12, %v3239_v15, %v3257_v41  ;;  %v367_v51 = vmax.f32 %v358_v38, 0.0 }
 0x274   :  { %v343_v62 = vadd.f32 %v3384_v50, %v3380_v30  ;;  %v366_v26 = vmax.f32 %v357_v10, 0.0  ;;  %v360_v29 = vsub.f32 %v2875_v12, %v3362_v39  ;;  %v359_v14 = vsub.f32 %v2866_v9, %v3364_v46 }
 0x275   :  { %v3392_v35 = vmul.f32 0.5, %v344_v7  ;;  %v384_v25 = vsel %vm29_vm0, %v367_v51, 0.0 }
 0x276   :  { %v3395_v43 = vmul.f32 0.5, %v343_v62  ;;  %385 = vadd.xlane.f32.xlu0 %v384_v25  ;;  %v381_v15 = vsel %vm29_vm0, %v366_v26, 0.0  ;;  %v369_v41 = vmax.f32 %v360_v29, 0.0  ;;  %v368_v60 = vmax.f32 %v359_v14, 0.0 }
 0x277   :  { %382 = vadd.xlane.f32.xlu1 %v381_v15  ;;  %v362_v44 = vsub.f32 %v2889_v16, %v3392_v35 }
 0x278   :  { %v390_v53 = vsel %vm29_vm0, %v369_v41, 0.0  ;;  %v387_v19 = vsel %vm29_vm0, %v368_v60, 0.0  ;;  %v361_v27 = vsub.f32 %v2880_v13, %v3395_v43 }
 0x279   :  { %v371_v57 = vmax.f32 %v362_v44, 0.0 }
 0x27a   :  { %391 = vadd.xlane.f32.xlu0 %v390_v53  ;;  %v370_v58 = vmax.f32 %v361_v27, 0.0 }
 0x27b   :  { %388 = vadd.xlane.f32.xlu1 %v387_v19  ;;  %v396_v18 = vsel %vm29_vm0, %v371_v57, 0.0 }
 0x27c   :  { %v393_v55 = vsel %vm29_vm0, %v370_v58, 0.0 }
 0x27e   :  { %397 = vadd.xlane.f32.xlu0 %v396_v18 }
 0x27f   :  { %394 = vadd.xlane.f32.xlu1 %v393_v55 }
 0x2f9   :  { %v374_v59 = vpop.xlane.xlu0 %373 }
 0x2fa   :  { %vm399_vm13 = vcmp.ge.f32.partialorder %v374_v59, 1.0 }
 0x2fb   :  { %v3408_v36 = vsel %vm399_vm13, %v3281_v33, %v3273_v4  ;;  %v3412_v6 = vsel %vm399_vm13, %v3277_v23, %v3281_v33 }
 0x2fc   :  { %v426_v17 = vadd.f32 %v3412_v6, %v3408_v36 }
 0x2fe   :  { %v3416_v61 = vmul.f32 0.5, %v426_v17 }
 0x2ff   :  { %v380_v11 = vpop.xlane.xlu0 %379 }
 0x300   :  { %v377_v38 = vpop.xlane.xlu1 %376  ;;  %vm401_vm14 = vcmp.ge.f32.partialorder %v380_v11, 1.0  ;;  %v444_v10 = vsub.f32 %v2833_v0, %v3416_v61 }
 0x301   :  { %vm400_vm15 = vcmp.ge.f32.partialorder %v377_v38, 1.0  ;;  %v3422_v4 = vsel %vm401_vm14, %v3307_v40, %v3293_v31  ;;  %v3426_v23 = vsel %vm401_vm14, %v3297_v32, %v3307_v40 }
 0x302   :  { %v3430_v33 = vsel %vm400_vm15, %v3305_v45, %v3285_v49  ;;  %v3434_v37 = vsel %vm400_vm15, %v3289_v22, %v3305_v45  ;;  %v428_v63 = vadd.f32 %v3426_v23, %v3422_v4  ;;  %v453_v7 = vmax.f32 %v444_v10, 0.0 }
 0x303   :  { %v427_v31 = vadd.f32 %v3434_v37, %v3430_v33  ;;  %v386_v51 = vpop.xlane.xlu0 %385 }
 0x304   :  { %v3440_v62 = vmul.f32 0.5, %v428_v63  ;;  %v383_v32 = vpop.xlane.xlu1 %382  ;;  %vm403_vm1 = vcmp.ge.f32.partialorder %v386_v51, 1.0  ;;  %v462_v40 = vsel %vm29_vm0, %v453_v7, 0.0 }
 0x305   :  { %v3443_v49 = vmul.f32 0.5, %v427_v31  ;;  %vm402_vm2 = vcmp.ge.f32.partialorder %v383_v32, 1.0  ;;  %v3447_v22 = vsel %vm403_vm1, %v3334_v48, %v3311_v54  ;;  %v3451_v45 = vsel %vm403_vm1, %v3315_v56, %v3334_v48  ;;  %463 = vadd.xlane.f32.xlu1 %v462_v40 }
 0x306   :  { %v3455_v26 = vsel %vm402_vm2, %v3336_v20, %v3319_v34  ;;  %v3459_v29 = vsel %vm402_vm2, %v3323_v47, %v3336_v20  ;;  %v430_v14 = vadd.f32 %v3451_v45, %v3447_v22  ;;  %v446_v54 = vsub.f32 %v2838_v1, %v3440_v62 }
 0x307   :  { %v429_v25 = vadd.f32 %v3459_v29, %v3455_v26  ;;  %v392_v56 = vpop.xlane.xlu0 %391  ;;  %v445_v48 = vsub.f32 %v2843_v2, %v3443_v49 }
 0x308   :  { %v3469_v15 = vmul.f32 0.5, %v430_v14  ;;  %v389_v34 = vpop.xlane.xlu1 %388  ;;  %vm405_vm3 = vcmp.ge.f32.partialorder %v392_v56, 1.0  ;;  %v455_v41 = vmax.f32 %v446_v54, 0.0 }
 0x309   :  { %v3471_v47 = vmul.f32 0.5, %v429_v25  ;;  %vm404_vm4 = vcmp.ge.f32.partialorder %v389_v34, 1.0  ;;  %v3475_v20 = vsel %vm405_vm3, %v3362_v39, %v3340_v21  ;;  %v3479_v60 = vsel %vm405_vm3, %v3344_v42, %v3362_v39 }
 0x30a   :  { %v3483_v44 = vsel %vm404_vm4, %v3364_v46, %v3348_v52  ;;  %v3487_v53 = vsel %vm404_vm4, %v3352_v3, %v3364_v46  ;;  %v432_v19 = vadd.f32 %v3479_v60, %v3475_v20  ;;  %v454_v27 = vmax.f32 %v445_v48, 0.0 }
 0x30b   :  { %v431_v21 = vadd.f32 %v3487_v53, %v3483_v44  ;;  %v468_v57 = vsel %vm29_vm0, %v455_v41, 0.0  ;;  %v398_v58 = vpop.xlane.xlu0 %397  ;;  %v447_v42 = vsub.f32 %v2852_v5, %v3471_v47  ;;  %v448_v52 = vsub.f32 %v2861_v8, %v3469_v15 }
 0x30c   :  { %v3498_v39 = vmul.f32 0.5, %v432_v19  ;;  %v465_v3 = vsel %vm29_vm0, %v454_v27, 0.0  ;;  %v395_v46 = vpop.xlane.xlu1 %394  ;;  %469 = vadd.xlane.f32.xlu1 %v468_v57  ;;  %vm407_vm5 = vcmp.ge.f32.partialorder %v398_v58, 1.0 }
 0x30d   :  { %v3501_v18 = vmul.f32 0.5, %v431_v21  ;;  %466 = vadd.xlane.f32.xlu0 %v465_v3  ;;  %vm406_vm6 = vcmp.ge.f32.partialorder %v395_v46, 1.0  ;;  %v3505_v55 = vsel %vm407_vm5, %v3392_v35, %v3369_v24  ;;  %v3509_v59 = vsel %vm407_vm5, %v3373_v28, %v3392_v35 }
 0x30e   :  { %v3513_v17 = vsel %vm406_vm6, %v3395_v43, %v3380_v30  ;;  %v3517_v11 = vsel %vm406_vm6, %v3384_v50, %v3395_v43  ;;  %v434_v38 = vadd.f32 %v3509_v59, %v3505_v55  ;;  %v456_v10 = vmax.f32 %v447_v42, 0.0 }
 0x30f   :  { %v433_v24 = vadd.f32 %v3517_v11, %v3513_v17  ;;  %v457_v63 = vmax.f32 %v448_v52, 0.0  ;;  %v449_v28 = vsub.f32 %v2866_v9, %v3501_v18  ;;  %v450_v35 = vsub.f32 %v2875_v12, %v3498_v39 }
 0x310   :  { %v3527_v30 = vmul.f32 0.5, %v434_v38  ;;  %v471_v7 = vsel %vm29_vm0, %v456_v10, 0.0 }
 0x311   :  { %v3530_v50 = vmul.f32 0.5, %v433_v24  ;;  %472 = vadd.xlane.f32.xlu0 %v471_v7  ;;  %v474_v43 = vsel %vm29_vm0, %v457_v63, 0.0  ;;  %v458_v31 = vmax.f32 %v449_v28, 0.0  ;;  %v459_v51 = vmax.f32 %v450_v35, 0.0 }
 0x312   :  { %475 = vadd.xlane.f32.xlu1 %v474_v43  ;;  %v452_v32 = vsub.f32 %v2889_v16, %v3527_v30 }
 0x313   :  { %v477_v9 = vsel %vm29_vm0, %v458_v31, 0.0  ;;  %v480_v40 = vsel %vm29_vm0, %v459_v51, 0.0  ;;  %v451_v14 = vsub.f32 %v2880_v13, %v3530_v50 }
 0x314   :  { %v461_v54 = vmax.f32 %v452_v32, 0.0 }
 0x315   :  { %478 = vadd.xlane.f32.xlu0 %v477_v9  ;;  %v460_v25 = vmax.f32 %v451_v14, 0.0 }
 0x316   :  { %481 = vadd.xlane.f32.xlu1 %v480_v40  ;;  %v486_v48 = vsel %vm29_vm0, %v461_v54, 0.0 }
 0x317   :  { %v483_v56 = vsel %vm29_vm0, %v460_v25, 0.0 }
 0x319   :  { %484 = vadd.xlane.f32.xlu0 %v483_v56 }
 0x31a   :  { %487 = vadd.xlane.f32.xlu1 %v486_v48 }
 0x392   :  { %v464_v34 = vpop.xlane.xlu1 %463 }
 0x393   :  { %vm489_vm7 = vcmp.ge.f32.partialorder %v464_v34, 1.0 }
 0x394   :  { %v3543_v16 = vsel %vm489_vm7, %v3416_v61, %v3408_v36  ;;  %v3547_v41 = vsel %vm489_vm7, %v3412_v6, %v3416_v61 }
 0x395   :  { %v516_v13 = vadd.f32 %v3547_v41, %v3543_v16 }
 0x397   :  { %v3551_v19 = vmul.f32 0.5, %v516_v13 }
 0x399   :  { %v470_v27 = vpop.xlane.xlu1 %469  ;;  %v534_v21 = vsub.f32 %v2833_v0, %v3551_v19 }
 0x39a   :  { %vm491_vm8 = vcmp.ge.f32.partialorder %v470_v27, 1.0  ;;  %v467_v57 = vpop.xlane.xlu0 %466 }
 0x39b   :  { %v3557_v58 = vsel %vm491_vm8, %v3440_v62, %v3422_v4  ;;  %v3561_v36 = vsel %vm491_vm8, %v3426_v23, %v3440_v62  ;;  %vm490_vm9 = vcmp.ge.f32.partialorder %v467_v57, 1.0  ;;  %v543_v6 = vmax.f32 %v534_v21, 0.0 }
 0x39c   :  { %v518_v61 = vadd.f32 %v3561_v36, %v3557_v58  ;;  %v3567_v42 = vsel %vm490_vm9, %v3443_v49, %v3430_v33  ;;  %v3571_v0 = vsel %vm490_vm9, %v3434_v37, %v3443_v49 }
 0x39d   :  { %v517_v4 = vadd.f32 %v3571_v0, %v3567_v42  ;;  %v552_v52 = vsel %vm29_vm0, %v543_v6, 0.0  ;;  %v3685_v6 = vld [vmem:[%s6846_s0 + $0x40] sm:$0xff] }
 0x39e   :  { %v3576_v23 = vmul.f32 0.5, %v518_v61  ;;  %v473_v62 = vpop.xlane.xlu0 %472  ;;  %553 = vadd.xlane.f32.xlu0 %v552_v52 }
 0x39f   :  { %v3578_v3 = vmul.f32 0.5, %v517_v4  ;;  %v476_v46 = vpop.xlane.xlu1 %475  ;;  %vm492_vm10 = vcmp.ge.f32.partialorder %v473_v62, 1.0 }
 0x3a0   :  { %vm493_vm11 = vcmp.ge.f32.partialorder %v476_v46, 1.0  ;;  %v3582_v33 = vsel %vm492_vm10, %v3471_v47, %v3455_v26  ;;  %v3586_v37 = vsel %vm492_vm10, %v3459_v29, %v3471_v47  ;;  %v536_v49 = vsub.f32 %v2838_v1, %v3576_v23 }
 0x3a1   :  { %v3592_v38 = vsel %vm493_vm11, %v3469_v15, %v3447_v22  ;;  %v3596_v10 = vsel %vm493_vm11, %v3451_v45, %v3469_v15  ;;  %v519_v24 = vadd.f32 %v3586_v37, %v3582_v33  ;;  %v535_v26 = vsub.f32 %v2843_v2, %v3578_v3 }
 0x3a2   :  { %v520_v29 = vadd.f32 %v3596_v10, %v3592_v38  ;;  %v479_v47 = vpop.xlane.xlu0 %478  ;;  %v545_v63 = vmax.f32 %v536_v49, 0.0 }
 0x3a3   :  { %v3604_v1 = vmul.f32 0.5, %v519_v24  ;;  %v482_v28 = vpop.xlane.xlu1 %481  ;;  %vm494_vm12 = vcmp.ge.f32.partialorder %v479_v47, 1.0  ;;  %v544_v22 = vmax.f32 %v535_v26, 0.0 }
 0x3a4   :  { %v3606_v35 = vmul.f32 0.5, %v520_v29  ;;  %vm495_vm13 = vcmp.ge.f32.partialorder %v482_v28, 1.0  ;;  %v3610_v45 = vsel %vm494_vm12, %v3501_v18, %v3483_v44  ;;  %v3614_v2 = vsel %vm494_vm12, %v3487_v53, %v3501_v18 }
 0x3a5   :  { %v3618_v15 = vsel %vm495_vm13, %v3498_v39, %v3475_v20  ;;  %v3622_v7 = vsel %vm495_vm13, %v3479_v60, %v3498_v39  ;;  %v521_v43 = vadd.f32 %v3614_v2, %v3610_v45  ;;  %v558_v31 = vsel %vm29_vm0, %v545_v63, 0.0  ;;  %v3706_v63 = vld [vmem:[%s6846_s0] sm:$0xff] }
 0x3a6   :  { %v522_v44 = vadd.f32 %v3622_v7, %v3618_v15  ;;  %559 = vadd.xlane.f32.xlu0 %v558_v31  ;;  %v555_v53 = vsel %vm29_vm0, %v544_v22, 0.0  ;;  %v485_v18 = vpop.xlane.xlu0 %484  ;;  %v538_v20 = vsub.f32 %v2861_v8, %v3606_v35  ;;  %v537_v51 = vsub.f32 %v2852_v5, %v3604_v1 }
 0x3a7   :  { %v3634_v60 = vmul.f32 0.5, %v521_v43  ;;  %v488_v39 = vpop.xlane.xlu1 %487  ;;  %556 = vadd.xlane.f32.xlu1 %v555_v53  ;;  %vm496_vm14 = vcmp.ge.f32.partialorder %v485_v18, 1.0 }
 0x3a8   :  { %v3636_v32 = vmul.f32 0.5, %v522_v44  ;;  %vm497_vm15 = vcmp.ge.f32.partialorder %v488_v39, 1.0  ;;  %v3640_v9 = vsel %vm496_vm14, %v3530_v50, %v3513_v17  ;;  %v3644_v40 = vsel %vm496_vm14, %v3517_v11, %v3530_v50 }
 0x3a9   :  { %v3648_v8 = vsel %vm497_vm15, %v3527_v30, %v3505_v55  ;;  %v3652_v5 = vsel %vm497_vm15, %v3509_v59, %v3527_v30  ;;  %v523_v14 = vadd.f32 %v3644_v40, %v3640_v9  ;;  %v547_v54 = vmax.f32 %v538_v20, 0.0  ;;  %v3663_v55 = vld [vmem:[%s6846_s0 + $0x28] sm:$0xff] }
 0x3aa   :  { %v524_v17 = vadd.f32 %v3652_v5, %v3648_v8  ;;  %v546_v25 = vmax.f32 %v537_v51, 0.0  ;;  %v540_v11 = vsub.f32 %v2875_v12, %v3636_v32  ;;  %v539_v59 = vsub.f32 %v3663_v55, %v3634_v60  ;;  %v3676_v12 = vld [vmem:[%s6846_s0 + $0x38] sm:$0xff] }
 0x3ab   :  { %v3667_v30 = vmul.f32 0.5, %v523_v14  ;;  %v564_v50 = vsel %vm29_vm0, %v547_v54, 0.0  ;;  %v3753_v14 = vld [vmem:[%s6846_s0 + $0x8] sm:$0xff] }
 0x3ac   :  { %v3670_v56 = vmul.f32 0.5, %v524_v17  ;;  %565 = vadd.xlane.f32.xlu0 %v564_v50  ;;  %v561_v48 = vsel %vm29_vm0, %v546_v25, 0.0  ;;  %v549_v34 = vmax.f32 %v540_v11, 0.0  ;;  %v548_v13 = vmax.f32 %v539_v59, 0.0 }
 0x3ad   :  { %562 = vadd.xlane.f32.xlu1 %v561_v48  ;;  %v541_v27 = vsub.f32 %v3676_v12, %v3667_v30 }
 0x3ae   :  { %v570_v21 = vsel %vm29_vm0, %v549_v34, 0.0  ;;  %v567_v57 = vsel %vm29_vm0, %v548_v13, 0.0  ;;  %v542_v61 = vsub.f32 %v3685_v6, %v3670_v56 }
 0x3af   :  { %v550_v4 = vmax.f32 %v541_v27, 0.0 }
 0x3b0   :  { %571 = vadd.xlane.f32.xlu0 %v570_v21  ;;  %v551_v52 = vmax.f32 %v542_v61, 0.0 }
 0x3b1   :  { %568 = vadd.xlane.f32.xlu1 %v567_v57  ;;  %v573_v46 = vsel %vm29_vm0, %v550_v4, 0.0 }
 0x3b2   :  { %v576_v62 = vsel %vm29_vm0, %v551_v52, 0.0 }
 0x3b4   :  { %577 = vadd.xlane.f32.xlu0 %v576_v62 }
 0x3b5   :  { %574 = vadd.xlane.f32.xlu1 %v573_v46 }
 0x42b   :  { %v554_v49 = vpop.xlane.xlu0 %553 }
 0x42c   :  { %vm579_vm1 = vcmp.ge.f32.partialorder %v554_v49, 1.0 }
 0x42d   :  { %v3693_v24 = vsel %vm579_vm1, %v3551_v19, %v3543_v16  ;;  %v3697_v26 = vsel %vm579_vm1, %v3547_v41, %v3551_v19 }
 0x42e   :  { %v606_v29 = vadd.f32 %v3697_v26, %v3693_v24 }
 0x430   :  { %v3701_v47 = vmul.f32 0.5, %v606_v29 }
 0x432   :  { %v624_v28 = vsub.f32 %v3706_v63, %v3701_v47 }
 0x433   :  { %v560_v22 = vpop.xlane.xlu0 %559 }
 0x434   :  { %v557_v16 = vpop.xlane.xlu1 %556  ;;  %vm581_vm2 = vcmp.ge.f32.partialorder %v560_v22, 1.0  ;;  %v633_v43 = vmax.f32 %v624_v28, 0.0 }
 0x435   :  { %vm580_vm3 = vcmp.ge.f32.partialorder %v557_v16, 1.0  ;;  %v3712_v41 = vsel %vm581_vm2, %v3576_v23, %v3557_v58  ;;  %v3716_v19 = vsel %vm581_vm2, %v3561_v36, %v3576_v23 }
 0x436   :  { %v3720_v31 = vsel %vm580_vm3, %v3578_v3, %v3567_v42  ;;  %v3724_v44 = vsel %vm580_vm3, %v3571_v0, %v3578_v3  ;;  %v608_v53 = vadd.f32 %v3716_v19, %v3712_v41  ;;  %v642_v18 = vsel %vm29_vm0, %v633_v43, 0.0  ;;  %v3738_v0 = vld [vmem:[%s6846_s0 + $0x10] sm:$0xff] }
 0x437   :  { %v607_v58 = vadd.f32 %v3724_v44, %v3720_v31  ;;  %643 = vadd.xlane.f32.xlu1 %v642_v18 }
 0x438   :  { %v3731_v20 = vmul.f32 0.5, %v608_v53 }
 0x439   :  { %v3733_v36 = vmul.f32 0.5, %v607_v58  ;;  %v566_v23 = vpop.xlane.xlu0 %565 }
 0x43a   :  { %v563_v42 = vpop.xlane.xlu1 %562  ;;  %vm583_vm4 = vcmp.ge.f32.partialorder %v566_v23, 1.0  ;;  %v626_v3 = vsub.f32 %v3738_v0, %v3731_v20 }
 0x43b   :  { %vm582_vm5 = vcmp.ge.f32.partialorder %v563_v42, 1.0  ;;  %v3744_v51 = vsel %vm583_vm4, %v3606_v35, %v3592_v38  ;;  %v3748_v39 = vsel %vm583_vm4, %v3596_v10, %v3606_v35  ;;  %v625_v54 = vsub.f32 %v3753_v14, %v3733_v36 }
 0x43c   :  { %v3759_v17 = vsel %vm582_vm5, %v3604_v1, %v3582_v33  ;;  %v3763_v38 = vsel %vm582_vm5, %v3586_v37, %v3604_v1  ;;  %v610_v10 = vadd.f32 %v3748_v39, %v3744_v51  ;;  %v635_v35 = vmax.f32 %v626_v3, 0.0 }
 0x43d   :  { %v609_v25 = vadd.f32 %v3763_v38, %v3759_v17  ;;  %v572_v11 = vpop.xlane.xlu0 %571  ;;  %v634_v59 = vmax.f32 %v625_v54, 0.0 }
 0x43e   :  { %v3769_v50 = vmul.f32 0.5, %v610_v10  ;;  %v569_v48 = vpop.xlane.xlu1 %568  ;;  %vm585_vm6 = vcmp.ge.f32.partialorder %v572_v11, 1.0  ;;  %v648_v33 = vsel %vm29_vm0, %v635_v35, 0.0 }
 0x43f   :  { %v3772_v34 = vmul.f32 0.5, %v609_v25  ;;  %vm584_vm7 = vcmp.ge.f32.partialorder %v569_v48, 1.0  ;;  %v3776_v37 = vsel %vm585_vm6, %v3636_v32, %v3618_v15  ;;  %v3780_v1 = vsel %vm585_vm6, %v3622_v7, %v3636_v32  ;;  %649 = vadd.xlane.f32.xlu1 %v648_v33  ;;  %v3798_v32 = vld [vmem:[%s6846_s0 + $0x18] sm:$0xff] }
 0x440   :  { %v3784_v13 = vsel %vm584_vm7, %v3634_v60, %v3610_v45  ;;  %v3788_v27 = vsel %vm584_vm7, %v3614_v2, %v3634_v60  ;;  %v612_v21 = vadd.f32 %v3780_v1, %v3776_v37  ;;  %v645_v57 = vsel %vm29_vm0, %v634_v59, 0.0  ;;  %v3805_v2 = vld [vmem:[%s6846_s0 + $0x20] sm:$0xff] }
 0x441   :  { %v611_v15 = vadd.f32 %v3788_v27, %v3784_v13  ;;  %646 = vadd.xlane.f32.xlu0 %v645_v57  ;;  %v578_v7 = vpop.xlane.xlu0 %577  ;;  %v627_v45 = vsub.f32 %v3798_v32, %v3772_v34  ;;  %v628_v60 = vsub.f32 %v3805_v2, %v3769_v50 }
 0x442   :  { %v3809_v61 = vmul.f32 0.5, %v612_v21  ;;  %v575_v4 = vpop.xlane.xlu1 %574  ;;  %vm587_vm8 = vcmp.ge.f32.partialorder %v578_v7, 1.0 }
 0x443   :  { %v3811_v52 = vmul.f32 0.5, %v611_v15  ;;  %vm586_vm9 = vcmp.ge.f32.partialorder %v575_v4, 1.0  ;;  %v3815_v62 = vsel %vm587_vm8, %v3670_v56, %v3648_v8  ;;  %v3819_v46 = vsel %vm587_vm8, %v3652_v5, %v3670_v56 }
 0x444   :  { %v3823_v49 = vsel %vm586_vm9, %v3667_v30, %v3640_v9  ;;  %v3827_v29 = vsel %vm586_vm9, %v3644_v40, %v3667_v30  ;;  %v614_v28 = vadd.f32 %v3819_v46, %v3815_v62  ;;  %v636_v22 = vmax.f32 %v627_v45, 0.0  ;;  %v3838_v9 = vld [vmem:[%s6846_s0 + $0x30] sm:$0xff] }
 0x445   :  { %v613_v8 = vadd.f32 %v3827_v29, %v3823_v49  ;;  %v637_v16 = vmax.f32 %v628_v60, 0.0  ;;  %v629_v5 = vsub.f32 %v3663_v55, %v3811_v52  ;;  %v630_v40 = vsub.f32 %v3838_v9, %v3809_v61 }
 0x446   :  { %v3842_v30 = vmul.f32 0.5, %v614_v28  ;;  %v651_v56 = vsel %vm29_vm0, %v636_v22, 0.0 }
 0x447   :  { %v3845_v43 = vmul.f32 0.5, %v613_v8  ;;  %652 = vadd.xlane.f32.xlu0 %v651_v56  ;;  %v654_v53 = vsel %vm29_vm0, %v637_v16, 0.0  ;;  %v638_v18 = vmax.f32 %v629_v5, 0.0  ;;  %v639_v58 = vmax.f32 %v630_v40, 0.0 }
 0x448   :  { %655 = vadd.xlane.f32.xlu1 %v654_v53  ;;  %v632_v23 = vsub.f32 %v3685_v6, %v3842_v30 }
 0x449   :  { %v657_v42 = vsel %vm29_vm0, %v638_v18, 0.0  ;;  %v660_v3 = vsel %vm29_vm0, %v639_v58, 0.0  ;;  %v631_v54 = vsub.f32 %v3676_v12, %v3845_v43 }
 0x44a   :  { %v641_v10 = vmax.f32 %v632_v23, 0.0 }
 0x44b   :  { %658 = vadd.xlane.f32.xlu0 %v657_v42  ;;  %v640_v35 = vmax.f32 %v631_v54, 0.0 }
 0x44c   :  { %661 = vadd.xlane.f32.xlu1 %v660_v3  ;;  %v666_v11 = vsel %vm29_vm0, %v641_v10, 0.0 }
 0x44d   :  { %v663_v25 = vsel %vm29_vm0, %v640_v35, 0.0 }
 0x44f   :  { %664 = vadd.xlane.f32.xlu0 %v663_v25 }
 0x450   :  { %667 = vadd.xlane.f32.xlu1 %v666_v11 }
 0x4c4   :  { %v644_v59 = vpop.xlane.xlu1 %643 }
 0x4c5   :  { %vm669_vm10 = vcmp.ge.f32.partialorder %v644_v59, 1.0 }
 0x4c6   :  { %v3858_v48 = vsel %vm669_vm10, %v3701_v47, %v3693_v24  ;;  %v3862_v33 = vsel %vm669_vm10, %v3697_v26, %v3701_v47 }
 0x4c7   :  { %v696_v21 = vadd.f32 %v3862_v33, %v3858_v48 }
 0x4c9   :  { %v3866_v57 = vmul.f32 0.5, %v696_v21 }
 0x4cb   :  { %v714_v15 = vsub.f32 %v3706_v63, %v3866_v57 }
 0x4cc   :  { %v650_v7 = vpop.xlane.xlu1 %649 }
 0x4cd   :  { %vm671_vm11 = vcmp.ge.f32.partialorder %v650_v7, 1.0  ;;  %v723_v45 = vmax.f32 %v714_v15, 0.0 }
 0x4ce   :  { %v3872_v60 = vsel %vm671_vm11, %v3731_v20, %v3712_v41  ;;  %v3876_v24 = vsel %vm671_vm11, %v3716_v19, %v3731_v20  ;;  %v647_v26 = vpop.xlane.xlu0 %646 }
 0x4cf   :  { %v698_v47 = vadd.f32 %v3876_v24, %v3872_v60  ;;  %vm670_vm12 = vcmp.ge.f32.partialorder %v647_v26, 1.0  ;;  %v732_v4 = vsel %vm29_vm0, %v723_v45, 0.0 }
 0x4d0   :  { %v3883_v28 = vsel %vm670_vm12, %v3733_v36, %v3720_v31  ;;  %v3887_v22 = vsel %vm670_vm12, %v3724_v44, %v3733_v36  ;;  %733 = vadd.xlane.f32.xlu0 %v732_v4 }
 0x4d1   :  { %v3889_v41 = vmul.f32 0.5, %v698_v47  ;;  %v697_v19 = vadd.f32 %v3887_v22, %v3883_v28 }
 0x4d3   :  { %v3893_v20 = vmul.f32 0.5, %v697_v19  ;;  %v716_v8 = vsub.f32 %v3738_v0, %v3889_v41 }
 0x4d4   :  { %v653_v16 = vpop.xlane.xlu0 %652 }
 0x4d5   :  { %v656_v5 = vpop.xlane.xlu1 %655  ;;  %vm672_vm13 = vcmp.ge.f32.partialorder %v653_v16, 1.0  ;;  %v725_v31 = vmax.f32 %v716_v8, 0.0  ;;  %v715_v40 = vsub.f32 %v3753_v14, %v3893_v20 }
 0x4d6   :  { %vm673_vm14 = vcmp.ge.f32.partialorder %v656_v5, 1.0  ;;  %v3901_v44 = vsel %vm672_vm13, %v3772_v34, %v3759_v17  ;;  %v3905_v36 = vsel %vm672_vm13, %v3763_v38, %v3772_v34 }
 0x4d7   :  { %v3909_v56 = vsel %vm673_vm14, %v3769_v50, %v3744_v51  ;;  %v3913_v53 = vsel %vm673_vm14, %v3748_v39, %v3769_v50  ;;  %v699_v18 = vadd.f32 %v3905_v36, %v3901_v44  ;;  %v738_v58 = vsel %vm29_vm0, %v725_v31, 0.0 }
 0x4d8   :  { %v700_v17 = vadd.f32 %v3913_v53, %v3909_v56  ;;  %v659_v23 = vpop.xlane.xlu0 %658  ;;  %739 = vadd.xlane.f32.xlu0 %v738_v58  ;;  %v724_v38 = vmax.f32 %v715_v40, 0.0 }
 0x4d9   :  { %v3920_v34 = vmul.f32 0.5, %v699_v18  ;;  %v662_v42 = vpop.xlane.xlu1 %661  ;;  %vm674_vm15 = vcmp.ge.f32.partialorder %v659_v23, 1.0 }
 0x4da   :  { %v3922_v51 = vmul.f32 0.5, %v700_v17  ;;  %vm675_vm1 = vcmp.ge.f32.partialorder %v662_v42, 1.0  ;;  %v3926_v39 = vsel %vm674_vm15, %v3811_v52, %v3784_v13  ;;  %v3930_v50 = vsel %vm674_vm15, %v3788_v27, %v3811_v52 }
 0x4db   :  { %v3934_v3 = vsel %vm675_vm1, %v3809_v61, %v3776_v37  ;;  %v3938_v54 = vsel %vm675_vm1, %v3780_v1, %v3809_v61  ;;  %v701_v10 = vadd.f32 %v3930_v50, %v3926_v39  ;;  %v735_v35 = vsel %vm29_vm0, %v724_v38, 0.0 }
 0x4dc   :  { %v702_v13 = vadd.f32 %v3938_v54, %v3934_v3  ;;  %736 = vadd.xlane.f32.xlu1 %v735_v35  ;;  %v665_v25 = vpop.xlane.xlu0 %664  ;;  %v718_v27 = vsub.f32 %v3805_v2, %v3922_v51  ;;  %v717_v37 = vsub.f32 %v3798_v32, %v3920_v34 }
 0x4dd   :  { %v3949_v52 = vmul.f32 0.5, %v701_v10  ;;  %v668_v1 = vpop.xlane.xlu1 %667  ;;  %vm676_vm2 = vcmp.ge.f32.partialorder %v665_v25, 1.0 }
 0x4de   :  { %v3951_v61 = vmul.f32 0.5, %v702_v13  ;;  %vm677_vm3 = vcmp.ge.f32.partialorder %v668_v1, 1.0  ;;  %v3955_v11 = vsel %vm676_vm2, %v3845_v43, %v3823_v49  ;;  %v3959_v59 = vsel %vm676_vm2, %v3827_v29, %v3845_v43 }
 0x4df   :  { %v3963_v21 = vsel %vm677_vm3, %v3842_v30, %v3815_v62  ;;  %v3967_v15 = vsel %vm677_vm3, %v3819_v46, %v3842_v30  ;;  %v703_v7 = vadd.f32 %v3959_v59, %v3955_v11  ;;  %v727_v45 = vmax.f32 %v718_v27, 0.0 }
 0x4e0   :  { %v704_v49 = vadd.f32 %v3967_v15, %v3963_v21  ;;  %v726_v26 = vmax.f32 %v717_v37, 0.0  ;;  %v720_v29 = vsub.f32 %v3838_v9, %v3951_v61  ;;  %v719_v43 = vsub.f32 %v3663_v55, %v3949_v52 }
 0x4e1   :  { %v3977_v62 = vmul.f32 0.5, %v703_v7  ;;  %v744_v47 = vsel %vm29_vm0, %v727_v45, 0.0 }
 0x4e2   :  { %v3980_v46 = vmul.f32 0.5, %v704_v49  ;;  %745 = vadd.xlane.f32.xlu0 %v744_v47  ;;  %v741_v30 = vsel %vm29_vm0, %v726_v26, 0.0  ;;  %v729_v4 = vmax.f32 %v720_v29, 0.0  ;;  %v728_v19 = vmax.f32 %v719_v43, 0.0 }
 0x4e3   :  { %742 = vadd.xlane.f32.xlu1 %v741_v30  ;;  %v721_v8 = vsub.f32 %v3676_v12, %v3977_v62 }
 0x4e4   :  { %v750_v16 = vsel %vm29_vm0, %v729_v4, 0.0  ;;  %v747_v5 = vsel %vm29_vm0, %v728_v19, 0.0  ;;  %v722_v31 = vsub.f32 %v3685_v6, %v3980_v46 }
 0x4e5   :  { %v730_v40 = vmax.f32 %v721_v8, 0.0 }
 0x4e6   :  { %751 = vadd.xlane.f32.xlu0 %v750_v16  ;;  %v731_v18 = vmax.f32 %v722_v31, 0.0 }
 0x4e7   :  { %748 = vadd.xlane.f32.xlu1 %v747_v5  ;;  %v753_v17 = vsel %vm29_vm0, %v730_v40, 0.0 }
 0x4e8   :  { %v756_v58 = vsel %vm29_vm0, %v731_v18, 0.0 }
 0x4ea   :  { %757 = vadd.xlane.f32.xlu0 %v756_v58 }
 0x4eb   :  { %754 = vadd.xlane.f32.xlu1 %v753_v17 }
 0x55d   :  { %v734_v23 = vpop.xlane.xlu0 %733 }
 0x55e   :  { %vm759_vm4 = vcmp.ge.f32.partialorder %v734_v23, 1.0 }
 0x55f   :  { %v3993_v38 = vsel %vm759_vm4, %v3866_v57, %v3858_v48  ;;  %v3997_v42 = vsel %vm759_vm4, %v3862_v33, %v3866_v57 }
 0x560   :  { %v786_v10 = vadd.f32 %v3997_v42, %v3993_v38 }
 0x562   :  { %v4001_v35 = vmul.f32 0.5, %v786_v10 }
 0x564   :  { %v804_v13 = vsub.f32 %v3706_v63, %v4001_v35 }
 0x565   :  { %v740_v25 = vpop.xlane.xlu0 %739 }
 0x566   :  { %vm761_vm5 = vcmp.ge.f32.partialorder %v740_v25, 1.0  ;;  %v813_v27 = vmax.f32 %v804_v13, 0.0 }
 0x567   :  { %v4007_v37 = vsel %vm761_vm5, %v3889_v41, %v3872_v60  ;;  %v4011_v48 = vsel %vm761_vm5, %v3876_v24, %v3889_v41 }
 0x568   :  { %v788_v33 = vadd.f32 %v4011_v48, %v4007_v37  ;;  %v822_v57 = vsel %vm29_vm0, %v813_v27, 0.0 }
 0x569   :  { %v737_v1 = vpop.xlane.xlu1 %736  ;;  %823 = vadd.xlane.f32.xlu1 %v822_v57 }
 0x56a   :  { %vm760_vm6 = vcmp.ge.f32.partialorder %v737_v1, 1.0  ;;  %v4016_v7 = vmul.f32 0.5, %v788_v33 }
 0x56b   :  { %v4020_v45 = vsel %vm760_vm6, %v3893_v20, %v3883_v28  ;;  %v4024_v60 = vsel %vm760_vm6, %v3887_v22, %v3893_v20 }
 0x56c   :  { %v787_v24 = vadd.f32 %v4024_v60, %v4020_v45  ;;  %v806_v41 = vsub.f32 %v3738_v0, %v4016_v7 }
 0x56e   :  { %v4030_v49 = vmul.f32 0.5, %v787_v24  ;;  %v815_v26 = vmax.f32 %v806_v41, 0.0 }
 0x56f   :  { %v746_v29 = vpop.xlane.xlu0 %745 }
 0x570   :  { %v743_v43 = vpop.xlane.xlu1 %742  ;;  %vm763_vm7 = vcmp.ge.f32.partialorder %v746_v29, 1.0  ;;  %v805_v28 = vsub.f32 %v3753_v14, %v4030_v49  ;;  %v828_v47 = vsel %vm29_vm0, %v815_v26, 0.0 }
 0x571   :  { %vm762_vm8 = vcmp.ge.f32.partialorder %v743_v43, 1.0  ;;  %v4037_v22 = vsel %vm763_vm7, %v3922_v51, %v3909_v56  ;;  %v4041_v20 = vsel %vm763_vm7, %v3913_v53, %v3922_v51  ;;  %829 = vadd.xlane.f32.xlu1 %v828_v47 }
 0x572   :  { %v4045_v30 = vsel %vm762_vm8, %v3920_v34, %v3901_v44  ;;  %v4049_v4 = vsel %vm762_vm8, %v3905_v36, %v3920_v34  ;;  %v790_v19 = vadd.f32 %v4041_v20, %v4037_v22  ;;  %v814_v8 = vmax.f32 %v805_v28, 0.0 }
 0x573   :  { %v789_v56 = vadd.f32 %v4049_v4, %v4045_v30  ;;  %v752_v16 = vpop.xlane.xlu0 %751 }
 0x574   :  { %v4055_v5 = vmul.f32 0.5, %v790_v19  ;;  %v749_v53 = vpop.xlane.xlu1 %748  ;;  %vm765_vm9 = vcmp.ge.f32.partialorder %v752_v16, 1.0  ;;  %v825_v51 = vsel %vm29_vm0, %v814_v8, 0.0 }
 0x575   :  { %v4058_v44 = vmul.f32 0.5, %v789_v56  ;;  %vm764_vm10 = vcmp.ge.f32.partialorder %v749_v53, 1.0  ;;  %v4062_v36 = vsel %vm765_vm9, %v3951_v61, %v3934_v3  ;;  %v4066_v34 = vsel %vm765_vm9, %v3938_v54, %v3951_v61  ;;  %826 = vadd.xlane.f32.xlu0 %v825_v51 }
 0x576   :  { %v4070_v31 = vsel %vm764_vm10, %v3949_v52, %v3926_v39  ;;  %v4074_v40 = vsel %vm764_vm10, %v3930_v50, %v3949_v52  ;;  %v792_v18 = vadd.f32 %v4066_v34, %v4062_v36  ;;  %v808_v3 = vsub.f32 %v3805_v2, %v4055_v5 }
 0x577   :  { %v791_v58 = vadd.f32 %v4074_v40, %v4070_v31  ;;  %v758_v54 = vpop.xlane.xlu0 %757  ;;  %v807_v61 = vsub.f32 %v3798_v32, %v4058_v44 }
 0x578   :  { %v4084_v17 = vmul.f32 0.5, %v792_v18  ;;  %v755_v39 = vpop.xlane.xlu1 %754  ;;  %vm767_vm11 = vcmp.ge.f32.partialorder %v758_v54, 1.0  ;;  %v817_v23 = vmax.f32 %v808_v3, 0.0 }
 0x579   :  { %v4086_v50 = vmul.f32 0.5, %v791_v58  ;;  %vm766_vm12 = vcmp.ge.f32.partialorder %v755_v39, 1.0  ;;  %v4090_v52 = vsel %vm767_vm11, %v3980_v46, %v3963_v21  ;;  %v4094_v10 = vsel %vm767_vm11, %v3967_v15, %v3980_v46 }
 0x57a   :  { %v4098_v13 = vsel %vm766_vm12, %v3977_v62, %v3955_v11  ;;  %v4102_v25 = vsel %vm766_vm12, %v3959_v59, %v3977_v62  ;;  %v794_v27 = vadd.f32 %v4094_v10, %v4090_v52  ;;  %v816_v33 = vmax.f32 %v807_v61, 0.0 }
 0x57b   :  { %v793_v21 = vadd.f32 %v4102_v25, %v4098_v13  ;;  %v834_v57 = vsel %vm29_vm0, %v817_v23, 0.0  ;;  %v809_v15 = vsub.f32 %v3663_v55, %v4086_v50  ;;  %v810_v11 = vsub.f32 %v3838_v9, %v4084_v17 }
 0x57c   :  { %v4113_v46 = vmul.f32 0.5, %v794_v27  ;;  %v831_v59 = vsel %vm29_vm0, %v816_v33, 0.0  ;;  %835 = vadd.xlane.f32.xlu1 %v834_v57 }
 0x57d   :  { %v4116_v62 = vmul.f32 0.5, %v793_v21  ;;  %832 = vadd.xlane.f32.xlu0 %v831_v59  ;;  %v818_v1 = vmax.f32 %v809_v15, 0.0  ;;  %v819_v24 = vmax.f32 %v810_v11, 0.0 }
 0x57e   :  { %v812_v41 = vsub.f32 %v3685_v6, %v4113_v46 }
 0x57f   :  { %v837_v26 = vsel %vm29_vm0, %v818_v1, 0.0  ;;  %v840_v29 = vsel %vm29_vm0, %v819_v24, 0.0  ;;  %v811_v43 = vsub.f32 %v3676_v12, %v4116_v62 }
 0x580   :  { %841 = vadd.xlane.f32.xlu1 %v840_v29  ;;  %v821_v28 = vmax.f32 %v812_v41, 0.0 }
 0x581   :  { %838 = vadd.xlane.f32.xlu0 %v837_v26  ;;  %v820_v47 = vmax.f32 %v811_v43, 0.0 }
 0x582   :  { %v846_v19 = vsel %vm29_vm0, %v821_v28, 0.0 }
 0x583   :  { %v843_v8 = vsel %vm29_vm0, %v820_v47, 0.0 }
 0x584   :  { %847 = vadd.xlane.f32.xlu1 %v846_v19 }
 0x585   :  { %844 = vadd.xlane.f32.xlu0 %v843_v8 }
 0x5f6   :  { %v824_v56 = vpop.xlane.xlu1 %823 }
 0x5f7   :  { %vm849_vm13 = vcmp.ge.f32.partialorder %v824_v56, 1.0 }
 0x5f8   :  { %v4128_v16 = vsel %vm849_vm13, %v4001_v35, %v3993_v38  ;;  %v4132_v53 = vsel %vm849_vm13, %v3997_v42, %v4001_v35 }
 0x5f9   :  { %v876_v51 = vadd.f32 %v4132_v53, %v4128_v16 }
 0x5fb   :  { %v4136_v18 = vmul.f32 0.5, %v876_v51 }
 0x5fd   :  { %v894_v3 = vsub.f32 %v3706_v63, %v4136_v18 }
 0x5fe   :  { %v830_v58 = vpop.xlane.xlu1 %829 }
 0x5ff   :  { %vm851_vm14 = vcmp.ge.f32.partialorder %v830_v58, 1.0  ;;  %v903_v54 = vmax.f32 %v894_v3, 0.0 }
 0x600   :  { %v4142_v61 = vsel %vm851_vm14, %v4016_v7, %v4007_v37  ;;  %v4146_v38 = vsel %vm851_vm14, %v4011_v48, %v4016_v7 }
 0x601   :  { %v878_v42 = vadd.f32 %v4146_v38, %v4142_v61  ;;  %v912_v35 = vsel %vm29_vm0, %v903_v54, 0.0 }
 0x602   :  { %v827_v39 = vpop.xlane.xlu0 %826  ;;  %913 = vadd.xlane.f32.xlu0 %v912_v35 }
 0x603   :  { %v4151_v23 = vmul.f32 0.5, %v878_v42  ;;  %vm850_vm15 = vcmp.ge.f32.partialorder %v827_v39, 1.0 }
 0x604   :  { %v4155_v27 = vsel %vm850_vm15, %v4030_v49, %v4020_v45  ;;  %v4159_v37 = vsel %vm850_vm15, %v4024_v60, %v4030_v49 }
 0x605   :  { %v877_v48 = vadd.f32 %v4159_v37, %v4155_v27  ;;  %v896_v7 = vsub.f32 %v3738_v0, %v4151_v23 }
 0x607   :  { %v4165_v33 = vmul.f32 0.5, %v877_v48  ;;  %v905_v21 = vmax.f32 %v896_v7, 0.0 }
 0x609   :  { %v836_v57 = vpop.xlane.xlu1 %835  ;;  %v918_v15 = vsel %vm29_vm0, %v905_v21, 0.0  ;;  %v895_v45 = vsub.f32 %v3753_v14, %v4165_v33 }
 0x60a   :  { %vm853_vm1 = vcmp.ge.f32.partialorder %v836_v57, 1.0  ;;  %v833_v11 = vpop.xlane.xlu0 %832  ;;  %919 = vadd.xlane.f32.xlu0 %v918_v15 }
 0x60b   :  { %v4172_v60 = vsel %vm853_vm1, %v4055_v5, %v4037_v22  ;;  %v4176_v49 = vsel %vm853_vm1, %v4041_v20, %v4055_v5  ;;  %vm852_vm2 = vcmp.ge.f32.partialorder %v833_v11, 1.0  ;;  %v904_v59 = vmax.f32 %v895_v45, 0.0 }
 0x60c   :  { %v880_v1 = vadd.f32 %v4176_v49, %v4172_v60  ;;  %v4182_v24 = vsel %vm852_vm2, %v4058_v44, %v4045_v30  ;;  %v4186_v41 = vsel %vm852_vm2, %v4049_v4, %v4058_v44 }
 0x60d   :  { %v879_v22 = vadd.f32 %v4186_v41, %v4182_v24  ;;  %v842_v26 = vpop.xlane.xlu1 %841  ;;  %v915_v20 = vsel %vm29_vm0, %v904_v59, 0.0 }
 0x60e   :  { %v4191_v5 = vmul.f32 0.5, %v880_v1  ;;  %vm855_vm3 = vcmp.ge.f32.partialorder %v842_v26, 1.0  ;;  %v839_v29 = vpop.xlane.xlu0 %838  ;;  %916 = vadd.xlane.f32.xlu1 %v915_v20 }
 0x60f   :  { %v4193_v43 = vmul.f32 0.5, %v879_v22  ;;  %v4197_v30 = vsel %vm855_vm3, %v4084_v17, %v4062_v36  ;;  %v4201_v4 = vsel %vm855_vm3, %v4066_v34, %v4084_v17  ;;  %vm854_vm4 = vcmp.ge.f32.partialorder %v839_v29, 1.0 }
 0x610   :  { %v882_v44 = vadd.f32 %v4201_v4, %v4197_v30  ;;  %v4207_v28 = vsel %vm854_vm4, %v4086_v50, %v4070_v31  ;;  %v4211_v47 = vsel %vm854_vm4, %v4074_v40, %v4086_v50  ;;  %v898_v36 = vsub.f32 %v3805_v2, %v4191_v5 }
 0x611   :  { %v881_v19 = vadd.f32 %v4211_v47, %v4207_v28  ;;  %v848_v34 = vpop.xlane.xlu1 %847  ;;  %v897_v17 = vsub.f32 %v3798_v32, %v4193_v43 }
 0x612   :  { %v4219_v8 = vmul.f32 0.5, %v882_v44  ;;  %vm857_vm5 = vcmp.ge.f32.partialorder %v848_v34, 1.0  ;;  %v845_v56 = vpop.xlane.xlu0 %844  ;;  %v907_v31 = vmax.f32 %v898_v36, 0.0 }
 0x613   :  { %v4221_v51 = vmul.f32 0.5, %v881_v19  ;;  %v4225_v40 = vsel %vm857_vm5, %v4113_v46, %v4090_v52  ;;  %v4229_v50 = vsel %vm857_vm5, %v4094_v10, %v4113_v46  ;;  %vm856_vm6 = vcmp.ge.f32.partialorder %v845_v56, 1.0 }
 0x614   :  { %v884_v3 = vadd.f32 %v4229_v50, %v4225_v40  ;;  %v4235_v58 = vsel %vm856_vm6, %v4116_v62, %v4098_v13  ;;  %v4239_v54 = vsel %vm856_vm6, %v4102_v25, %v4116_v62  ;;  %v924_v42 = vsel %vm29_vm0, %v907_v31, 0.0 }
 0x615   :  { %v883_v52 = vadd.f32 %v4239_v54, %v4235_v58  ;;  %925 = vadd.xlane.f32.xlu0 %v924_v42  ;;  %v906_v10 = vmax.f32 %v897_v17, 0.0  ;;  %v900_v46 = vsub.f32 %v3838_v9, %v4219_v8  ;;  %v899_v35 = vsub.f32 %v3663_v55, %v4221_v51 }
 0x616   :  { %v4248_v39 = vmul.f32 0.5, %v884_v3 }
 0x617   :  { %v4250_v13 = vmul.f32 0.5, %v883_v52  ;;  %v921_v25 = vsel %vm29_vm0, %v906_v10, 0.0  ;;  %v909_v62 = vmax.f32 %v900_v46, 0.0  ;;  %v908_v48 = vmax.f32 %v899_v35, 0.0 }
 0x618   :  { %922 = vadd.xlane.f32.xlu1 %v921_v25  ;;  %v902_v7 = vsub.f32 %v3685_v6, %v4248_v39 }
 0x619   :  { %v930_v21 = vsel %vm29_vm0, %v909_v62, 0.0  ;;  %v927_v57 = vsel %vm29_vm0, %v908_v48, 0.0  ;;  %v901_v15 = vsub.f32 %v3676_v12, %v4250_v13 }
 0x61a   :  { %931 = vadd.xlane.f32.xlu0 %v930_v21  ;;  %v911_v45 = vmax.f32 %v902_v7, 0.0 }
 0x61b   :  { %v910_v11 = vmax.f32 %v901_v15, 0.0 }
 0x61c   :  { %928 = vadd.xlane.f32.xlu1 %v927_v57  ;;  %v936_v59 = vsel %vm29_vm0, %v911_v45, 0.0 }
 0x61d   :  { %v933_v1 = vsel %vm29_vm0, %v910_v11, 0.0 }
 0x61e   :  { %937 = vadd.xlane.f32.xlu0 %v936_v59 }
 0x620   :  { %934 = vadd.xlane.f32.xlu1 %v933_v1 }
 0x68f   :  { %v914_v22 = vpop.xlane.xlu0 %913 }
 0x690   :  { %vm939_vm7 = vcmp.ge.f32.partialorder %v914_v22, 1.0 }
 0x691   :  { %v4263_v26 = vsel %vm939_vm7, %v4136_v18, %v4128_v16  ;;  %v4267_v20 = vsel %vm939_vm7, %v4132_v53, %v4136_v18 }
 0x692   :  { %v966_v29 = vadd.f32 %v4267_v20, %v4263_v26 }
 0x694   :  { %v4271_v44 = vmul.f32 0.5, %v966_v29 }
 0x696   :  { %v984_v36 = vsub.f32 %v3706_v63, %v4271_v44 }
 0x697   :  { %v920_v19 = vpop.xlane.xlu0 %919 }
 0x698   :  { %vm941_vm8 = vcmp.ge.f32.partialorder %v920_v19, 1.0  ;;  %v993_v34 = vmax.f32 %v984_v36, 0.0 }
 0x699   :  { %v4277_v17 = vsel %vm941_vm8, %v4151_v23, %v4142_v61  ;;  %v4281_v16 = vsel %vm941_vm8, %v4146_v38, %v4151_v23 }
 0x69a   :  { %v968_v53 = vadd.f32 %v4281_v16, %v4277_v17  ;;  %v1002_v18 = vsel %vm29_vm0, %v993_v34, 0.0 }
 0x69b   :  { %v917_v56 = vpop.xlane.xlu1 %916  ;;  %1003 = vadd.xlane.f32.xlu1 %v1002_v18 }
 0x69c   :  { %vm940_vm9 = vcmp.ge.f32.partialorder %v917_v56, 1.0  ;;  %v4286_v31 = vmul.f32 0.5, %v968_v53 }
 0x69d   :  { %v4290_v3 = vsel %vm940_vm9, %v4165_v33, %v4155_v27  ;;  %v4294_v61 = vsel %vm940_vm9, %v4159_v37, %v4165_v33 }
 0x69e   :  { %v967_v38 = vadd.f32 %v4294_v61, %v4290_v3  ;;  %v986_v23 = vsub.f32 %v3738_v0, %v4286_v31 }
 0x6a0   :  { %v4300_v42 = vmul.f32 0.5, %v967_v38  ;;  %v995_v52 = vmax.f32 %v986_v23, 0.0 }
 0x6a2   :  { %v926_v10 = vpop.xlane.xlu0 %925  ;;  %v985_v46 = vsub.f32 %v3753_v14, %v4300_v42  ;;  %v1008_v27 = vsel %vm29_vm0, %v995_v52, 0.0 }
 0x6a3   :  { %vm943_vm10 = vcmp.ge.f32.partialorder %v926_v10, 1.0  ;;  %1009 = vadd.xlane.f32.xlu1 %v1008_v27 }
 0x6a4   :  { %v4307_v37 = vsel %vm943_vm10, %v4191_v5, %v4172_v60  ;;  %v4311_v33 = vsel %vm943_vm10, %v4176_v49, %v4191_v5  ;;  %v994_v35 = vmax.f32 %v985_v46, 0.0 }
 0x6a5   :  { %v923_v25 = vpop.xlane.xlu1 %922  ;;  %v970_v62 = vadd.f32 %v4311_v33, %v4307_v37 }
 0x6a6   :  { %vm942_vm11 = vcmp.ge.f32.partialorder %v923_v25, 1.0  ;;  %v1005_v48 = vsel %vm29_vm0, %v994_v35, 0.0 }
 0x6a7   :  { %v4318_v7 = vsel %vm942_vm11, %v4193_v43, %v4182_v24  ;;  %v4322_v60 = vsel %vm942_vm11, %v4186_v41, %v4193_v43  ;;  %v4324_v21 = vmul.f32 0.5, %v970_v62  ;;  %v932_v49 = vpop.xlane.xlu0 %931  ;;  %1006 = vadd.xlane.f32.xlu0 %v1005_v48 }
 0x6a8   :  { %v969_v5 = vadd.f32 %v4322_v60, %v4318_v7  ;;  %vm945_vm12 = vcmp.ge.f32.partialorder %v932_v49, 1.0 }
 0x6a9   :  { %v929_v57 = vpop.xlane.xlu1 %928  ;;  %v4330_v15 = vsel %vm945_vm12, %v4219_v8, %v4197_v30  ;;  %v4334_v24 = vsel %vm945_vm12, %v4201_v4, %v4219_v8  ;;  %v988_v41 = vsub.f32 %v3805_v2, %v4324_v21 }
 0x6aa   :  { %v4338_v43 = vmul.f32 0.5, %v969_v5  ;;  %vm944_vm13 = vcmp.ge.f32.partialorder %v929_v57, 1.0  ;;  %v972_v45 = vadd.f32 %v4334_v24, %v4330_v15 }
 0x6ab   :  { %v4344_v11 = vsel %vm944_vm13, %v4221_v51, %v4207_v28  ;;  %v4348_v30 = vsel %vm944_vm13, %v4211_v47, %v4221_v51  ;;  %v938_v59 = vpop.xlane.xlu0 %937  ;;  %v997_v4 = vmax.f32 %v988_v41, 0.0 }
 0x6ac   :  { %v971_v8 = vadd.f32 %v4348_v30, %v4344_v11  ;;  %v4352_v1 = vmul.f32 0.5, %v972_v45  ;;  %vm947_vm14 = vcmp.ge.f32.partialorder %v938_v59, 1.0  ;;  %v987_v22 = vsub.f32 %v3798_v32, %v4338_v43 }
 0x6ad   :  { %v935_v29 = vpop.xlane.xlu1 %934  ;;  %v4358_v28 = vsel %vm947_vm14, %v4248_v39, %v4225_v40  ;;  %v4362_v47 = vsel %vm947_vm14, %v4229_v50, %v4248_v39  ;;  %v1014_v51 = vsel %vm29_vm0, %v997_v4, 0.0 }
 0x6ae   :  { %v4365_v36 = vmul.f32 0.5, %v971_v8  ;;  %vm946_vm15 = vcmp.ge.f32.partialorder %v935_v29, 1.0  ;;  %v974_v19 = vadd.f32 %v4362_v47, %v4358_v28  ;;  %v996_v34 = vmax.f32 %v987_v22, 0.0  ;;  %1015 = vadd.xlane.f32.xlu1 %v1014_v51 }
 0x6af   :  { %v4371_v53 = vsel %vm946_vm15, %v4250_v13, %v4235_v58  ;;  %v4375_v40 = vsel %vm946_vm15, %v4239_v54, %v4250_v13  ;;  %v990_v50 = vsub.f32 %v3838_v9, %v4352_v1 }
 0x6b0   :  { %v973_v39 = vadd.f32 %v4375_v40, %v4371_v53  ;;  %v4381_v18 = vmul.f32 0.5, %v974_v19  ;;  %v1011_v56 = vsel %vm29_vm0, %v996_v34, 0.0  ;;  %v989_v38 = vsub.f32 %v3663_v55, %v4365_v36 }
 0x6b1   :  { %1012 = vadd.xlane.f32.xlu0 %v1011_v56  ;;  %v999_v58 = vmax.f32 %v990_v50, 0.0 }
 0x6b2   :  { %v4386_v23 = vmul.f32 0.5, %v973_v39  ;;  %v998_v52 = vmax.f32 %v989_v38, 0.0  ;;  %v992_v54 = vsub.f32 %v3685_v6, %v4381_v18 }
 0x6b3   :  { %v1020_v13 = vsel %vm29_vm0, %v999_v58, 0.0 }
 0x6b4   :  { %v1017_v10 = vsel %vm29_vm0, %v998_v52, 0.0  ;;  %1021 = vadd.xlane.f32.xlu1 %v1020_v13  ;;  %v991_v46 = vsub.f32 %v3676_v12, %v4386_v23  ;;  %v1001_v27 = vmax.f32 %v992_v54, 0.0 }
 0x6b5   :  { %1018 = vadd.xlane.f32.xlu0 %v1017_v10 }
 0x6b6   :  { %v1000_v35 = vmax.f32 %v991_v46, 0.0  ;;  %v1026_v55 = vsel %vm29_vm0, %v1001_v27, 0.0 }
 0x6b8   :  { %v1023_v25 = vsel %vm29_vm0, %v1000_v35, 0.0  ;;  %1027 = vadd.xlane.f32.xlu1 %v1026_v55 }
 0x6b9   :  { %1024 = vadd.xlane.f32.xlu0 %v1023_v25 }
 0x728   :  { %v1004_v62 = vpop.xlane.xlu1 %1003 }
 0x729   :  { %vm1029_vm1 = vcmp.ge.f32.partialorder %v1004_v62, 1.0 }
 0x72a   :  { %v4398_v6 = vsel %vm1029_vm1, %v4271_v44, %v4263_v26  ;;  %v4402_v48 = vsel %vm1029_vm1, %v4267_v20, %v4271_v44 }
 0x72b   :  { %v1056_v12 = vadd.f32 %v4402_v48, %v4398_v6 }
 0x72d   :  { %v4406_v49 = vmul.f32 0.5, %v1056_v12 }
 0x72f   :  { %v1074_v5 = vsub.f32 %v3706_v63, %v4406_v49 }
 0x730   :  { %v1010_v57 = vpop.xlane.xlu1 %1009 }
 0x731   :  { %vm1031_vm2 = vcmp.ge.f32.partialorder %v1010_v57, 1.0  ;;  %v1083_v41 = vmax.f32 %v1074_v5, 0.0 }
 0x732   :  { %v4412_v45 = vsel %vm1031_vm2, %v4286_v31, %v4277_v17  ;;  %v4416_v26 = vsel %vm1031_vm2, %v4281_v16, %v4286_v31 }
 0x733   :  { %v1058_v20 = vadd.f32 %v4416_v26, %v4412_v45  ;;  %v1092_v44 = vsel %vm29_vm0, %v1083_v41, 0.0 }
 0x734   :  { %v1007_v59 = vpop.xlane.xlu0 %1006  ;;  %1093 = vadd.xlane.f32.xlu0 %v1092_v44 }
 0x735   :  { %v4421_v4 = vmul.f32 0.5, %v1058_v20  ;;  %vm1030_vm3 = vcmp.ge.f32.partialorder %v1007_v59, 1.0  ;;  %v4540_v20 = vld [vmem:[%s6846_s0 + $0x38] sm:$0xff] }
 0x736   :  { %v4425_v63 = vsel %vm1030_vm3, %v4300_v42, %v4290_v3  ;;  %v4429_v17 = vsel %vm1030_vm3, %v4294_v61, %v4300_v42 }
 0x737   :  { %v1057_v16 = vadd.f32 %v4429_v17, %v4425_v63  ;;  %v1076_v31 = vsub.f32 %v3738_v0, %v4421_v4 }
 0x739   :  { %v4435_v8 = vmul.f32 0.5, %v1057_v16  ;;  %v1085_v22 = vmax.f32 %v1076_v31, 0.0 }
 0x73b   :  { %v1016_v29 = vpop.xlane.xlu1 %1015  ;;  %v1098_v51 = vsel %vm29_vm0, %v1085_v22, 0.0  ;;  %v1075_v3 = vsub.f32 %v3753_v14, %v4435_v8 }
 0x73c   :  { %vm1033_vm4 = vcmp.ge.f32.partialorder %v1016_v29, 1.0  ;;  %1099 = vadd.xlane.f32.xlu0 %v1098_v51 }
 0x73d   :  { %v4442_v61 = vsel %vm1033_vm4, %v4324_v21, %v4307_v37  ;;  %v4446_v42 = vsel %vm1033_vm4, %v4311_v33, %v4324_v21  ;;  %v1084_v0 = vmax.f32 %v1075_v3, 0.0 }
 0x73e   :  { %v1060_v19 = vadd.f32 %v4446_v42, %v4442_v61  ;;  %v1013_v34 = vpop.xlane.xlu0 %1012 }
 0x73f   :  { %vm1032_vm5 = vcmp.ge.f32.partialorder %v1013_v34, 1.0  ;;  %v1095_v50 = vsel %vm29_vm0, %v1084_v0, 0.0  ;;  %v4561_v34 = vld [vmem:[%s6846_s0] sm:$0xff] }
 0x740   :  { %v4451_v39 = vmul.f32 0.5, %v1060_v19  ;;  %v4455_v14 = vsel %vm1032_vm5, %v4338_v43, %v4318_v7  ;;  %v4459_v37 = vsel %vm1032_vm5, %v4322_v60, %v4338_v43  ;;  %1096 = vadd.xlane.f32.xlu1 %v1095_v50 }
 0x741   :  { %v1059_v33 = vadd.f32 %v4459_v37, %v4455_v14  ;;  %v1022_v21 = vpop.xlane.xlu1 %1021 }
 0x742   :  { %vm1035_vm6 = vcmp.ge.f32.partialorder %v1022_v21, 1.0  ;;  %v1019_v56 = vpop.xlane.xlu0 %1018  ;;  %v1078_v38 = vsub.f32 %v3805_v2, %v4451_v39 }
 0x743   :  { %v4465_v58 = vmul.f32 0.5, %v1059_v33  ;;  %v4469_v7 = vsel %vm1035_vm6, %v4352_v1, %v4330_v15  ;;  %v4473_v60 = vsel %vm1035_vm6, %v4334_v24, %v4352_v1  ;;  %vm1034_vm7 = vcmp.ge.f32.partialorder %v1019_v56, 1.0 }
 0x744   :  { %v1062_v43 = vadd.f32 %v4473_v60, %v4469_v7  ;;  %v4479_v52 = vsel %vm1034_vm7, %v4365_v36, %v4344_v11  ;;  %v4483_v2 = vsel %vm1034_vm7, %v4348_v30, %v4365_v36  ;;  %v1087_v54 = vmax.f32 %v1078_v38, 0.0 }
 0x745   :  { %v1061_v15 = vadd.f32 %v4483_v2, %v4479_v52  ;;  %v1028_v13 = vpop.xlane.xlu1 %1027  ;;  %v1077_v24 = vsub.f32 %v3798_v32, %v4465_v58 }
 0x746   :  { %v4489_v1 = vmul.f32 0.5, %v1062_v43  ;;  %vm1037_vm8 = vcmp.ge.f32.partialorder %v1028_v13, 1.0  ;;  %v1025_v10 = vpop.xlane.xlu0 %1024  ;;  %v1104_v46 = vsel %vm29_vm0, %v1087_v54, 0.0 }
 0x747   :  { %v4492_v11 = vmul.f32 0.5, %v1061_v15  ;;  %v4496_v30 = vsel %vm1037_vm8, %v4381_v18, %v4358_v28  ;;  %v4500_v36 = vsel %vm1037_vm8, %v4362_v47, %v4381_v18  ;;  %vm1036_vm9 = vcmp.ge.f32.partialorder %v1025_v10, 1.0  ;;  %1105 = vadd.xlane.f32.xlu0 %v1104_v46  ;;  %v4519_v18 = vld [vmem:[%s6846_s0 + $0x28] sm:$0xff] }
 0x748   :  { %v1064_v32 = vadd.f32 %v4500_v36, %v4496_v30  ;;  %v4506_v27 = vsel %vm1036_vm9, %v4386_v23, %v4371_v53  ;;  %v4510_v35 = vsel %vm1036_vm9, %v4375_v40, %v4386_v23  ;;  %v1086_v55 = vmax.f32 %v1077_v24, 0.0 }
 0x749   :  { %v1063_v28 = vadd.f32 %v4510_v35, %v4506_v27  ;;  %v1080_v47 = vsub.f32 %v3838_v9, %v4489_v1  ;;  %v1079_v53 = vsub.f32 %v4519_v18, %v4492_v11  ;;  %v4531_v9 = vld [vmem:[%s6846_s0 + $0x40] sm:$0xff] }
 0x74a   :  { %v4523_v25 = vmul.f32 0.5, %v1064_v32  ;;  %v1101_v40 = vsel %vm29_vm0, %v1086_v55, 0.0 }
 0x74b   :  { %v4526_v23 = vmul.f32 0.5, %v1063_v28  ;;  %1102 = vadd.xlane.f32.xlu1 %v1101_v40  ;;  %v1089_v62 = vmax.f32 %v1080_v47, 0.0  ;;  %v1088_v12 = vmax.f32 %v1079_v53, 0.0 }
 0x74c   :  { %v1082_v5 = vsub.f32 %v4531_v9, %v4523_v25 }
 0x74d   :  { %v1110_v57 = vsel %vm29_vm0, %v1089_v62, 0.0  ;;  %v1107_v41 = vsel %vm29_vm0, %v1088_v12, 0.0  ;;  %v1081_v44 = vsub.f32 %v4540_v20, %v4526_v23  ;;  %v4631_v12 = vld [vmem:[%s6846_s0 + $0x20] sm:$0xff] }
 0x74e   :  { %1111 = vadd.xlane.f32.xlu0 %v1110_v57  ;;  %v1091_v59 = vmax.f32 %v1082_v5, 0.0 }
 0x74f   :  { %1108 = vadd.xlane.f32.xlu1 %v1107_v41  ;;  %v1090_v16 = vmax.f32 %v1081_v44, 0.0 }
 0x750   :  { %v1116_v31 = vsel %vm29_vm0, %v1091_v59, 0.0 }
 0x751   :  { %v1113_v22 = vsel %vm29_vm0, %v1090_v16, 0.0 }
 0x752   :  { %1117 = vadd.xlane.f32.xlu0 %v1116_v31 }
 0x753   :  { %1114 = vadd.xlane.f32.xlu1 %v1113_v22 }
 0x7c1   :  { %v1094_v29 = vpop.xlane.xlu0 %1093 }
 0x7c2   :  { %vm1119_vm10 = vcmp.ge.f32.partialorder %v1094_v29, 1.0 }
 0x7c3   :  { %v4548_v51 = vsel %vm1119_vm10, %v4406_v49, %v4398_v6  ;;  %v4552_v3 = vsel %vm1119_vm10, %v4402_v48, %v4406_v49 }
 0x7c4   :  { %v1146_v0 = vadd.f32 %v4552_v3, %v4548_v51 }
 0x7c6   :  { %v4556_v19 = vmul.f32 0.5, %v1146_v0 }
 0x7c8   :  { %v1164_v50 = vsub.f32 %v4561_v34, %v4556_v19 }
 0x7c9   :  { %v1100_v33 = vpop.xlane.xlu0 %1099 }
 0x7ca   :  { %vm1121_vm11 = vcmp.ge.f32.partialorder %v1100_v33, 1.0  ;;  %v1173_v6 = vmax.f32 %v1164_v50, 0.0 }
 0x7cb   :  { %v4567_v48 = vsel %vm1121_vm11, %v4421_v4, %v4412_v45  ;;  %v4571_v49 = vsel %vm1121_vm11, %v4416_v26, %v4421_v4  ;;  %v4591_v4 = vld [vmem:[%s6846_s0 + $0x10] sm:$0xff] }
 0x7cc   :  { %v1148_v21 = vadd.f32 %v4571_v49, %v4567_v48  ;;  %v1182_v56 = vsel %vm29_vm0, %v1173_v6, 0.0 }
 0x7cd   :  { %v1097_v38 = vpop.xlane.xlu1 %1096  ;;  %1183 = vadd.xlane.f32.xlu1 %v1182_v56 }
 0x7ce   :  { %vm1120_vm12 = vcmp.ge.f32.partialorder %v1097_v38, 1.0  ;;  %v4576_v43 = vmul.f32 0.5, %v1148_v21 }
 0x7cf   :  { %v4580_v54 = vsel %vm1120_vm12, %v4435_v8, %v4425_v63  ;;  %v4584_v45 = vsel %vm1120_vm12, %v4429_v17, %v4435_v8  ;;  %v4600_v17 = vld [vmem:[%s6846_s0 + $0x8] sm:$0xff] }
 0x7d0   :  { %v1147_v26 = vadd.f32 %v4584_v45, %v4580_v54  ;;  %v1166_v15 = vsub.f32 %v4591_v4, %v4576_v43 }
 0x7d2   :  { %v4595_v13 = vmul.f32 0.5, %v1147_v26  ;;  %v1175_v24 = vmax.f32 %v1166_v15, 0.0 }
 0x7d4   :  { %v1106_v63 = vpop.xlane.xlu0 %1105  ;;  %v1165_v8 = vsub.f32 %v4600_v17, %v4595_v13  ;;  %v1188_v10 = vsel %vm29_vm0, %v1175_v24, 0.0 }
 0x7d5   :  { %vm1123_vm13 = vcmp.ge.f32.partialorder %v1106_v63, 1.0  ;;  %1189 = vadd.xlane.f32.xlu1 %v1188_v10 }
 0x7d6   :  { %v4607_v46 = vsel %vm1123_vm13, %v4451_v39, %v4442_v61  ;;  %v4611_v32 = vsel %vm1123_vm13, %v4446_v42, %v4451_v39  ;;  %v1174_v55 = vmax.f32 %v1165_v8, 0.0 }
 0x7d7   :  { %v1150_v28 = vadd.f32 %v4611_v32, %v4607_v46 }
 0x7d8   :  { %v1103_v47 = vpop.xlane.xlu1 %1102  ;;  %v1185_v53 = vsel %vm29_vm0, %v1174_v55, 0.0 }
 0x7d9   :  { %vm1122_vm14 = vcmp.ge.f32.partialorder %v1103_v47, 1.0  ;;  %v4616_v40 = vmul.f32 0.5, %v1150_v28  ;;  %1186 = vadd.xlane.f32.xlu0 %v1185_v53 }
 0x7da   :  { %v4620_v62 = vsel %vm1122_vm14, %v4465_v58, %v4455_v14  ;;  %v4624_v61 = vsel %vm1122_vm14, %v4459_v37, %v4465_v58 }
 0x7db   :  { %v1149_v42 = vadd.f32 %v4624_v61, %v4620_v62  ;;  %v1112_v39 = vpop.xlane.xlu0 %1111  ;;  %v1168_v5 = vsub.f32 %v4631_v12, %v4616_v40 }
 0x7dc   :  { %v1109_v57 = vpop.xlane.xlu1 %1108  ;;  %vm1125_vm15 = vcmp.ge.f32.partialorder %v1112_v39, 1.0 }
 0x7dd   :  { %v4635_v14 = vmul.f32 0.5, %v1149_v42  ;;  %vm1124_vm1 = vcmp.ge.f32.partialorder %v1109_v57, 1.0  ;;  %v4639_v37 = vsel %vm1125_vm15, %v4489_v1, %v4469_v7  ;;  %v4643_v58 = vsel %vm1125_vm15, %v4473_v60, %v4489_v1  ;;  %v4660_v60 = vld [vmem:[%s6846_s0 + $0x18] sm:$0xff] }
 0x7de   :  { %v4647_v41 = vsel %vm1124_vm1, %v4492_v11, %v4479_v52  ;;  %v4651_v44 = vsel %vm1124_vm1, %v4483_v2, %v4492_v11  ;;  %v1152_v59 = vadd.f32 %v4643_v58, %v4639_v37  ;;  %v1177_v16 = vmax.f32 %v1168_v5, 0.0 }
 0x7df   :  { %v1151_v7 = vadd.f32 %v4651_v44, %v4647_v41  ;;  %v1118_v31 = vpop.xlane.xlu0 %1117  ;;  %v1167_v52 = vsub.f32 %v4660_v60, %v4635_v14 }
 0x7e0   :  { %v4664_v1 = vmul.f32 0.5, %v1152_v59  ;;  %v1115_v2 = vpop.xlane.xlu1 %1114  ;;  %vm1127_vm2 = vcmp.ge.f32.partialorder %v1118_v31, 1.0  ;;  %v1194_v11 = vsel %vm29_vm0, %v1177_v16, 0.0 }
 0x7e1   :  { %v4667_v22 = vmul.f32 0.5, %v1151_v7  ;;  %vm1126_vm3 = vcmp.ge.f32.partialorder %v1115_v2, 1.0  ;;  %v4671_v29 = vsel %vm1127_vm2, %v4523_v25, %v4496_v30  ;;  %v4675_v0 = vsel %vm1127_vm2, %v4500_v36, %v4523_v25  ;;  %1195 = vadd.xlane.f32.xlu1 %v1194_v11  ;;  %v4694_v25 = vld [vmem:[%s6846_s0 + $0x30] sm:$0xff] }
 0x7e2   :  { %v4679_v50 = vsel %vm1126_vm3, %v4526_v23, %v4506_v27  ;;  %v4683_v33 = vsel %vm1126_vm3, %v4510_v35, %v4526_v23  ;;  %v1154_v6 = vadd.f32 %v4675_v0, %v4671_v29  ;;  %v1176_v21 = vmax.f32 %v1167_v52, 0.0 }
 0x7e3   :  { %v1153_v30 = vadd.f32 %v4683_v33, %v4679_v50  ;;  %v1169_v36 = vsub.f32 %v4519_v18, %v4667_v22  ;;  %v1170_v27 = vsub.f32 %v4694_v25, %v4664_v1 }
 0x7e4   :  { %v4698_v35 = vmul.f32 0.5, %v1154_v6  ;;  %v1191_v23 = vsel %vm29_vm0, %v1176_v21, 0.0 }
 0x7e5   :  { %v4701_v56 = vmul.f32 0.5, %v1153_v30  ;;  %1192 = vadd.xlane.f32.xlu0 %v1191_v23  ;;  %v1178_v38 = vmax.f32 %v1169_v36, 0.0  ;;  %v1179_v26 = vmax.f32 %v1170_v27, 0.0 }
 0x7e6   :  { %v1172_v15 = vsub.f32 %v4531_v9, %v4698_v35 }
 0x7e7   :  { %v1197_v24 = vsel %vm29_vm0, %v1178_v38, 0.0  ;;  %v1200_v63 = vsel %vm29_vm0, %v1179_v26, 0.0  ;;  %v1171_v8 = vsub.f32 %v4540_v20, %v4701_v56 }
 0x7e8   :  { %1201 = vadd.xlane.f32.xlu1 %v1200_v63  ;;  %v1181_v10 = vmax.f32 %v1172_v15, 0.0 }
 0x7e9   :  { %1198 = vadd.xlane.f32.xlu0 %v1197_v24  ;;  %v1180_v55 = vmax.f32 %v1171_v8, 0.0 }
 0x7ea   :  { %v1206_v28 = vsel %vm29_vm0, %v1181_v10, 0.0 }
 0x7eb   :  { %v1203_v47 = vsel %vm29_vm0, %v1180_v55, 0.0 }
 0x7ec   :  { %1207 = vadd.xlane.f32.xlu1 %v1206_v28 }
 0x7ed   :  { %1204 = vadd.xlane.f32.xlu0 %v1203_v47 }
 0x85a   :  { %v1184_v53 = vpop.xlane.xlu1 %1183 }
 0x85b   :  { %vm1209_vm4 = vcmp.ge.f32.partialorder %v1184_v53, 1.0 }
 0x85c   :  { %v4713_v42 = vsel %vm1209_vm4, %v4556_v19, %v4548_v51  ;;  %v4717_v39 = vsel %vm1209_vm4, %v4552_v3, %v4556_v19 }
 0x85d   :  { %v1236_v5 = vadd.f32 %v4717_v39, %v4713_v42 }
 0x85f   :  { %v4721_v57 = vmul.f32 0.5, %v1236_v5 }
 0x861   :  { %v1254_v59 = vsub.f32 %v4561_v34, %v4721_v57 }
 0x862   :  { %v1190_v16 = vpop.xlane.xlu1 %1189 }
 0x863   :  { %vm1211_vm5 = vcmp.ge.f32.partialorder %v1190_v16, 1.0  ;;  %v1263_v7 = vmax.f32 %v1254_v59, 0.0 }
 0x864   :  { %v4727_v31 = vsel %vm1211_vm5, %v4576_v43, %v4567_v48  ;;  %v4731_v51 = vsel %vm1211_vm5, %v4571_v49, %v4576_v43 }
 0x865   :  { %v1238_v3 = vadd.f32 %v4731_v51, %v4727_v31  ;;  %v1272_v19 = vsel %vm29_vm0, %v1263_v7, 0.0 }
 0x866   :  { %v1187_v52 = vpop.xlane.xlu0 %1186  ;;  %1273 = vadd.xlane.f32.xlu0 %v1272_v19 }
 0x867   :  { %v4736_v2 = vmul.f32 0.5, %v1238_v3  ;;  %vm1210_vm6 = vcmp.ge.f32.partialorder %v1187_v52, 1.0 }
 0x868   :  { %v4740_v11 = vsel %vm1210_vm6, %v4595_v13, %v4580_v54  ;;  %v4744_v48 = vsel %vm1210_vm6, %v4584_v45, %v4595_v13 }
 0x869   :  { %v1237_v49 = vadd.f32 %v4744_v48, %v4740_v11  ;;  %v1256_v43 = vsub.f32 %v4591_v4, %v4736_v2 }
 0x86b   :  { %v4750_v6 = vmul.f32 0.5, %v1237_v49  ;;  %v1265_v21 = vmax.f32 %v1256_v43, 0.0 }
 0x86d   :  { %v1278_v30 = vsel %vm29_vm0, %v1265_v21, 0.0  ;;  %v1255_v36 = vsub.f32 %v4600_v17, %v4750_v6 }
 0x86e   :  { %v1196_v54 = vpop.xlane.xlu1 %1195  ;;  %1279 = vadd.xlane.f32.xlu0 %v1278_v30 }
 0x86f   :  { %vm1213_vm7 = vcmp.ge.f32.partialorder %v1196_v54, 1.0  ;;  %v1264_v27 = vmax.f32 %v1255_v36, 0.0 }
 0x870   :  { %v4757_v45 = vsel %vm1213_vm7, %v4616_v40, %v4607_v46  ;;  %v4761_v13 = vsel %vm1213_vm7, %v4611_v32, %v4616_v40 }
 0x871   :  { %v1240_v23 = vadd.f32 %v4761_v13, %v4757_v45  ;;  %v1275_v38 = vsel %vm29_vm0, %v1264_v27, 0.0 }
 0x872   :  { %v1193_v26 = vpop.xlane.xlu0 %1192  ;;  %1276 = vadd.xlane.f32.xlu1 %v1275_v38 }
 0x873   :  { %v4766_v15 = vmul.f32 0.5, %v1240_v23  ;;  %vm1212_vm8 = vcmp.ge.f32.partialorder %v1193_v26, 1.0 }
 0x874   :  { %v4770_v24 = vsel %vm1212_vm8, %v4635_v14, %v4620_v62  ;;  %v4774_v46 = vsel %vm1212_vm8, %v4624_v61, %v4635_v14 }
 0x875   :  { %v1239_v32 = vadd.f32 %v4774_v46, %v4770_v24  ;;  %v1202_v40 = vpop.xlane.xlu1 %1201  ;;  %v1258_v63 = vsub.f32 %v4631_v12, %v4766_v15 }
 0x876   :  { %vm1215_vm9 = vcmp.ge.f32.partialorder %v1202_v40, 1.0  ;;  %v1199_v8 = vpop.xlane.xlu0 %1198 }
 0x877   :  { %v4780_v10 = vmul.f32 0.5, %v1239_v32  ;;  %v4784_v55 = vsel %vm1215_vm9, %v4664_v1, %v4639_v37  ;;  %v4788_v62 = vsel %vm1215_vm9, %v4643_v58, %v4664_v1  ;;  %vm1214_vm10 = vcmp.ge.f32.partialorder %v1199_v8, 1.0 }
 0x878   :  { %v1242_v61 = vadd.f32 %v4788_v62, %v4784_v55  ;;  %v4794_v14 = vsel %vm1214_vm10, %v4667_v22, %v4647_v41  ;;  %v4798_v28 = vsel %vm1214_vm10, %v4651_v44, %v4667_v22  ;;  %v1267_v47 = vmax.f32 %v1258_v63, 0.0 }
 0x879   :  { %v1241_v37 = vadd.f32 %v4798_v28, %v4794_v14  ;;  %v1208_v53 = vpop.xlane.xlu1 %1207  ;;  %v1257_v58 = vsub.f32 %v4660_v60, %v4780_v10 }
 0x87a   :  { %v4804_v1 = vmul.f32 0.5, %v1242_v61  ;;  %vm1217_vm11 = vcmp.ge.f32.partialorder %v1208_v53, 1.0  ;;  %v1205_v5 = vpop.xlane.xlu0 %1204  ;;  %v1284_v59 = vsel %vm29_vm0, %v1267_v47, 0.0 }
 0x87b   :  { %v4807_v41 = vmul.f32 0.5, %v1241_v37  ;;  %v4811_v44 = vsel %vm1217_vm11, %v4698_v35, %v4671_v29  ;;  %v4815_v22 = vsel %vm1217_vm11, %v4675_v0, %v4698_v35  ;;  %vm1216_vm12 = vcmp.ge.f32.partialorder %v1205_v5, 1.0  ;;  %1285 = vadd.xlane.f32.xlu0 %v1284_v59 }
 0x87c   :  { %v1244_v16 = vadd.f32 %v4815_v22, %v4811_v44  ;;  %v4821_v7 = vsel %vm1216_vm12, %v4701_v56, %v4679_v50  ;;  %v4825_v3 = vsel %vm1216_vm12, %v4683_v33, %v4701_v56  ;;  %v1266_v19 = vmax.f32 %v1257_v58, 0.0 }
 0x87d   :  { %v1243_v29 = vadd.f32 %v4825_v3, %v4821_v7  ;;  %v1260_v0 = vsub.f32 %v4694_v25, %v4804_v1  ;;  %v1259_v35 = vsub.f32 %v4519_v18, %v4807_v41 }
 0x87e   :  { %v4833_v52 = vmul.f32 0.5, %v1244_v16  ;;  %v1281_v49 = vsel %vm29_vm0, %v1266_v19, 0.0 }
 0x87f   :  { %v4836_v50 = vmul.f32 0.5, %v1243_v29  ;;  %1282 = vadd.xlane.f32.xlu1 %v1281_v49  ;;  %v1269_v43 = vmax.f32 %v1260_v0, 0.0  ;;  %v1268_v33 = vmax.f32 %v1259_v35, 0.0 }
 0x880   :  { %v1262_v56 = vsub.f32 %v4531_v9, %v4833_v52 }
 0x881   :  { %v1290_v21 = vsel %vm29_vm0, %v1269_v43, 0.0  ;;  %v1287_v30 = vsel %vm29_vm0, %v1268_v33, 0.0  ;;  %v1261_v36 = vsub.f32 %v4540_v20, %v4836_v50 }
 0x882   :  { %1291 = vadd.xlane.f32.xlu0 %v1290_v21  ;;  %v1271_v54 = vmax.f32 %v1262_v56, 0.0 }
 0x883   :  { %1288 = vadd.xlane.f32.xlu1 %v1287_v30  ;;  %v1270_v27 = vmax.f32 %v1261_v36, 0.0 }
 0x884   :  { %v1296_v23 = vsel %vm29_vm0, %v1271_v54, 0.0 }
 0x885   :  { %v1293_v38 = vsel %vm29_vm0, %v1270_v27, 0.0 }
 0x886   :  { %1297 = vadd.xlane.f32.xlu0 %v1296_v23 }
 0x887   :  { %1294 = vadd.xlane.f32.xlu1 %v1293_v38 }
 0x8f3   :  { %v1274_v26 = vpop.xlane.xlu0 %1273 }
 0x8f4   :  { %vm1299_vm13 = vcmp.ge.f32.partialorder %v1274_v26, 1.0 }
 0x8f5   :  { %v4848_v32 = vsel %vm1299_vm13, %v4721_v57, %v4713_v42  ;;  %v4852_v40 = vsel %vm1299_vm13, %v4717_v39, %v4721_v57 }
 0x8f6   :  { %v1326_v63 = vadd.f32 %v4852_v40, %v4848_v32 }
 0x8f8   :  { %v4856_v8 = vmul.f32 0.5, %v1326_v63 }
 0x8fa   :  { %v1344_v61 = vsub.f32 %v4561_v34, %v4856_v8 }
 0x8fb   :  { %v1280_v47 = vpop.xlane.xlu0 %1279 }
 0x8fc   :  { %vm1301_vm14 = vcmp.ge.f32.partialorder %v1280_v47, 1.0  ;;  %v1353_v37 = vmax.f32 %v1344_v61, 0.0 }
 0x8fd   :  { %v4862_v53 = vsel %vm1301_vm14, %v4736_v2, %v4727_v31  ;;  %v4866_v42 = vsel %vm1301_vm14, %v4731_v51, %v4736_v2 }
 0x8fe   :  { %v1328_v39 = vadd.f32 %v4866_v42, %v4862_v53  ;;  %v1362_v57 = vsel %vm29_vm0, %v1353_v37, 0.0 }
 0x8ff   :  { %v1277_v58 = vpop.xlane.xlu1 %1276  ;;  %1363 = vadd.xlane.f32.xlu1 %v1362_v57 }
 0x900   :  { %vm1300_vm15 = vcmp.ge.f32.partialorder %v1277_v58, 1.0  ;;  %v4871_v5 = vmul.f32 0.5, %v1328_v39 }
 0x901   :  { %v4875_v59 = vsel %vm1300_vm15, %v4750_v6, %v4740_v11  ;;  %v4879_v31 = vsel %vm1300_vm15, %v4744_v48, %v4750_v6 }
 0x902   :  { %v1327_v51 = vadd.f32 %v4879_v31, %v4875_v59  ;;  %v1346_v2 = vsub.f32 %v4591_v4, %v4871_v5 }
 0x904   :  { %v4885_v16 = vmul.f32 0.5, %v1327_v51  ;;  %v1355_v19 = vmax.f32 %v1346_v2, 0.0 }
 0x906   :  { %v1345_v29 = vsub.f32 %v4600_v17, %v4885_v16  ;;  %v1368_v0 = vsel %vm29_vm0, %v1355_v19, 0.0 }
 0x907   :  { %1369 = vadd.xlane.f32.xlu1 %v1368_v0 }
 0x908   :  { %v1286_v11 = vpop.xlane.xlu0 %1285  ;;  %v1354_v35 = vmax.f32 %v1345_v29, 0.0 }
 0x909   :  { %vm1303_vm1 = vcmp.ge.f32.partialorder %v1286_v11, 1.0 }
 0x90a   :  { %v4892_v48 = vsel %vm1303_vm1, %v4766_v15, %v4757_v45  ;;  %v4896_v6 = vsel %vm1303_vm1, %v4761_v13, %v4766_v15  ;;  %v1365_v49 = vsel %vm29_vm0, %v1354_v35, 0.0 }
 0x90b   :  { %v1330_v43 = vadd.f32 %v4896_v6, %v4892_v48  ;;  %1366 = vadd.xlane.f32.xlu0 %v1365_v49 }
 0x90c   :  { %v1283_v33 = vpop.xlane.xlu1 %1282 }
 0x90d   :  { %vm1302_vm2 = vcmp.ge.f32.partialorder %v1283_v33, 1.0  ;;  %v4901_v56 = vmul.f32 0.5, %v1330_v43 }
 0x90e   :  { %v4905_v21 = vsel %vm1302_vm2, %v4780_v10, %v4770_v24  ;;  %v4909_v45 = vsel %vm1302_vm2, %v4774_v46, %v4780_v10 }
 0x90f   :  { %v1329_v13 = vadd.f32 %v4909_v45, %v4905_v21  ;;  %v1292_v15 = vpop.xlane.xlu0 %1291  ;;  %v1348_v30 = vsub.f32 %v4631_v12, %v4901_v56 }
 0x910   :  { %v1289_v36 = vpop.xlane.xlu1 %1288  ;;  %vm1305_vm3 = vcmp.ge.f32.partialorder %v1292_v15, 1.0 }
 0x911   :  { %v4915_v54 = vmul.f32 0.5, %v1329_v13  ;;  %vm1304_vm4 = vcmp.ge.f32.partialorder %v1289_v36, 1.0  ;;  %v4919_v24 = vsel %vm1305_vm3, %v4804_v1, %v4784_v55  ;;  %v4923_v46 = vsel %vm1305_vm3, %v4788_v62, %v4804_v1 }
 0x912   :  { %v4927_v10 = vsel %vm1304_vm4, %v4807_v41, %v4794_v14  ;;  %v4931_v27 = vsel %vm1304_vm4, %v4798_v28, %v4807_v41  ;;  %v1332_v23 = vadd.f32 %v4923_v46, %v4919_v24  ;;  %v1357_v38 = vmax.f32 %v1348_v30, 0.0 }
 0x913   :  { %v1331_v55 = vadd.f32 %v4931_v27, %v4927_v10  ;;  %v1298_v26 = vpop.xlane.xlu0 %1297  ;;  %v1347_v62 = vsub.f32 %v4660_v60, %v4915_v54 }
 0x914   :  { %v4939_v1 = vmul.f32 0.5, %v1332_v23  ;;  %v1295_v63 = vpop.xlane.xlu1 %1294  ;;  %vm1307_vm5 = vcmp.ge.f32.partialorder %v1298_v26, 1.0  ;;  %v1374_v14 = vsel %vm29_vm0, %v1357_v38, 0.0 }
 0x915   :  { %v4942_v61 = vmul.f32 0.5, %v1331_v55  ;;  %vm1306_vm6 = vcmp.ge.f32.partialorder %v1295_v63, 1.0  ;;  %v4946_v28 = vsel %vm1307_vm5, %v4833_v52, %v4811_v44  ;;  %v4950_v41 = vsel %vm1307_vm5, %v4815_v22, %v4833_v52  ;;  %1375 = vadd.xlane.f32.xlu1 %v1374_v14 }
 0x916   :  { %v4954_v47 = vsel %vm1306_vm6, %v4836_v50, %v4821_v7  ;;  %v4958_v37 = vsel %vm1306_vm6, %v4825_v3, %v4836_v50  ;;  %v1334_v39 = vadd.f32 %v4950_v41, %v4946_v28  ;;  %v1356_v57 = vmax.f32 %v1347_v62, 0.0 }
 0x917   :  { %v1333_v44 = vadd.f32 %v4958_v37, %v4954_v47  ;;  %v1349_v22 = vsub.f32 %v4519_v18, %v4942_v61  ;;  %v1350_v52 = vsub.f32 %v4694_v25, %v4939_v1 }
 0x918   :  { %v4968_v58 = vmul.f32 0.5, %v1334_v39  ;;  %v1371_v7 = vsel %vm29_vm0, %v1356_v57, 0.0 }
 0x919   :  { %v4971_v51 = vmul.f32 0.5, %v1333_v44  ;;  %1372 = vadd.xlane.f32.xlu0 %v1371_v7  ;;  %v1358_v3 = vmax.f32 %v1349_v22, 0.0  ;;  %v1359_v50 = vmax.f32 %v1350_v52, 0.0 }
 0x91a   :  { %v1352_v2 = vsub.f32 %v4531_v9, %v4968_v58 }
 0x91b   :  { %v1377_v19 = vsel %vm29_vm0, %v1358_v3, 0.0  ;;  %v1380_v29 = vsel %vm29_vm0, %v1359_v50, 0.0  ;;  %v1351_v0 = vsub.f32 %v4540_v20, %v4971_v51 }
 0x91c   :  { %1381 = vadd.xlane.f32.xlu1 %v1380_v29  ;;  %v1361_v11 = vmax.f32 %v1352_v2, 0.0 }
 0x91d   :  { %1378 = vadd.xlane.f32.xlu0 %v1377_v19  ;;  %v1360_v35 = vmax.f32 %v1351_v0, 0.0 }
 0x91e   :  { %v1386_v49 = vsel %vm29_vm0, %v1361_v11, 0.0 }
 0x91f   :  { %v1383_v43 = vsel %vm29_vm0, %v1360_v35, 0.0 }
 0x920   :  { %1387 = vadd.xlane.f32.xlu1 %v1386_v49 }
 0x921   :  { %1384 = vadd.xlane.f32.xlu0 %v1383_v43 }
 0x98c   :  { %v1364_v33 = vpop.xlane.xlu1 %1363 }
 0x98d   :  { %vm1389_vm7 = vcmp.ge.f32.partialorder %v1364_v33, 1.0 }
 0x98e   :  { %v4983_v13 = vsel %vm1389_vm7, %v4856_v8, %v4848_v32  ;;  %v4987_v15 = vsel %vm1389_vm7, %v4852_v40, %v4856_v8 }
 0x98f   :  { %v1416_v30 = vadd.f32 %v4987_v15, %v4983_v13 }
 0x991   :  { %v4991_v36 = vmul.f32 0.5, %v1416_v30 }
 0x993   :  { %v1434_v23 = vsub.f32 %v4561_v34, %v4991_v36 }
 0x994   :  { %v1370_v38 = vpop.xlane.xlu1 %1369 }
 0x995   :  { %vm1391_vm8 = vcmp.ge.f32.partialorder %v1370_v38, 1.0  ;;  %v1443_v55 = vmax.f32 %v1434_v23, 0.0 }
 0x996   :  { %v4997_v26 = vsel %vm1391_vm8, %v4871_v5, %v4862_v53  ;;  %v5001_v32 = vsel %vm1391_vm8, %v4866_v42, %v4871_v5 }
 0x997   :  { %v1418_v40 = vadd.f32 %v5001_v32, %v4997_v26  ;;  %v1452_v8 = vsel %vm29_vm0, %v1443_v55, 0.0 }
 0x998   :  { %v1367_v62 = vpop.xlane.xlu0 %1366  ;;  %1453 = vadd.xlane.f32.xlu0 %v1452_v8 }
 0x999   :  { %v5006_v63 = vmul.f32 0.5, %v1418_v40  ;;  %vm1390_vm9 = vcmp.ge.f32.partialorder %v1367_v62, 1.0 }
 0x99a   :  { %v5010_v14 = vsel %vm1390_vm9, %v4885_v16, %v4875_v59  ;;  %v5014_v53 = vsel %vm1390_vm9, %v4879_v31, %v4885_v16 }
 0x99b   :  { %v1417_v42 = vadd.f32 %v5014_v53, %v5010_v14  ;;  %v1436_v5 = vsub.f32 %v4591_v4, %v5006_v63 }
 0x99d   :  { %v5020_v39 = vmul.f32 0.5, %v1417_v42  ;;  %v1445_v57 = vmax.f32 %v1436_v5, 0.0 }
 0x99f   :  { %v1458_v44 = vsel %vm29_vm0, %v1445_v57, 0.0  ;;  %v1435_v22 = vsub.f32 %v4600_v17, %v5020_v39 }
 0x9a0   :  { %1459 = vadd.xlane.f32.xlu0 %v1458_v44 }
 0x9a1   :  { %v1444_v59 = vmax.f32 %v1435_v22, 0.0 }
 0x9a2   :  { %v1376_v52 = vpop.xlane.xlu1 %1375 }
 0x9a3   :  { %vm1393_vm10 = vcmp.ge.f32.partialorder %v1376_v52, 1.0  ;;  %v1455_v31 = vsel %vm29_vm0, %v1444_v59, 0.0 }
 0x9a4   :  { %v5028_v16 = vsel %vm1393_vm10, %v4901_v56, %v4892_v48  ;;  %v5032_v7 = vsel %vm1393_vm10, %v4896_v6, %v4901_v56  ;;  %1456 = vadd.xlane.f32.xlu1 %v1455_v31 }
 0x9a5   :  { %v1420_v3 = vadd.f32 %v5032_v7, %v5028_v16 }
 0x9a6   :  { %v1373_v50 = vpop.xlane.xlu0 %1372 }
 0x9a7   :  { %v5036_v2 = vmul.f32 0.5, %v1420_v3  ;;  %vm1392_vm11 = vcmp.ge.f32.partialorder %v1373_v50, 1.0 }
 0x9a8   :  { %v5040_v19 = vsel %vm1392_vm11, %v4915_v54, %v4905_v21  ;;  %v5044_v48 = vsel %vm1392_vm11, %v4909_v45, %v4915_v54 }
 0x9a9   :  { %v1419_v6 = vadd.f32 %v5044_v48, %v5040_v19  ;;  %v1382_v56 = vpop.xlane.xlu1 %1381  ;;  %v1438_v29 = vsub.f32 %v4631_v12, %v5036_v2 }
 0x9aa   :  { %vm1395_vm12 = vcmp.ge.f32.partialorder %v1382_v56, 1.0  ;;  %v1379_v0 = vpop.xlane.xlu0 %1378 }
 0x9ab   :  { %v5050_v11 = vmul.f32 0.5, %v1419_v6  ;;  %v5054_v35 = vsel %vm1395_vm12, %v4939_v1, %v4919_v24  ;;  %v5058_v21 = vsel %vm1395_vm12, %v4923_v46, %v4939_v1  ;;  %vm1394_vm13 = vcmp.ge.f32.partialorder %v1379_v0, 1.0 }
 0x9ac   :  { %v1422_v45 = vadd.f32 %v5058_v21, %v5054_v35  ;;  %v5064_v54 = vsel %vm1394_vm13, %v4942_v61, %v4927_v10  ;;  %v5068_v49 = vsel %vm1394_vm13, %v4931_v27, %v4942_v61  ;;  %v1447_v43 = vmax.f32 %v1438_v29, 0.0 }
 0x9ad   :  { %v1421_v24 = vadd.f32 %v5068_v49, %v5064_v54  ;;  %v1388_v33 = vpop.xlane.xlu1 %1387  ;;  %v1437_v46 = vsub.f32 %v4660_v60, %v5050_v11 }
 0x9ae   :  { %v5074_v1 = vmul.f32 0.5, %v1422_v45  ;;  %vm1397_vm14 = vcmp.ge.f32.partialorder %v1388_v33, 1.0  ;;  %v1385_v30 = vpop.xlane.xlu0 %1384  ;;  %v1464_v23 = vsel %vm29_vm0, %v1447_v43, 0.0 }
 0x9af   :  { %v5077_v10 = vmul.f32 0.5, %v1421_v24  ;;  %v5081_v27 = vsel %vm1397_vm14, %v4968_v58, %v4946_v28  ;;  %v5085_v61 = vsel %vm1397_vm14, %v4950_v41, %v4968_v58  ;;  %vm1396_vm15 = vcmp.ge.f32.partialorder %v1385_v30, 1.0  ;;  %1465 = vadd.xlane.f32.xlu0 %v1464_v23 }
 0x9b0   :  { %v1424_v38 = vadd.f32 %v5085_v61, %v5081_v27  ;;  %v5091_v55 = vsel %vm1396_vm15, %v4971_v51, %v4954_v47  ;;  %v5095_v40 = vsel %vm1396_vm15, %v4958_v37, %v4971_v51  ;;  %v1446_v8 = vmax.f32 %v1437_v46, 0.0 }
 0x9b1   :  { %v1423_v28 = vadd.f32 %v5095_v40, %v5091_v55  ;;  %v1440_v41 = vsub.f32 %v4694_v25, %v5074_v1  ;;  %v1439_v58 = vsub.f32 %v4519_v18, %v5077_v10 }
 0x9b2   :  { %v5103_v62 = vmul.f32 0.5, %v1424_v38  ;;  %v1461_v42 = vsel %vm29_vm0, %v1446_v8, 0.0 }
 0x9b3   :  { %v5106_v47 = vmul.f32 0.5, %v1423_v28  ;;  %1462 = vadd.xlane.f32.xlu1 %v1461_v42  ;;  %v1449_v5 = vmax.f32 %v1440_v41, 0.0  ;;  %v1448_v37 = vmax.f32 %v1439_v58, 0.0 }
 0x9b4   :  { %v1442_v51 = vsub.f32 %v4531_v9, %v5103_v62 }
 0x9b5   :  { %v1470_v57 = vsel %vm29_vm0, %v1449_v5, 0.0  ;;  %v1467_v44 = vsel %vm29_vm0, %v1448_v37, 0.0  ;;  %v1441_v22 = vsub.f32 %v4540_v20, %v5106_v47 }
 0x9b6   :  { %1471 = vadd.xlane.f32.xlu0 %v1470_v57  ;;  %v1451_v59 = vmax.f32 %v1442_v51, 0.0 }
 0x9b7   :  { %1468 = vadd.xlane.f32.xlu1 %v1467_v44  ;;  %v1450_v52 = vmax.f32 %v1441_v22, 0.0 }
 0x9b8   :  { %v1476_v31 = vsel %vm29_vm0, %v1451_v59, 0.0 }
 0x9b9   :  { %v1473_v3 = vsel %vm29_vm0, %v1450_v52, 0.0 }
 0x9ba   :  { %1477 = vadd.xlane.f32.xlu0 %v1476_v31 }
 0x9bb   :  { %1474 = vadd.xlane.f32.xlu1 %v1473_v3 }
 0xa25   :  { %v1454_v50 = vpop.xlane.xlu0 %1453 }
 0xa26   :  { %vm1479_vm1 = vcmp.ge.f32.partialorder %v1454_v50, 1.0 }
 0xa27   :  { %v5118_v6 = vsel %vm1479_vm1, %v4991_v36, %v4983_v13  ;;  %v5122_v56 = vsel %vm1479_vm1, %v4987_v15, %v4991_v36 }
 0xa28   :  { %v1506_v29 = vadd.f32 %v5122_v56, %v5118_v6 }
 0xa2a   :  { %v5126_v0 = vmul.f32 0.5, %v1506_v29 }
 0xa2c   :  { %v1524_v45 = vsub.f32 %v4561_v34, %v5126_v0 }
 0xa2d   :  { %v1460_v43 = vpop.xlane.xlu0 %1459 }
 0xa2e   :  { %vm1481_vm2 = vcmp.ge.f32.partialorder %v1460_v43, 1.0  ;;  %v1533_v24 = vmax.f32 %v1524_v45, 0.0 }
 0xa2f   :  { %v5132_v33 = vsel %vm1481_vm2, %v5006_v63, %v4997_v26  ;;  %v5136_v13 = vsel %vm1481_vm2, %v5001_v32, %v5006_v63 }
 0xa30   :  { %v1508_v15 = vadd.f32 %v5136_v13, %v5132_v33  ;;  %v1542_v36 = vsel %vm29_vm0, %v1533_v24, 0.0 }
 0xa31   :  { %v1457_v46 = vpop.xlane.xlu1 %1456  ;;  %1543 = vadd.xlane.f32.xlu1 %v1542_v36 }
 0xa32   :  { %vm1480_vm3 = vcmp.ge.f32.partialorder %v1457_v46, 1.0  ;;  %v5141_v30 = vmul.f32 0.5, %v1508_v15 }
 0xa33   :  { %v5145_v23 = vsel %vm1480_vm3, %v5020_v39, %v5010_v14  ;;  %v5149_v26 = vsel %vm1480_vm3, %v5014_v53, %v5020_v39 }
 0xa34   :  { %v1507_v32 = vadd.f32 %v5149_v26, %v5145_v23  ;;  %v1526_v63 = vsub.f32 %v4591_v4, %v5141_v30 }
 0xa36   :  { %v5155_v38 = vmul.f32 0.5, %v1507_v32  ;;  %v1535_v8 = vmax.f32 %v1526_v63, 0.0 }
 0xa38   :  { %v1525_v28 = vsub.f32 %v4600_v17, %v5155_v38  ;;  %v1548_v41 = vsel %vm29_vm0, %v1535_v8, 0.0 }
 0xa39   :  { %1549 = vadd.xlane.f32.xlu1 %v1548_v41 }
 0xa3a   :  { %v1534_v14 = vmax.f32 %v1525_v28, 0.0 }
 0xa3c   :  { %v1466_v58 = vpop.xlane.xlu0 %1465  ;;  %v1545_v53 = vsel %vm29_vm0, %v1534_v14, 0.0 }
 0xa3d   :  { %vm1483_vm4 = vcmp.ge.f32.partialorder %v1466_v58, 1.0  ;;  %1546 = vadd.xlane.f32.xlu0 %v1545_v53 }
 0xa3e   :  { %v5163_v39 = vsel %vm1483_vm4, %v5036_v2, %v5028_v16  ;;  %v5167_v42 = vsel %vm1483_vm4, %v5032_v7, %v5036_v2 }
 0xa3f   :  { %v1510_v5 = vadd.f32 %v5167_v42, %v5163_v39 }
 0xa40   :  { %v1463_v37 = vpop.xlane.xlu1 %1462 }
 0xa41   :  { %vm1482_vm5 = vcmp.ge.f32.partialorder %v1463_v37, 1.0  ;;  %v5171_v51 = vmul.f32 0.5, %v1510_v5 }
 0xa42   :  { %v5175_v57 = vsel %vm1482_vm5, %v5050_v11, %v5040_v19  ;;  %v5179_v44 = vsel %vm1482_vm5, %v5044_v48, %v5050_v11 }
 0xa43   :  { %v1509_v16 = vadd.f32 %v5179_v44, %v5175_v57  ;;  %v1472_v7 = vpop.xlane.xlu0 %1471  ;;  %v1528_v2 = vsub.f32 %v4631_v12, %v5171_v51 }
 0xa44   :  { %v1469_v22 = vpop.xlane.xlu1 %1468  ;;  %vm1485_vm6 = vcmp.ge.f32.partialorder %v1472_v7, 1.0 }
 0xa45   :  { %v5185_v59 = vmul.f32 0.5, %v1509_v16  ;;  %vm1484_vm7 = vcmp.ge.f32.partialorder %v1469_v22, 1.0  ;;  %v5189_v19 = vsel %vm1485_vm6, %v5074_v1, %v5054_v35  ;;  %v5193_v48 = vsel %vm1485_vm6, %v5058_v21, %v5074_v1 }
 0xa46   :  { %v5197_v11 = vsel %vm1484_vm7, %v5077_v10, %v5064_v54  ;;  %v5201_v52 = vsel %vm1484_vm7, %v5068_v49, %v5077_v10  ;;  %v1512_v31 = vadd.f32 %v5193_v48, %v5189_v19  ;;  %v1537_v3 = vmax.f32 %v1528_v2, 0.0 }
 0xa47   :  { %v1511_v35 = vadd.f32 %v5201_v52, %v5197_v11  ;;  %v1478_v50 = vpop.xlane.xlu0 %1477  ;;  %v1527_v21 = vsub.f32 %v4660_v60, %v5185_v59 }
 0xa48   :  { %v5209_v1 = vmul.f32 0.5, %v1512_v31  ;;  %v1475_v29 = vpop.xlane.xlu1 %1474  ;;  %vm1487_vm8 = vcmp.ge.f32.partialorder %v1478_v50, 1.0  ;;  %v1554_v54 = vsel %vm29_vm0, %v1537_v3, 0.0 }
 0xa49   :  { %v5212_v45 = vmul.f32 0.5, %v1511_v35  ;;  %vm1486_vm9 = vcmp.ge.f32.partialorder %v1475_v29, 1.0  ;;  %v5216_v49 = vsel %vm1487_vm8, %v5103_v62, %v5081_v27  ;;  %v5220_v10 = vsel %vm1487_vm8, %v5085_v61, %v5103_v62  ;;  %1555 = vadd.xlane.f32.xlu1 %v1554_v54 }
 0xa4a   :  { %v5224_v43 = vsel %vm1486_vm9, %v5106_v47, %v5091_v55  ;;  %v5228_v24 = vsel %vm1486_vm9, %v5095_v40, %v5106_v47  ;;  %v1514_v15 = vadd.f32 %v5220_v10, %v5216_v49  ;;  %v1536_v36 = vmax.f32 %v1527_v21, 0.0 }
 0xa4b   :  { %v1513_v27 = vadd.f32 %v5228_v24, %v5224_v43  ;;  %v1529_v61 = vsub.f32 %v4519_v18, %v5212_v45  ;;  %v1530_v62 = vsub.f32 %v4694_v25, %v5209_v1 }
 0xa4c   :  { %v5238_v46 = vmul.f32 0.5, %v1514_v15  ;;  %v1551_v55 = vsel %vm29_vm0, %v1536_v36, 0.0 }
 0xa4d   :  { %v5241_v32 = vmul.f32 0.5, %v1513_v27  ;;  %1552 = vadd.xlane.f32.xlu0 %v1551_v55  ;;  %v1538_v40 = vmax.f32 %v1529_v61, 0.0  ;;  %v1539_v47 = vmax.f32 %v1530_v62, 0.0 }
 0xa4e   :  { %v1532_v63 = vsub.f32 %v4531_v9, %v5238_v46 }
 0xa4f   :  { %v1557_v8 = vsel %vm29_vm0, %v1538_v40, 0.0  ;;  %v1560_v28 = vsel %vm29_vm0, %v1539_v47, 0.0  ;;  %v1531_v18 = vsub.f32 %v4540_v20, %v5241_v32 }
 0xa50   :  { %1561 = vadd.xlane.f32.xlu1 %v1560_v28  ;;  %v1541_v41 = vmax.f32 %v1532_v63, 0.0 }
 0xa51   :  { %1558 = vadd.xlane.f32.xlu0 %v1557_v8  ;;  %v1540_v14 = vmax.f32 %v1531_v18, 0.0 }
 0xa52   :  { %v1566_v58 = vsel %vm29_vm0, %v1541_v41, 0.0 }
 0xa53   :  { %v1563_v53 = vsel %vm29_vm0, %v1540_v14, 0.0 }
 0xa54   :  { %1567 = vadd.xlane.f32.xlu1 %v1566_v58 }
 0xa55   :  { %1564 = vadd.xlane.f32.xlu0 %v1563_v53 }
 0xabe   :  { %v1544_v5 = vpop.xlane.xlu1 %1543 }
 0xabf   :  { %vm1569_vm10 = vcmp.ge.f32.partialorder %v1544_v5, 1.0 }
 0xac0   :  { %v5253_v9 = vsel %vm1569_vm10, %v5126_v0, %v5118_v6  ;;  %v5257_v37 = vsel %vm1569_vm10, %v5122_v56, %v5126_v0 }
 0xac1   :  { %v1596_v20 = vadd.f32 %v5257_v37, %v5253_v9 }
 0xac3   :  { %v5261_v16 = vmul.f32 0.5, %v1596_v20 }
 0xac5   :  { %v1614_v7 = vsub.f32 %v4561_v34, %v5261_v16 }
 0xac6   :  { %v1550_v2 = vpop.xlane.xlu1 %1549 }
 0xac7   :  { %vm1571_vm11 = vcmp.ge.f32.partialorder %v1550_v2, 1.0  ;;  %v1623_v22 = vmax.f32 %v1614_v7, 0.0 }
 0xac8   :  { %v5267_v31 = vsel %vm1571_vm11, %v5141_v30, %v5132_v33  ;;  %v5271_v6 = vsel %vm1571_vm11, %v5136_v13, %v5141_v30 }
 0xac9   :  { %v1598_v56 = vadd.f32 %v5271_v6, %v5267_v31  ;;  %v1632_v0 = vsel %vm29_vm0, %v1623_v22, 0.0 }
 0xaca   :  { %v1547_v3 = vpop.xlane.xlu0 %1546  ;;  %1633 = vadd.xlane.f32.xlu0 %v1632_v0 }
 0xacb   :  { %v5276_v35 = vmul.f32 0.5, %v1598_v56  ;;  %vm1570_vm12 = vcmp.ge.f32.partialorder %v1547_v3, 1.0  ;;  %v5395_v56 = vld [vmem:[%s6846_s0 + $0x38] sm:$0xff] }
 0xacc   :  { %v5280_v34 = vsel %vm1570_vm12, %v5155_v38, %v5145_v23  ;;  %v5284_v33 = vsel %vm1570_vm12, %v5149_v26, %v5155_v38 }
 0xacd   :  { %v1597_v13 = vadd.f32 %v5284_v33, %v5280_v34  ;;  %v1616_v30 = vsub.f32 %v4591_v4, %v5276_v35 }
 0xacf   :  { %v5290_v50 = vmul.f32 0.5, %v1597_v13  ;;  %v1625_v21 = vmax.f32 %v1616_v30, 0.0 }
 0xad1   :  { %v1638_v29 = vsel %vm29_vm0, %v1625_v21, 0.0  ;;  %v1615_v54 = vsub.f32 %v4600_v17, %v5290_v50 }
 0xad2   :  { %1639 = vadd.xlane.f32.xlu0 %v1638_v29 }
 0xad3   :  { %v1624_v23 = vmax.f32 %v1615_v54, 0.0 }
 0xad5   :  { %v1635_v15 = vsel %vm29_vm0, %v1624_v23, 0.0 }
 0xad6   :  { %v1556_v26 = vpop.xlane.xlu1 %1555  ;;  %1636 = vadd.xlane.f32.xlu1 %v1635_v15 }
 0xad7   :  { %vm1573_vm13 = vcmp.ge.f32.partialorder %v1556_v26, 1.0 }
 0xad8   :  { %v5298_v38 = vsel %vm1573_vm13, %v5171_v51, %v5163_v39  ;;  %v5302_v4 = vsel %vm1573_vm13, %v5167_v42, %v5171_v51 }
 0xad9   :  { %v1600_v36 = vadd.f32 %v5302_v4, %v5298_v38 }
 0xada   :  { %v1553_v27 = vpop.xlane.xlu0 %1552 }
 0xadb   :  { %v5306_v17 = vmul.f32 0.5, %v1600_v36  ;;  %vm1572_vm14 = vcmp.ge.f32.partialorder %v1553_v27, 1.0  ;;  %v5416_v36 = vld [vmem:[%s6846_s0] sm:$0xff] }
 0xadc   :  { %v5310_v61 = vsel %vm1572_vm14, %v5185_v59, %v5175_v57  ;;  %v5314_v62 = vsel %vm1572_vm14, %v5179_v44, %v5185_v59 }
 0xadd   :  { %v1599_v39 = vadd.f32 %v5314_v62, %v5310_v61  ;;  %v1562_v42 = vpop.xlane.xlu1 %1561  ;;  %v1618_v51 = vsub.f32 %v4631_v12, %v5306_v17 }
 0xade   :  { %vm1575_vm15 = vcmp.ge.f32.partialorder %v1562_v42, 1.0  ;;  %v1559_v55 = vpop.xlane.xlu0 %1558 }
 0xadf   :  { %v5320_v40 = vmul.f32 0.5, %v1599_v39  ;;  %v5324_v47 = vsel %vm1575_vm15, %v5209_v1, %v5189_v19  ;;  %v5328_v57 = vsel %vm1575_vm15, %v5193_v48, %v5209_v1  ;;  %vm1574_vm1 = vcmp.ge.f32.partialorder %v1559_v55, 1.0 }
 0xae0   :  { %v1602_v44 = vadd.f32 %v5328_v57, %v5324_v47  ;;  %v5334_v59 = vsel %vm1574_vm1, %v5212_v45, %v5197_v11  ;;  %v5338_v12 = vsel %vm1574_vm1, %v5201_v52, %v5212_v45  ;;  %v1627_v63 = vmax.f32 %v1618_v51, 0.0 }
 0xae1   :  { %v1601_v19 = vadd.f32 %v5338_v12, %v5334_v59  ;;  %v1568_v8 = vpop.xlane.xlu1 %1567  ;;  %v1617_v48 = vsub.f32 %v4660_v60, %v5320_v40 }
 0xae2   :  { %v5344_v1 = vmul.f32 0.5, %v1602_v44  ;;  %vm1577_vm2 = vcmp.ge.f32.partialorder %v1568_v8, 1.0  ;;  %v1565_v28 = vpop.xlane.xlu0 %1564  ;;  %v1644_v18 = vsel %vm29_vm0, %v1627_v63, 0.0 }
 0xae3   :  { %v5347_v11 = vmul.f32 0.5, %v1601_v19  ;;  %v5351_v52 = vsel %vm1577_vm2, %v5238_v46, %v5216_v49  ;;  %v5355_v45 = vsel %vm1577_vm2, %v5220_v10, %v5238_v46  ;;  %vm1576_vm3 = vcmp.ge.f32.partialorder %v1565_v28, 1.0  ;;  %1645 = vadd.xlane.f32.xlu0 %v1644_v18  ;;  %v5374_v46 = vld [vmem:[%s6846_s0 + $0x28] sm:$0xff] }
 0xae4   :  { %v1604_v60 = vadd.f32 %v5355_v45, %v5351_v52  ;;  %v5361_v41 = vsel %vm1576_vm3, %v5241_v32, %v5224_v43  ;;  %v5365_v14 = vsel %vm1576_vm3, %v5228_v24, %v5241_v32  ;;  %v1626_v58 = vmax.f32 %v1617_v48, 0.0 }
 0xae5   :  { %v1603_v49 = vadd.f32 %v5365_v14, %v5361_v41  ;;  %v1620_v10 = vsub.f32 %v4694_v25, %v5344_v1  ;;  %v1619_v43 = vsub.f32 %v5374_v46, %v5347_v11  ;;  %v5386_v25 = vld [vmem:[%s6846_s0 + $0x40] sm:$0xff] }
 0xae6   :  { %v5378_v53 = vmul.f32 0.5, %v1604_v60  ;;  %v1641_v24 = vsel %vm29_vm0, %v1626_v58, 0.0 }
 0xae7   :  { %v5381_v32 = vmul.f32 0.5, %v1603_v49  ;;  %1642 = vadd.xlane.f32.xlu1 %v1641_v24  ;;  %v1629_v5 = vmax.f32 %v1620_v10, 0.0  ;;  %v1628_v20 = vmax.f32 %v1619_v43, 0.0 }
 0xae8   :  { %v1622_v7 = vsub.f32 %v5386_v25, %v5378_v53 }
 0xae9   :  { %v1650_v2 = vsel %vm29_vm0, %v1629_v5, 0.0  ;;  %v1647_v22 = vsel %vm29_vm0, %v1628_v20, 0.0  ;;  %v1621_v0 = vsub.f32 %v5395_v56, %v5381_v32 }
 0xaea   :  { %1651 = vadd.xlane.f32.xlu0 %v1650_v2  ;;  %v1631_v3 = vmax.f32 %v1622_v7, 0.0 }
 0xaeb   :  { %1648 = vadd.xlane.f32.xlu1 %v1647_v22  ;;  %v1630_v13 = vmax.f32 %v1621_v0, 0.0 }
 0xaec   :  { %v1656_v30 = vsel %vm29_vm0, %v1631_v3, 0.0 }
 0xaed   :  { %v1653_v21 = vsel %vm29_vm0, %v1630_v13, 0.0 }
 0xaee   :  { %1657 = vadd.xlane.f32.xlu0 %v1656_v30 }
 0xaef   :  { %1654 = vadd.xlane.f32.xlu1 %v1653_v21 }
 0xb57   :  { %v1634_v29 = vpop.xlane.xlu0 %1633 }
 0xb58   :  { %vm1659_vm4 = vcmp.ge.f32.partialorder %v1634_v29, 1.0 }
 0xb59   :  { %v5403_v54 = vsel %vm1659_vm4, %v5261_v16, %v5253_v9  ;;  %v5407_v23 = vsel %vm1659_vm4, %v5257_v37, %v5261_v16 }
 0xb5a   :  { %v1686_v15 = vadd.f32 %v5407_v23, %v5403_v54 }
 0xb5c   :  { %v5411_v26 = vmul.f32 0.5, %v1686_v15 }
 0xb5e   :  { %v1704_v27 = vsub.f32 %v5416_v36, %v5411_v26 }
 0xb5f   :  { %v1640_v39 = vpop.xlane.xlu0 %1639 }
 0xb60   :  { %vm1661_vm5 = vcmp.ge.f32.partialorder %v1640_v39, 1.0  ;;  %v1713_v9 = vmax.f32 %v1704_v27, 0.0 }
 0xb61   :  { %v5422_v37 = vsel %vm1661_vm5, %v5276_v35, %v5267_v31  ;;  %v5426_v16 = vsel %vm1661_vm5, %v5271_v6, %v5276_v35  ;;  %v5446_v35 = vld [vmem:[%s6846_s0 + $0x10] sm:$0xff] }
 0xb62   :  { %v1688_v42 = vadd.f32 %v5426_v16, %v5422_v37  ;;  %v1722_v51 = vsel %vm29_vm0, %v1713_v9, 0.0 }
 0xb63   :  { %v1637_v55 = vpop.xlane.xlu1 %1636  ;;  %1723 = vadd.xlane.f32.xlu1 %v1722_v51 }
 0xb64   :  { %vm1660_vm6 = vcmp.ge.f32.partialorder %v1637_v55, 1.0  ;;  %v5431_v44 = vmul.f32 0.5, %v1688_v42 }
 0xb65   :  { %v5435_v63 = vsel %vm1660_vm6, %v5290_v50, %v5280_v34  ;;  %v5439_v31 = vsel %vm1660_vm6, %v5284_v33, %v5290_v50  ;;  %v5455_v34 = vld [vmem:[%s6846_s0 + $0x8] sm:$0xff] }
 0xb66   :  { %v1687_v6 = vadd.f32 %v5439_v31, %v5435_v63  ;;  %v1706_v19 = vsub.f32 %v5446_v35, %v5431_v44 }
 0xb68   :  { %v5450_v8 = vmul.f32 0.5, %v1687_v6  ;;  %v1715_v48 = vmax.f32 %v1706_v19, 0.0 }
 0xb6a   :  { %v1705_v33 = vsub.f32 %v5455_v34, %v5450_v8  ;;  %v1728_v50 = vsel %vm29_vm0, %v1715_v48, 0.0 }
 0xb6b   :  { %1729 = vadd.xlane.f32.xlu1 %v1728_v50 }
 0xb6c   :  { %v1714_v28 = vmax.f32 %v1705_v33, 0.0 }
 0xb6e   :  { %v1725_v18 = vsel %vm29_vm0, %v1714_v28, 0.0 }
 0xb6f   :  { %1726 = vadd.xlane.f32.xlu0 %v1725_v18 }
 0xb70   :  { %v1646_v60 = vpop.xlane.xlu0 %1645 }
 0xb71   :  { %vm1663_vm7 = vcmp.ge.f32.partialorder %v1646_v60, 1.0 }
 0xb72   :  { %v5463_v58 = vsel %vm1663_vm7, %v5306_v17, %v5298_v38  ;;  %v5467_v49 = vsel %vm1663_vm7, %v5302_v4, %v5306_v17  ;;  %v5486_v17 = vld [vmem:[%s6846_s0 + $0x20] sm:$0xff] }
 0xb73   :  { %v1690_v10 = vadd.f32 %v5467_v49, %v5463_v58 }
 0xb74   :  { %v1643_v43 = vpop.xlane.xlu1 %1642 }
 0xb75   :  { %vm1662_vm8 = vcmp.ge.f32.partialorder %v1643_v43, 1.0  ;;  %v5471_v24 = vmul.f32 0.5, %v1690_v10 }
 0xb76   :  { %v5475_v5 = vsel %vm1662_vm8, %v5320_v40, %v5310_v61  ;;  %v5479_v20 = vsel %vm1662_vm8, %v5314_v62, %v5320_v40 }
 0xb77   :  { %v1689_v38 = vadd.f32 %v5479_v20, %v5475_v5  ;;  %v1652_v4 = vpop.xlane.xlu0 %1651  ;;  %v1708_v7 = vsub.f32 %v5486_v17, %v5471_v24 }
 0xb78   :  { %v1649_v2 = vpop.xlane.xlu1 %1648  ;;  %vm1665_vm9 = vcmp.ge.f32.partialorder %v1652_v4, 1.0 }
 0xb79   :  { %v5490_v61 = vmul.f32 0.5, %v1689_v38  ;;  %vm1664_vm10 = vcmp.ge.f32.partialorder %v1649_v2, 1.0  ;;  %v5494_v62 = vsel %vm1665_vm9, %v5344_v1, %v5324_v47  ;;  %v5498_v40 = vsel %vm1665_vm9, %v5328_v57, %v5344_v1  ;;  %v5515_v57 = vld [vmem:[%s6846_s0 + $0x18] sm:$0xff] }
 0xb7a   :  { %v5502_v22 = vsel %vm1664_vm10, %v5347_v11, %v5334_v59  ;;  %v5506_v0 = vsel %vm1664_vm10, %v5338_v12, %v5347_v11  ;;  %v1692_v3 = vadd.f32 %v5498_v40, %v5494_v62  ;;  %v1717_v13 = vmax.f32 %v1708_v7, 0.0 }
 0xb7b   :  { %v1691_v47 = vadd.f32 %v5506_v0, %v5502_v22  ;;  %v1658_v30 = vpop.xlane.xlu0 %1657  ;;  %v1707_v59 = vsub.f32 %v5515_v57, %v5490_v61 }
 0xb7c   :  { %v5519_v1 = vmul.f32 0.5, %v1692_v3  ;;  %v1655_v12 = vpop.xlane.xlu1 %1654  ;;  %vm1667_vm11 = vcmp.ge.f32.partialorder %v1658_v30, 1.0  ;;  %v1734_v11 = vsel %vm29_vm0, %v1717_v13, 0.0 }
 0xb7d   :  { %v5522_v21 = vmul.f32 0.5, %v1691_v47  ;;  %vm1666_vm12 = vcmp.ge.f32.partialorder %v1655_v12, 1.0  ;;  %v5526_v29 = vsel %vm1667_vm11, %v5378_v53, %v5351_v52  ;;  %v5530_v15 = vsel %vm1667_vm11, %v5355_v45, %v5378_v53  ;;  %1735 = vadd.xlane.f32.xlu1 %v1734_v11  ;;  %v5549_v53 = vld [vmem:[%s6846_s0 + $0x30] sm:$0xff] }
 0xb7e   :  { %v5534_v27 = vsel %vm1666_vm12, %v5381_v32, %v5361_v41  ;;  %v5538_v39 = vsel %vm1666_vm12, %v5365_v14, %v5381_v32  ;;  %v1694_v9 = vadd.f32 %v5530_v15, %v5526_v29  ;;  %v1716_v42 = vmax.f32 %v1707_v59, 0.0 }
 0xb7f   :  { %v1693_v52 = vadd.f32 %v5538_v39, %v5534_v27  ;;  %v1709_v45 = vsub.f32 %v5374_v46, %v5522_v21  ;;  %v1710_v41 = vsub.f32 %v5549_v53, %v5519_v1 }
 0xb80   :  { %v5553_v14 = vmul.f32 0.5, %v1694_v9  ;;  %v1731_v32 = vsel %vm29_vm0, %v1716_v42, 0.0 }
 0xb81   :  { %v5556_v51 = vmul.f32 0.5, %v1693_v52  ;;  %1732 = vadd.xlane.f32.xlu0 %v1731_v32  ;;  %v1718_v55 = vmax.f32 %v1709_v45, 0.0  ;;  %v1719_v6 = vmax.f32 %v1710_v41, 0.0 }
 0xb82   :  { %v1712_v19 = vsub.f32 %v5386_v25, %v5553_v14 }
 0xb83   :  { %v1737_v48 = vsel %vm29_vm0, %v1718_v55, 0.0  ;;  %v1740_v33 = vsel %vm29_vm0, %v1719_v6, 0.0  ;;  %v1711_v50 = vsub.f32 %v5395_v56, %v5556_v51 }
 0xb84   :  { %1741 = vadd.xlane.f32.xlu1 %v1740_v33  ;;  %v1721_v28 = vmax.f32 %v1712_v19, 0.0 }
 0xb85   :  { %1738 = vadd.xlane.f32.xlu0 %v1737_v48  ;;  %v1720_v18 = vmax.f32 %v1711_v50, 0.0 }
 0xb86   :  { %v1746_v60 = vsel %vm29_vm0, %v1721_v28, 0.0 }
 0xb87   :  { %v1743_v10 = vsel %vm29_vm0, %v1720_v18, 0.0 }
 0xb88   :  { %1747 = vadd.xlane.f32.xlu1 %v1746_v60 }
 0xb89   :  { %1744 = vadd.xlane.f32.xlu0 %v1743_v10 }
 0xbf0   :  { %v1724_v43 = vpop.xlane.xlu1 %1723 }
 0xbf1   :  { %vm1749_vm13 = vcmp.ge.f32.partialorder %v1724_v43, 1.0 }
 0xbf2   :  { %v5568_v38 = vsel %vm1749_vm13, %v5411_v26, %v5403_v54  ;;  %v5572_v4 = vsel %vm1749_vm13, %v5407_v23, %v5411_v26 }
 0xbf3   :  { %v1776_v7 = vadd.f32 %v5572_v4, %v5568_v38 }
 0xbf5   :  { %v5576_v2 = vmul.f32 0.5, %v1776_v7 }
 0xbf7   :  { %v1794_v3 = vsub.f32 %v5416_v36, %v5576_v2 }
 0xbf8   :  { %v1730_v13 = vpop.xlane.xlu1 %1729 }
 0xbf9   :  { %vm1751_vm14 = vcmp.ge.f32.partialorder %v1730_v13, 1.0  ;;  %v1803_v47 = vmax.f32 %v1794_v3, 0.0 }
 0xbfa   :  { %v5582_v30 = vsel %vm1751_vm14, %v5431_v44, %v5422_v37  ;;  %v5586_v54 = vsel %vm1751_vm14, %v5426_v16, %v5431_v44 }
 0xbfb   :  { %v1778_v23 = vadd.f32 %v5586_v54, %v5582_v30  ;;  %v1812_v26 = vsel %vm29_vm0, %v1803_v47, 0.0 }
 0xbfc   :  { %v1727_v59 = vpop.xlane.xlu0 %1726  ;;  %1813 = vadd.xlane.f32.xlu0 %v1812_v26 }
 0xbfd   :  { %v5591_v12 = vmul.f32 0.5, %v1778_v23  ;;  %vm1750_vm15 = vcmp.ge.f32.partialorder %v1727_v59, 1.0 }
 0xbfe   :  { %v5595_v11 = vsel %vm1750_vm15, %v5450_v8, %v5435_v63  ;;  %v5599_v37 = vsel %vm1750_vm15, %v5439_v31, %v5450_v8 }
 0xbff   :  { %v1777_v16 = vadd.f32 %v5599_v37, %v5595_v11  ;;  %v1796_v44 = vsub.f32 %v5446_v35, %v5591_v12 }
 0xc01   :  { %v5605_v9 = vmul.f32 0.5, %v1777_v16  ;;  %v1805_v42 = vmax.f32 %v1796_v44, 0.0 }
 0xc03   :  { %v1818_v52 = vsel %vm29_vm0, %v1805_v42, 0.0  ;;  %v1795_v45 = vsub.f32 %v5455_v34, %v5605_v9 }
 0xc04   :  { %1819 = vadd.xlane.f32.xlu0 %v1818_v52 }
 0xc05   :  { %v1804_v63 = vmax.f32 %v1795_v45, 0.0 }
 0xc07   :  { %v1815_v41 = vsel %vm29_vm0, %v1804_v63, 0.0 }
 0xc08   :  { %1816 = vadd.xlane.f32.xlu1 %v1815_v41 }
 0xc0a   :  { %v1736_v31 = vpop.xlane.xlu1 %1735 }
 0xc0b   :  { %vm1753_vm1 = vcmp.ge.f32.partialorder %v1736_v31, 1.0 }
 0xc0c   :  { %v5613_v8 = vsel %vm1753_vm1, %v5471_v24, %v5463_v58  ;;  %v5617_v32 = vsel %vm1753_vm1, %v5467_v49, %v5471_v24 }
 0xc0d   :  { %v1780_v55 = vadd.f32 %v5617_v32, %v5613_v8 }
 0xc0e   :  { %v1733_v6 = vpop.xlane.xlu0 %1732 }
 0xc0f   :  { %v5621_v19 = vmul.f32 0.5, %v1780_v55  ;;  %vm1752_vm2 = vcmp.ge.f32.partialorder %v1733_v6, 1.0 }
 0xc10   :  { %v5625_v48 = vsel %vm1752_vm2, %v5490_v61, %v5475_v5  ;;  %v5629_v33 = vsel %vm1752_vm2, %v5479_v20, %v5490_v61 }
 0xc11   :  { %v1779_v58 = vadd.f32 %v5629_v33, %v5625_v48  ;;  %v1742_v49 = vpop.xlane.xlu1 %1741  ;;  %v1798_v24 = vsub.f32 %v5486_v17, %v5621_v19 }
 0xc12   :  { %vm1755_vm3 = vcmp.ge.f32.partialorder %v1742_v49, 1.0  ;;  %v1739_v50 = vpop.xlane.xlu0 %1738 }
 0xc13   :  { %v5635_v28 = vmul.f32 0.5, %v1779_v58  ;;  %v5639_v18 = vsel %vm1755_vm3, %v5519_v1, %v5494_v62  ;;  %v5643_v5 = vsel %vm1755_vm3, %v5498_v40, %v5519_v1  ;;  %vm1754_vm4 = vcmp.ge.f32.partialorder %v1739_v50, 1.0 }
 0xc14   :  { %v1782_v20 = vadd.f32 %v5643_v5, %v5639_v18  ;;  %v5649_v61 = vsel %vm1754_vm4, %v5522_v21, %v5502_v22  ;;  %v5653_v60 = vsel %vm1754_vm4, %v5506_v0, %v5522_v21  ;;  %v1807_v10 = vmax.f32 %v1798_v24, 0.0 }
 0xc15   :  { %v1781_v62 = vadd.f32 %v5653_v60, %v5649_v61  ;;  %v1748_v43 = vpop.xlane.xlu1 %1747  ;;  %v1797_v40 = vsub.f32 %v5515_v57, %v5635_v28 }
 0xc16   :  { %v5659_v1 = vmul.f32 0.5, %v1782_v20  ;;  %vm1757_vm5 = vcmp.ge.f32.partialorder %v1748_v43, 1.0  ;;  %v1745_v7 = vpop.xlane.xlu0 %1744  ;;  %v1824_v3 = vsel %vm29_vm0, %v1807_v10, 0.0 }
 0xc17   :  { %v5662_v22 = vmul.f32 0.5, %v1781_v62  ;;  %v5666_v0 = vsel %vm1757_vm5, %v5553_v14, %v5526_v29  ;;  %v5670_v21 = vsel %vm1757_vm5, %v5530_v15, %v5553_v14  ;;  %vm1756_vm6 = vcmp.ge.f32.partialorder %v1745_v7, 1.0  ;;  %1825 = vadd.xlane.f32.xlu0 %v1824_v3 }
 0xc18   :  { %v1784_v13 = vadd.f32 %v5670_v21, %v5666_v0  ;;  %v5676_v47 = vsel %vm1756_vm6, %v5556_v51, %v5534_v27  ;;  %v5680_v23 = vsel %vm1756_vm6, %v5538_v39, %v5556_v51  ;;  %v1806_v26 = vmax.f32 %v1797_v40, 0.0 }
 0xc19   :  { %v1783_v29 = vadd.f32 %v5680_v23, %v5676_v47  ;;  %v1800_v15 = vsub.f32 %v5549_v53, %v5659_v1  ;;  %v1799_v14 = vsub.f32 %v5374_v46, %v5662_v22 }
 0xc1a   :  { %v5688_v59 = vmul.f32 0.5, %v1784_v13  ;;  %v1821_v16 = vsel %vm29_vm0, %v1806_v26, 0.0 }
 0xc1b   :  { %v5691_v27 = vmul.f32 0.5, %v1783_v29  ;;  %1822 = vadd.xlane.f32.xlu1 %v1821_v16  ;;  %v1809_v44 = vmax.f32 %v1800_v15, 0.0  ;;  %v1808_v39 = vmax.f32 %v1799_v14, 0.0 }
 0xc1c   :  { %v1802_v51 = vsub.f32 %v5386_v25, %v5688_v59 }
 0xc1d   :  { %v1830_v42 = vsel %vm29_vm0, %v1809_v44, 0.0  ;;  %v1827_v52 = vsel %vm29_vm0, %v1808_v39, 0.0  ;;  %v1801_v45 = vsub.f32 %v5395_v56, %v5691_v27 }
 0xc1e   :  { %1831 = vadd.xlane.f32.xlu0 %v1830_v42  ;;  %v1811_v63 = vmax.f32 %v1802_v51, 0.0 }
 0xc1f   :  { %1828 = vadd.xlane.f32.xlu1 %v1827_v52  ;;  %v1810_v41 = vmax.f32 %v1801_v45, 0.0 }
 0xc20   :  { %v1836_v31 = vsel %vm29_vm0, %v1811_v63, 0.0 }
 0xc21   :  { %v1833_v55 = vsel %vm29_vm0, %v1810_v41, 0.0 }
 0xc22   :  { %1837 = vadd.xlane.f32.xlu0 %v1836_v31 }
 0xc23   :  { %1834 = vadd.xlane.f32.xlu1 %v1833_v55 }
 0xc89   :  { %v1814_v6 = vpop.xlane.xlu0 %1813 }
 0xc8a   :  { %vm1839_vm7 = vcmp.ge.f32.partialorder %v1814_v6, 1.0 }
 0xc8b   :  { %v5703_v58 = vsel %vm1839_vm7, %v5576_v2, %v5568_v38  ;;  %v5707_v49 = vsel %vm1839_vm7, %v5572_v4, %v5576_v2 }
 0xc8c   :  { %v1866_v24 = vadd.f32 %v5707_v49, %v5703_v58 }
 0xc8e   :  { %v5711_v50 = vmul.f32 0.5, %v1866_v24 }
 0xc90   :  { %v1884_v20 = vsub.f32 %v5416_v36, %v5711_v50 }
 0xc91   :  { %v1820_v10 = vpop.xlane.xlu0 %1819 }
 0xc92   :  { %vm1841_vm8 = vcmp.ge.f32.partialorder %v1820_v10, 1.0  ;;  %v1893_v62 = vmax.f32 %v1884_v20, 0.0 }
 0xc93   :  { %v5717_v43 = vsel %vm1841_vm8, %v5591_v12, %v5582_v30  ;;  %v5721_v38 = vsel %vm1841_vm8, %v5586_v54, %v5591_v12 }
 0xc94   :  { %v1868_v4 = vadd.f32 %v5721_v38, %v5717_v43  ;;  %v1902_v2 = vsel %vm29_vm0, %v1893_v62, 0.0 }
 0xc95   :  { %v1817_v40 = vpop.xlane.xlu1 %1816  ;;  %1903 = vadd.xlane.f32.xlu1 %v1902_v2 }
 0xc96   :  { %vm1840_vm9 = vcmp.ge.f32.partialorder %v1817_v40, 1.0  ;;  %v5726_v7 = vmul.f32 0.5, %v1868_v4 }
 0xc97   :  { %v5730_v3 = vsel %vm1840_vm9, %v5605_v9, %v5595_v11  ;;  %v5734_v30 = vsel %vm1840_vm9, %v5599_v37, %v5605_v9 }
 0xc98   :  { %v1867_v54 = vadd.f32 %v5734_v30, %v5730_v3  ;;  %v1886_v12 = vsub.f32 %v5446_v35, %v5726_v7 }
 0xc9a   :  { %v5740_v13 = vmul.f32 0.5, %v1867_v54  ;;  %v1895_v26 = vmax.f32 %v1886_v12, 0.0 }
 0xc9c   :  { %v1885_v29 = vsub.f32 %v5455_v34, %v5740_v13  ;;  %v1908_v15 = vsel %vm29_vm0, %v1895_v26, 0.0 }
 0xc9d   :  { %1909 = vadd.xlane.f32.xlu1 %v1908_v15 }
 0xc9e   :  { %v1894_v11 = vmax.f32 %v1885_v29, 0.0 }
 0xca0   :  { %v1905_v14 = vsel %vm29_vm0, %v1894_v11, 0.0 }
 0xca1   :  { %1906 = vadd.xlane.f32.xlu0 %v1905_v14 }
 0xca4   :  { %v1826_v37 = vpop.xlane.xlu0 %1825 }
 0xca5   :  { %vm1843_vm10 = vcmp.ge.f32.partialorder %v1826_v37, 1.0 }
 0xca6   :  { %v5748_v9 = vsel %vm1843_vm10, %v5621_v19, %v5613_v8  ;;  %v5752_v16 = vsel %vm1843_vm10, %v5617_v32, %v5621_v19 }
 0xca7   :  { %v1870_v44 = vadd.f32 %v5752_v16, %v5748_v9 }
 0xca8   :  { %v1823_v39 = vpop.xlane.xlu1 %1822 }
 0xca9   :  { %vm1842_vm11 = vcmp.ge.f32.partialorder %v1823_v39, 1.0  ;;  %v5756_v51 = vmul.f32 0.5, %v1870_v44 }
 0xcaa   :  { %v5760_v42 = vsel %vm1842_vm11, %v5635_v28, %v5625_v48  ;;  %v5764_v52 = vsel %vm1842_vm11, %v5629_v33, %v5635_v28 }
 0xcab   :  { %v1869_v8 = vadd.f32 %v5764_v52, %v5760_v42  ;;  %v1832_v32 = vpop.xlane.xlu0 %1831  ;;  %v1888_v19 = vsub.f32 %v5486_v17, %v5756_v51 }
 0xcac   :  { %v1829_v45 = vpop.xlane.xlu1 %1828  ;;  %vm1845_vm12 = vcmp.ge.f32.partialorder %v1832_v32, 1.0 }
 0xcad   :  { %v5770_v63 = vmul.f32 0.5, %v1869_v8  ;;  %vm1844_vm13 = vcmp.ge.f32.partialorder %v1829_v45, 1.0  ;;  %v5774_v48 = vsel %vm1845_vm12, %v5659_v1, %v5639_v18  ;;  %v5778_v33 = vsel %vm1845_vm12, %v5643_v5, %v5659_v1 }
 0xcae   :  { %v5782_v28 = vsel %vm1844_vm13, %v5662_v22, %v5649_v61  ;;  %v5786_v41 = vsel %vm1844_vm13, %v5653_v60, %v5662_v22  ;;  %v1872_v31 = vadd.f32 %v5778_v33, %v5774_v48  ;;  %v1897_v55 = vmax.f32 %v1888_v19, 0.0 }
 0xcaf   :  { %v1871_v18 = vadd.f32 %v5786_v41, %v5782_v28  ;;  %v1838_v6 = vpop.xlane.xlu0 %1837  ;;  %v1887_v5 = vsub.f32 %v5515_v57, %v5770_v63 }
 0xcb0   :  { %v5794_v1 = vmul.f32 0.5, %v1872_v31  ;;  %v1835_v24 = vpop.xlane.xlu1 %1834  ;;  %vm1847_vm14 = vcmp.ge.f32.partialorder %v1838_v6, 1.0  ;;  %v1914_v61 = vsel %vm29_vm0, %v1897_v55, 0.0 }
 0xcb1   :  { %v5797_v20 = vmul.f32 0.5, %v1871_v18  ;;  %vm1846_vm15 = vcmp.ge.f32.partialorder %v1835_v24, 1.0  ;;  %v5801_v60 = vsel %vm1847_vm14, %v5688_v59, %v5666_v0  ;;  %v5805_v22 = vsel %vm1847_vm14, %v5670_v21, %v5688_v59  ;;  %1915 = vadd.xlane.f32.xlu1 %v1914_v61 }
 0xcb2   :  { %v5809_v10 = vsel %vm1846_vm15, %v5691_v27, %v5676_v47  ;;  %v5813_v62 = vsel %vm1846_vm15, %v5680_v23, %v5691_v27  ;;  %v1874_v4 = vadd.f32 %v5805_v22, %v5801_v60  ;;  %v1896_v2 = vmax.f32 %v1887_v5, 0.0 }
 0xcb3   :  { %v1873_v0 = vadd.f32 %v5813_v62, %v5809_v10  ;;  %v1889_v21 = vsub.f32 %v5374_v46, %v5797_v20  ;;  %v1890_v59 = vsub.f32 %v5549_v53, %v5794_v1 }
 0xcb4   :  { %v5823_v40 = vmul.f32 0.5, %v1874_v4  ;;  %v1911_v47 = vsel %vm29_vm0, %v1896_v2, 0.0 }
 0xcb5   :  { %v5826_v54 = vmul.f32 0.5, %v1873_v0  ;;  %1912 = vadd.xlane.f32.xlu0 %v1911_v47  ;;  %v1898_v23 = vmax.f32 %v1889_v21, 0.0  ;;  %v1899_v27 = vmax.f32 %v1890_v59, 0.0 }
 0xcb6   :  { %v1892_v12 = vsub.f32 %v5386_v25, %v5823_v40 }
 0xcb7   :  { %v1917_v26 = vsel %vm29_vm0, %v1898_v23, 0.0  ;;  %v1920_v29 = vsel %vm29_vm0, %v1899_v27, 0.0  ;;  %v1891_v15 = vsub.f32 %v5395_v56, %v5826_v54 }
 0xcb8   :  { %1921 = vadd.xlane.f32.xlu1 %v1920_v29  ;;  %v1901_v11 = vmax.f32 %v1892_v12, 0.0 }
 0xcb9   :  { %1918 = vadd.xlane.f32.xlu0 %v1917_v26  ;;  %v1900_v14 = vmax.f32 %v1891_v15, 0.0 }
 0xcba   :  { %v1926_v37 = vsel %vm29_vm0, %v1901_v11, 0.0 }
 0xcbb   :  { %v1923_v44 = vsel %vm29_vm0, %v1900_v14, 0.0 }
 0xcbc   :  { %1927 = vadd.xlane.f32.xlu1 %v1926_v37 }
 0xcbd   :  { %1924 = vadd.xlane.f32.xlu0 %v1923_v44 }
 0xd22   :  { %v1904_v39 = vpop.xlane.xlu1 %1903 }
 0xd23   :  { %vm1929_vm1 = vcmp.ge.f32.partialorder %v1904_v39, 1.0 }
 0xd24   :  { %v5838_v8 = vsel %vm1929_vm1, %v5711_v50, %v5703_v58  ;;  %v5842_v32 = vsel %vm1929_vm1, %v5707_v49, %v5711_v50 }
 0xd25   :  { %v1956_v19 = vadd.f32 %v5842_v32, %v5838_v8 }
 0xd27   :  { %v5846_v45 = vmul.f32 0.5, %v1956_v19 }
 0xd29   :  { %v1974_v31 = vsub.f32 %v5416_v36, %v5846_v45 }
 0xd2a   :  { %v1910_v55 = vpop.xlane.xlu1 %1909 }
 0xd2b   :  { %vm1931_vm2 = vcmp.ge.f32.partialorder %v1910_v55, 1.0  ;;  %v1983_v18 = vmax.f32 %v1974_v31, 0.0 }
 0xd2c   :  { %v5852_v6 = vsel %vm1931_vm2, %v5726_v7, %v5717_v43  ;;  %v5856_v58 = vsel %vm1931_vm2, %v5721_v38, %v5726_v7 }
 0xd2d   :  { %v1958_v49 = vadd.f32 %v5856_v58, %v5852_v6  ;;  %v1992_v50 = vsel %vm29_vm0, %v1983_v18, 0.0 }
 0xd2e   :  { %v1907_v5 = vpop.xlane.xlu0 %1906  ;;  %1993 = vadd.xlane.f32.xlu0 %v1992_v50 }
 0xd2f   :  { %v5861_v24 = vmul.f32 0.5, %v1958_v49  ;;  %vm1930_vm3 = vcmp.ge.f32.partialorder %v1907_v5, 1.0 }
 0xd30   :  { %v5865_v61 = vsel %vm1930_vm3, %v5740_v13, %v5730_v3  ;;  %v5869_v43 = vsel %vm1930_vm3, %v5734_v30, %v5740_v13 }
 0xd31   :  { %v1957_v38 = vadd.f32 %v5869_v43, %v5865_v61  ;;  %v1976_v7 = vsub.f32 %v5446_v35, %v5861_v24 }
 0xd33   :  { %v5875_v4 = vmul.f32 0.5, %v1957_v38  ;;  %v1985_v2 = vmax.f32 %v1976_v7, 0.0 }
 0xd35   :  { %v1998_v0 = vsel %vm29_vm0, %v1985_v2, 0.0  ;;  %v1975_v21 = vsub.f32 %v5455_v34, %v5875_v4 }
 0xd36   :  { %1999 = vadd.xlane.f32.xlu0 %v1998_v0 }
 0xd37   :  { %v1984_v3 = vmax.f32 %v1975_v21, 0.0 }
 0xd39   :  { %v1995_v59 = vsel %vm29_vm0, %v1984_v3, 0.0 }
 0xd3a   :  { %1996 = vadd.xlane.f32.xlu1 %v1995_v59 }
 0xd3e   :  { %v1916_v30 = vpop.xlane.xlu1 %1915 }
 0xd3f   :  { %vm1933_vm4 = vcmp.ge.f32.partialorder %v1916_v30, 1.0 }
 0xd40   :  { %v5883_v13 = vsel %vm1933_vm4, %v5756_v51, %v5748_v9  ;;  %v5887_v47 = vsel %vm1933_vm4, %v5752_v16, %v5756_v51 }
 0xd41   :  { %v1960_v23 = vadd.f32 %v5887_v47, %v5883_v13 }
 0xd42   :  { %v1913_v27 = vpop.xlane.xlu0 %1912 }
 0xd43   :  { %v5891_v12 = vmul.f32 0.5, %v1960_v23  ;;  %vm1932_vm5 = vcmp.ge.f32.partialorder %v1913_v27, 1.0 }
 0xd44   :  { %v5895_v26 = vsel %vm1932_vm5, %v5770_v63, %v5760_v42  ;;  %v5899_v29 = vsel %vm1932_vm5, %v5764_v52, %v5770_v63 }
 0xd45   :  { %v1959_v9 = vadd.f32 %v5899_v29, %v5895_v26  ;;  %v1922_v16 = vpop.xlane.xlu1 %1921  ;;  %v1978_v51 = vsub.f32 %v5486_v17, %v5891_v12 }
 0xd46   :  { %vm1935_vm6 = vcmp.ge.f32.partialorder %v1922_v16, 1.0  ;;  %v1919_v15 = vpop.xlane.xlu0 %1918 }
 0xd47   :  { %v5905_v11 = vmul.f32 0.5, %v1959_v9  ;;  %v5909_v14 = vsel %vm1935_vm6, %v5794_v1, %v5774_v48  ;;  %v5913_v42 = vsel %vm1935_vm6, %v5778_v33, %v5794_v1  ;;  %vm1934_vm7 = vcmp.ge.f32.partialorder %v1919_v15, 1.0 }
 0xd48   :  { %v1962_v52 = vadd.f32 %v5913_v42, %v5909_v14  ;;  %v5919_v63 = vsel %vm1934_vm7, %v5797_v20, %v5782_v28  ;;  %v5923_v37 = vsel %vm1934_vm7, %v5786_v41, %v5797_v20  ;;  %v1987_v44 = vmax.f32 %v1978_v51, 0.0 }
 0xd49   :  { %v1961_v48 = vadd.f32 %v5923_v37, %v5919_v63  ;;  %v1928_v39 = vpop.xlane.xlu1 %1927  ;;  %v1977_v33 = vsub.f32 %v5515_v57, %v5905_v11 }
 0xd4a   :  { %v5929_v1 = vmul.f32 0.5, %v1962_v52  ;;  %vm1937_vm8 = vcmp.ge.f32.partialorder %v1928_v39, 1.0  ;;  %v1925_v19 = vpop.xlane.xlu0 %1924  ;;  %v2004_v31 = vsel %vm29_vm0, %v1987_v44, 0.0 }
 0xd4b   :  { %v5932_v28 = vmul.f32 0.5, %v1961_v48  ;;  %v5936_v41 = vsel %vm1937_vm8, %v5823_v40, %v5801_v60  ;;  %v5940_v20 = vsel %vm1937_vm8, %v5805_v22, %v5823_v40  ;;  %vm1936_vm9 = vcmp.ge.f32.partialorder %v1925_v19, 1.0  ;;  %2005 = vadd.xlane.f32.xlu0 %v2004_v31 }
 0xd4c   :  { %v1964_v55 = vadd.f32 %v5940_v20, %v5936_v41  ;;  %v5946_v18 = vsel %vm1936_vm9, %v5826_v54, %v5809_v10  ;;  %v5950_v49 = vsel %vm1936_vm9, %v5813_v62, %v5826_v54  ;;  %v1986_v50 = vmax.f32 %v1977_v33, 0.0 }
 0xd4d   :  { %v1963_v60 = vadd.f32 %v5950_v49, %v5946_v18  ;;  %v1980_v22 = vsub.f32 %v5549_v53, %v5929_v1  ;;  %v1979_v40 = vsub.f32 %v5374_v46, %v5932_v28 }
 0xd4e   :  { %v5958_v5 = vmul.f32 0.5, %v1964_v55  ;;  %v2001_v38 = vsel %vm29_vm0, %v1986_v50, 0.0 }
 0xd4f   :  { %v5961_v10 = vmul.f32 0.5, %v1963_v60  ;;  %2002 = vadd.xlane.f32.xlu1 %v2001_v38  ;;  %v1989_v7 = vmax.f32 %v1980_v22, 0.0  ;;  %v1988_v62 = vmax.f32 %v1979_v40, 0.0 }
 0xd50   :  { %v1982_v54 = vsub.f32 %v5386_v25, %v5958_v5 }
 0xd51   :  { %v2010_v2 = vsel %vm29_vm0, %v1989_v7, 0.0  ;;  %v2007_v0 = vsel %vm29_vm0, %v1988_v62, 0.0  ;;  %v1981_v21 = vsub.f32 %v5395_v56, %v5961_v10 }
 0xd52   :  { %2011 = vadd.xlane.f32.xlu0 %v2010_v2  ;;  %v1991_v3 = vmax.f32 %v1982_v54, 0.0 }
 0xd53   :  { %2008 = vadd.xlane.f32.xlu1 %v2007_v0  ;;  %v1990_v59 = vmax.f32 %v1981_v21, 0.0 }
 0xd54   :  { %v2016_v30 = vsel %vm29_vm0, %v1991_v3, 0.0 }
 0xd55   :  { %v2013_v23 = vsel %vm29_vm0, %v1990_v59, 0.0 }
 0xd56   :  { %2017 = vadd.xlane.f32.xlu0 %v2016_v30 }
 0xd57   :  { %2014 = vadd.xlane.f32.xlu1 %v2013_v23 }
 0xdbb   :  { %v1994_v27 = vpop.xlane.xlu0 %1993 }
 0xdbc   :  { %vm2019_vm10 = vcmp.ge.f32.partialorder %v1994_v27, 1.0 }
 0xdbd   :  { %v5973_v9 = vsel %vm2019_vm10, %v5846_v45, %v5838_v8  ;;  %v5977_v16 = vsel %vm2019_vm10, %v5842_v32, %v5846_v45 }
 0xdbe   :  { %v2046_v51 = vadd.f32 %v5977_v16, %v5973_v9 }
 0xdc0   :  { %v5981_v15 = vmul.f32 0.5, %v2046_v51 }
 0xdc2   :  { %v2064_v52 = vsub.f32 %v5416_v36, %v5981_v15 }
 0xdc3   :  { %v2000_v44 = vpop.xlane.xlu0 %1999 }
 0xdc4   :  { %vm2021_vm11 = vcmp.ge.f32.partialorder %v2000_v44, 1.0  ;;  %v2073_v48 = vmax.f32 %v2064_v52, 0.0 }
 0xdc5   :  { %v5987_v39 = vsel %vm2021_vm11, %v5861_v24, %v5852_v6  ;;  %v5991_v8 = vsel %vm2021_vm11, %v5856_v58, %v5861_v24 }
 0xdc6   :  { %v2048_v32 = vadd.f32 %v5991_v8, %v5987_v39  ;;  %v2082_v45 = vsel %vm29_vm0, %v2073_v48, 0.0 }
 0xdc7   :  { %v1997_v33 = vpop.xlane.xlu1 %1996  ;;  %2083 = vadd.xlane.f32.xlu1 %v2082_v45 }
 0xdc8   :  { %vm2020_vm12 = vcmp.ge.f32.partialorder %v1997_v33, 1.0  ;;  %v5996_v19 = vmul.f32 0.5, %v2048_v32 }
 0xdc9   :  { %v6000_v31 = vsel %vm2020_vm12, %v5875_v4, %v5865_v61  ;;  %v6004_v6 = vsel %vm2020_vm12, %v5869_v43, %v5875_v4 }
 0xdca   :  { %v2047_v58 = vadd.f32 %v6004_v6, %v6000_v31  ;;  %v2066_v24 = vsub.f32 %v5446_v35, %v5996_v19 }
 0xdcc   :  { %v6010_v55 = vmul.f32 0.5, %v2047_v58  ;;  %v2075_v50 = vmax.f32 %v2066_v24, 0.0 }
 0xdce   :  { %v2065_v60 = vsub.f32 %v5455_v34, %v6010_v55  ;;  %v2088_v22 = vsel %vm29_vm0, %v2075_v50, 0.0 }
 0xdcf   :  { %2089 = vadd.xlane.f32.xlu1 %v2088_v22 }
 0xdd0   :  { %v2074_v61 = vmax.f32 %v2065_v60, 0.0 }
 0xdd2   :  { %v2085_v40 = vsel %vm29_vm0, %v2074_v61, 0.0 }
 0xdd3   :  { %2086 = vadd.xlane.f32.xlu0 %v2085_v40 }
 0xdd8   :  { %v2006_v43 = vpop.xlane.xlu0 %2005 }
 0xdd9   :  { %vm2023_vm13 = vcmp.ge.f32.partialorder %v2006_v43, 1.0 }
 0xdda   :  { %v6018_v4 = vsel %vm2023_vm13, %v5891_v12, %v5883_v13  ;;  %v6022_v38 = vsel %vm2023_vm13, %v5887_v47, %v5891_v12 }
 0xddb   :  { %v2050_v7 = vadd.f32 %v6022_v38, %v6018_v4 }
 0xddc   :  { %v2003_v62 = vpop.xlane.xlu1 %2002 }
 0xddd   :  { %vm2022_vm14 = vcmp.ge.f32.partialorder %v2003_v62, 1.0  ;;  %v6026_v54 = vmul.f32 0.5, %v2050_v7 }
 0xdde   :  { %v6030_v2 = vsel %vm2022_vm14, %v5905_v11, %v5895_v26  ;;  %v6034_v0 = vsel %vm2022_vm14, %v5899_v29, %v5905_v11 }
 0xddf   :  { %v2049_v13 = vadd.f32 %v6034_v0, %v6030_v2  ;;  %v2012_v47 = vpop.xlane.xlu0 %2011  ;;  %v2068_v12 = vsub.f32 %v5486_v17, %v6026_v54 }
 0xde0   :  { %v2009_v21 = vpop.xlane.xlu1 %2008  ;;  %vm2025_vm15 = vcmp.ge.f32.partialorder %v2012_v47, 1.0 }
 0xde1   :  { %v6040_v3 = vmul.f32 0.5, %v2049_v13  ;;  %vm2024_vm1 = vcmp.ge.f32.partialorder %v2009_v21, 1.0  ;;  %v6044_v26 = vsel %vm2025_vm15, %v5929_v1, %v5909_v14  ;;  %v6048_v29 = vsel %vm2025_vm15, %v5913_v42, %v5929_v1 }
 0xde2   :  { %v6052_v11 = vsel %vm2024_vm1, %v5932_v28, %v5919_v63  ;;  %v6056_v59 = vsel %vm2024_vm1, %v5923_v37, %v5932_v28  ;;  %v2052_v30 = vadd.f32 %v6048_v29, %v6044_v26  ;;  %v2077_v23 = vmax.f32 %v2068_v12, 0.0 }
 0xde3   :  { %v2051_v14 = vadd.f32 %v6056_v59, %v6052_v11  ;;  %v2018_v27 = vpop.xlane.xlu0 %2017  ;;  %v2067_v42 = vsub.f32 %v5515_v57, %v6040_v3 }
 0xde4   :  { %v6064_v1 = vmul.f32 0.5, %v2052_v30  ;;  %v2015_v51 = vpop.xlane.xlu1 %2014  ;;  %vm2027_vm2 = vcmp.ge.f32.partialorder %v2018_v27, 1.0  ;;  %v2094_v63 = vsel %vm29_vm0, %v2077_v23, 0.0 }
 0xde5   :  { %v6067_v52 = vmul.f32 0.5, %v2051_v14  ;;  %vm2026_vm3 = vcmp.ge.f32.partialorder %v2015_v51, 1.0  ;;  %v6071_v37 = vsel %vm2027_vm2, %v5958_v5, %v5936_v41  ;;  %v6075_v28 = vsel %vm2027_vm2, %v5940_v20, %v5958_v5  ;;  %2095 = vadd.xlane.f32.xlu1 %v2094_v63 }
 0xde6   :  { %v6079_v44 = vsel %vm2026_vm3, %v5961_v10, %v5946_v18  ;;  %v6083_v48 = vsel %vm2026_vm3, %v5950_v49, %v5961_v10  ;;  %v2054_v32 = vadd.f32 %v6075_v28, %v6071_v37  ;;  %v2076_v45 = vmax.f32 %v2067_v42, 0.0 }
 0xde7   :  { %v2053_v41 = vadd.f32 %v6083_v48, %v6079_v44  ;;  %v2069_v20 = vsub.f32 %v5374_v46, %v6067_v52  ;;  %v2070_v5 = vsub.f32 %v5549_v53, %v6064_v1 }
 0xde8   :  { %v6093_v33 = vmul.f32 0.5, %v2054_v32  ;;  %v2091_v18 = vsel %vm29_vm0, %v2076_v45, 0.0 }
 0xde9   :  { %v6096_v58 = vmul.f32 0.5, %v2053_v41  ;;  %2092 = vadd.xlane.f32.xlu0 %v2091_v18  ;;  %v2078_v49 = vmax.f32 %v2069_v20, 0.0  ;;  %v2079_v10 = vmax.f32 %v2070_v5, 0.0 }
 0xdea   :  { %v2072_v24 = vsub.f32 %v5386_v25, %v6093_v33 }
 0xdeb   :  { %v2097_v50 = vsel %vm29_vm0, %v2078_v49, 0.0  ;;  %v2100_v60 = vsel %vm29_vm0, %v2079_v10, 0.0  ;;  %v2071_v46 = vsub.f32 %v5395_v56, %v6096_v58 }
 0xdec   :  { %2101 = vadd.xlane.f32.xlu1 %v2100_v60  ;;  %v2081_v22 = vmax.f32 %v2072_v24, 0.0 }
 0xded   :  { %2098 = vadd.xlane.f32.xlu0 %v2097_v50  ;;  %v2080_v61 = vmax.f32 %v2071_v46, 0.0 }
 0xdee   :  { %v2106_v40 = vsel %vm29_vm0, %v2081_v22, 0.0 }
 0xdef   :  { %v2103_v43 = vsel %vm29_vm0, %v2080_v61, 0.0 }
 0xdf0   :  { %2107 = vadd.xlane.f32.xlu1 %v2106_v40 }
 0xdf1   :  { %2104 = vadd.xlane.f32.xlu0 %v2103_v43 }
 0xe54   :  { %v2084_v7 = vpop.xlane.xlu1 %2083 }
 0xe55   :  { %vm2109_vm4 = vcmp.ge.f32.partialorder %v2084_v7, 1.0 }
 0xe56   :  { %v6108_v25 = vsel %vm2109_vm4, %v5981_v15, %v5973_v9  ;;  %v6112_v62 = vsel %vm2109_vm4, %v5977_v16, %v5981_v15 }
 0xe57   :  { %v2136_v56 = vadd.f32 %v6112_v62, %v6108_v25 }
 0xe59   :  { %v6116_v13 = vmul.f32 0.5, %v2136_v56 }
 0xe5b   :  { %v2154_v47 = vsub.f32 %v5416_v36, %v6116_v13 }
 0xe5c   :  { %v2090_v12 = vpop.xlane.xlu1 %2089 }
 0xe5d   :  { %vm2111_vm5 = vcmp.ge.f32.partialorder %v2090_v12, 1.0  ;;  %v2163_v21 = vmax.f32 %v2154_v47, 0.0 }
 0xe5e   :  { %v6122_v30 = vsel %vm2111_vm5, %v5996_v19, %v5987_v39  ;;  %v6126_v9 = vsel %vm2111_vm5, %v5991_v8, %v5996_v19 }
 0xe5f   :  { %v2138_v16 = vadd.f32 %v6126_v9, %v6122_v30  ;;  %v2172_v15 = vsel %vm29_vm0, %v2163_v21, 0.0 }
 0xe60   :  { %v2087_v23 = vpop.xlane.xlu0 %2086  ;;  %2173 = vadd.xlane.f32.xlu0 %v2172_v15 }
 0xe61   :  { %v6131_v14 = vmul.f32 0.5, %v2138_v16  ;;  %vm2110_vm6 = vcmp.ge.f32.partialorder %v2087_v23, 1.0  ;;  %v6250_v16 = vld [vmem:[%s6846_s0 + $0x38] sm:$0xff] }
 0xe62   :  { %v6135_v36 = vsel %vm2110_vm6, %v6010_v55, %v6000_v31  ;;  %v6139_v39 = vsel %vm2110_vm6, %v6004_v6, %v6010_v55 }
 0xe63   :  { %v2137_v8 = vadd.f32 %v6139_v39, %v6135_v36  ;;  %v2156_v19 = vsub.f32 %v5446_v35, %v6131_v14 }
 0xe65   :  { %v6145_v27 = vmul.f32 0.5, %v2137_v8  ;;  %v2165_v42 = vmax.f32 %v2156_v19, 0.0 }
 0xe67   :  { %v2178_v51 = vsel %vm29_vm0, %v2165_v42, 0.0  ;;  %v2155_v63 = vsub.f32 %v5455_v34, %v6145_v27 }
 0xe68   :  { %2179 = vadd.xlane.f32.xlu0 %v2178_v51  ;;  %v2813_v51 = vmov 0  }
 0xe69   :  { %v2164_v31 = vmax.f32 %v2155_v63, 0.0  ;;  %2757 = vset.pattern.permute.xlu1 %v2813_v51  ;;  %2758 = vset.pattern.permute.xlu0 %v2813_v51 }
 0xe6b   :  { %v2175_v32 = vsel %vm29_vm0, %v2164_v31, 0.0 }
 0xe6c   :  { %2176 = vadd.xlane.f32.xlu1 %v2175_v32 }
 0xe72   :  { %v2096_v6 = vpop.xlane.xlu1 %2095 }
 0xe73   :  { %vm2113_vm7 = vcmp.ge.f32.partialorder %v2096_v6, 1.0 }
 0xe74   :  { %v6153_v55 = vsel %vm2113_vm7, %v6026_v54, %v6018_v4  ;;  %v6157_v35 = vsel %vm2113_vm7, %v6022_v38, %v6026_v54 }
 0xe75   :  { %v2140_v45 = vadd.f32 %v6157_v35, %v6153_v55 }
 0xe76   :  { %v2093_v41 = vpop.xlane.xlu0 %2092 }
 0xe77   :  { %v6161_v34 = vmul.f32 0.5, %v2140_v45  ;;  %vm2112_vm8 = vcmp.ge.f32.partialorder %v2093_v41, 1.0  ;;  %v6271_v41 = vld [vmem:[%s6846_s0] sm:$0xff] }
 0xe78   :  { %v6165_v20 = vsel %vm2112_vm8, %v6040_v3, %v6030_v2  ;;  %v6169_v5 = vsel %vm2112_vm8, %v6034_v0, %v6040_v3 }
 0xe79   :  { %v2139_v4 = vadd.f32 %v6169_v5, %v6165_v20  ;;  %v2102_v38 = vpop.xlane.xlu1 %2101  ;;  %v2158_v54 = vsub.f32 %v5486_v17, %v6161_v34 }
 0xe7a   :  { %vm2115_vm9 = vcmp.ge.f32.partialorder %v2102_v38, 1.0  ;;  %v2099_v18 = vpop.xlane.xlu0 %2098 }
 0xe7b   :  { %v6175_v49 = vmul.f32 0.5, %v2139_v4  ;;  %v6179_v10 = vsel %vm2115_vm9, %v6064_v1, %v6044_v26  ;;  %v6183_v2 = vsel %vm2115_vm9, %v6048_v29, %v6064_v1  ;;  %vm2114_vm10 = vcmp.ge.f32.partialorder %v2099_v18, 1.0 }
 0xe7c   :  { %v2142_v0 = vadd.f32 %v6183_v2, %v6179_v10  ;;  %v6189_v3 = vsel %vm2114_vm10, %v6067_v52, %v6052_v11  ;;  %v6193_v17 = vsel %vm2114_vm10, %v6056_v59, %v6067_v52  ;;  %v2167_v24 = vmax.f32 %v2158_v54, 0.0 }
 0xe7d   :  { %v2141_v26 = vadd.f32 %v6193_v17, %v6189_v3  ;;  %v2108_v50 = vpop.xlane.xlu1 %2107  ;;  %v2157_v29 = vsub.f32 %v5515_v57, %v6175_v49 }
 0xe7e   :  { %v6199_v1 = vmul.f32 0.5, %v2142_v0  ;;  %vm2117_vm11 = vcmp.ge.f32.partialorder %v2108_v50, 1.0  ;;  %v2105_v60 = vpop.xlane.xlu0 %2104  ;;  %v2184_v46 = vsel %vm29_vm0, %v2167_v24, 0.0 }
 0xe7f   :  { %v6202_v11 = vmul.f32 0.5, %v2141_v26  ;;  %v6206_v59 = vsel %vm2117_vm11, %v6093_v33, %v6071_v37  ;;  %v6210_v52 = vsel %vm2117_vm11, %v6075_v28, %v6093_v33  ;;  %vm2116_vm12 = vcmp.ge.f32.partialorder %v2105_v60, 1.0  ;;  %2185 = vadd.xlane.f32.xlu0 %v2184_v46  ;;  %v6229_v33 = vld [vmem:[%s6846_s0 + $0x28] sm:$0xff] }
 0xe80   :  { %v2144_v57 = vadd.f32 %v6210_v52, %v6206_v59  ;;  %v6216_v22 = vsel %vm2116_vm12, %v6096_v58, %v6079_v44  ;;  %v6220_v61 = vsel %vm2116_vm12, %v6083_v48, %v6096_v58  ;;  %v2166_v40 = vmax.f32 %v2157_v29, 0.0 }
 0xe81   :  { %v2143_v37 = vadd.f32 %v6220_v61, %v6216_v22  ;;  %v2160_v28 = vsub.f32 %v5549_v53, %v6199_v1  ;;  %v2159_v44 = vsub.f32 %v6229_v33, %v6202_v11  ;;  %v6241_v53 = vld [vmem:[%s6846_s0 + $0x40] sm:$0xff] }
 0xe82   :  { %v6233_v43 = vmul.f32 0.5, %v2144_v57  ;;  %v2181_v48 = vsel %vm29_vm0, %v2166_v40, 0.0 }
 0xe83   :  { %v6236_v58 = vmul.f32 0.5, %v2143_v37  ;;  %2182 = vadd.xlane.f32.xlu1 %v2181_v48  ;;  %v2169_v7 = vmax.f32 %v2160_v28, 0.0  ;;  %v2168_v56 = vmax.f32 %v2159_v44, 0.0 }
 0xe84   :  { %v2162_v47 = vsub.f32 %v6241_v53, %v6233_v43 }
 0xe85   :  { %v2190_v12 = vsel %vm29_vm0, %v2169_v7, 0.0  ;;  %v2187_v21 = vsel %vm29_vm0, %v2168_v56, 0.0  ;;  %v2161_v15 = vsub.f32 %v6250_v16, %v6236_v58 }
 0xe86   :  { %2191 = vadd.xlane.f32.xlu0 %v2190_v12  ;;  %v2171_v23 = vmax.f32 %v2162_v47, 0.0 }
 0xe87   :  { %2188 = vadd.xlane.f32.xlu1 %v2187_v21  ;;  %v2170_v8 = vmax.f32 %v2161_v15, 0.0 }
 0xe88   :  { %v2196_v19 = vsel %vm29_vm0, %v2171_v23, 0.0 }
 0xe89   :  { %v2193_v42 = vsel %vm29_vm0, %v2170_v8, 0.0 }
 0xe8a   :  { %2197 = vadd.xlane.f32.xlu0 %v2196_v19 }
 0xe8b   :  { %2194 = vadd.xlane.f32.xlu1 %v2193_v42 }
 0xeed   :  { %v2174_v63 = vpop.xlane.xlu0 %2173 }
 0xeee   :  { %vm2199_vm13 = vcmp.ge.f32.partialorder %v2174_v63, 1.0 }
 0xeef   :  { %v6258_v31 = vsel %vm2199_vm13, %v6116_v13, %v6108_v25  ;;  %v6262_v32 = vsel %vm2199_vm13, %v6112_v62, %v6116_v13 }
 0xef0   :  { %v2226_v6 = vadd.f32 %v6262_v32, %v6258_v31 }
 0xef2   :  { %v6266_v45 = vmul.f32 0.5, %v2226_v6 }
 0xef4   :  { %v2244_v4 = vsub.f32 %v6271_v41, %v6266_v45 }
 0xef5   :  { %v2180_v38 = vpop.xlane.xlu0 %2179 }
 0xef6   :  { %vm2201_vm14 = vcmp.ge.f32.partialorder %v2180_v38, 1.0  ;;  %v2253_v25 = vmax.f32 %v2244_v4, 0.0 }
 0xef7   :  { %v6277_v62 = vsel %vm2201_vm14, %v6131_v14, %v6122_v30  ;;  %v6281_v13 = vsel %vm2201_vm14, %v6126_v9, %v6131_v14  ;;  %v6301_v14 = vld [vmem:[%s6846_s0 + $0x10] sm:$0xff] }
 0xef8   :  { %v2228_v54 = vadd.f32 %v6281_v13, %v6277_v62  ;;  %v2262_v18 = vsel %vm29_vm0, %v2253_v25, 0.0 }
 0xef9   :  { %v2177_v0 = vpop.xlane.xlu1 %2176  ;;  %2263 = vadd.xlane.f32.xlu1 %v2262_v18 }
 0xefa   :  { %vm2200_vm15 = vcmp.ge.f32.partialorder %v2177_v0, 1.0  ;;  %v6286_v24 = vmul.f32 0.5, %v2228_v54 }
 0xefb   :  { %v6290_v26 = vsel %vm2200_vm15, %v6145_v27, %v6135_v36  ;;  %v6294_v30 = vsel %vm2200_vm15, %v6139_v39, %v6145_v27  ;;  %v6310_v36 = vld [vmem:[%s6846_s0 + $0x8] sm:$0xff] }
 0xefc   :  { %v2227_v9 = vadd.f32 %v6294_v30, %v6290_v26  ;;  %v2246_v50 = vsub.f32 %v6301_v14, %v6286_v24 }
 0xefe   :  { %v6305_v29 = vmul.f32 0.5, %v2227_v9  ;;  %v2255_v60 = vmax.f32 %v2246_v50, 0.0 }
 0xf00   :  { %v2245_v39 = vsub.f32 %v6310_v36, %v6305_v29  ;;  %v2268_v27 = vsel %vm29_vm0, %v2255_v60, 0.0 }
 0xf01   :  { %2269 = vadd.xlane.f32.xlu1 %v2268_v27 }
 0xf02   :  { %v2254_v46 = vmax.f32 %v2245_v39, 0.0 }
 0xf04   :  { %v2265_v57 = vsel %vm29_vm0, %v2254_v46, 0.0 }
 0xf05   :  { %2266 = vadd.xlane.f32.xlu0 %v2265_v57 }
 0xf0c   :  { %v2186_v40 = vpop.xlane.xlu0 %2185 }
 0xf0d   :  { %vm2203_vm1 = vcmp.ge.f32.partialorder %v2186_v40, 1.0 }
 0xf0e   :  { %v6318_v37 = vsel %vm2203_vm1, %v6161_v34, %v6153_v55  ;;  %v6322_v28 = vsel %vm2203_vm1, %v6157_v35, %v6161_v34  ;;  %v6341_v34 = vld [vmem:[%s6846_s0 + $0x20] sm:$0xff] }
 0xf0f   :  { %v2230_v44 = vadd.f32 %v6322_v28, %v6318_v37 }
 0xf10   :  { %v2183_v48 = vpop.xlane.xlu1 %2182 }
 0xf11   :  { %vm2202_vm2 = vcmp.ge.f32.partialorder %v2183_v48, 1.0  ;;  %v6326_v7 = vmul.f32 0.5, %v2230_v44  ;;  %v20_v48 = vld [vmem:[%s6847_s1] sm:$0xff] }
 0xf12   :  { %v6330_v56 = vsel %vm2202_vm2, %v6175_v49, %v6165_v20  ;;  %v6334_v47 = vsel %vm2202_vm2, %v6169_v5, %v6175_v49 }
 0xf13   :  { %v2229_v55 = vadd.f32 %v6334_v47, %v6330_v56  ;;  %v2192_v35 = vpop.xlane.xlu0 %2191  ;;  %v2248_v12 = vsub.f32 %v6341_v34, %v6326_v7 }
 0xf14   :  { %v2189_v21 = vpop.xlane.xlu1 %2188  ;;  %vm2205_vm3 = vcmp.ge.f32.partialorder %v2192_v35, 1.0 }
 0xf15   :  { %v6345_v20 = vmul.f32 0.5, %v2229_v55  ;;  %vm2204_vm4 = vcmp.ge.f32.partialorder %v2189_v21, 1.0  ;;  %v6349_v5 = vsel %vm2205_vm3, %v6199_v1, %v6179_v10  ;;  %v6353_v49 = vsel %vm2205_vm3, %v6183_v2, %v6199_v1  ;;  %v6370_v2 = vld [vmem:[%s6846_s0 + $0x18] sm:$0xff] }
 0xf16   :  { %v6357_v15 = vsel %vm2204_vm4, %v6202_v11, %v6189_v3  ;;  %v6361_v23 = vsel %vm2204_vm4, %v6193_v17, %v6202_v11  ;;  %v2232_v8 = vadd.f32 %v6353_v49, %v6349_v5  ;;  %v2257_v19 = vmax.f32 %v2248_v12, 0.0 }
 0xf17   :  { %v2231_v10 = vadd.f32 %v6361_v23, %v6357_v15  ;;  %v2198_v42 = vpop.xlane.xlu0 %2197  ;;  %v2247_v3 = vsub.f32 %v6370_v2, %v6345_v20 }
 0xf18   :  { %v6374_v1 = vmul.f32 0.5, %v2232_v8  ;;  %v2195_v17 = vpop.xlane.xlu1 %2194  ;;  %vm2207_vm5 = vcmp.ge.f32.partialorder %v2198_v42, 1.0  ;;  %v2274_v11 = vsel %vm29_vm0, %v2257_v19, 0.0 }
 0xf19   :  { %v6377_v51 = vmul.f32 0.5, %v2231_v10  ;;  %vm2206_vm6 = vcmp.ge.f32.partialorder %v2195_v17, 1.0  ;;  %v6381_v63 = vsel %vm2207_vm5, %v6233_v43, %v6206_v59  ;;  %v6385_v6 = vsel %vm2207_vm5, %v6210_v52, %v6233_v43  ;;  %2275 = vadd.xlane.f32.xlu1 %v2274_v11  ;;  %v6404_v43 = vld [vmem:[%s6846_s0 + $0x30] sm:$0xff] }
 0xf1a   :  { %v6389_v4 = vsel %vm2206_vm6, %v6236_v58, %v6216_v22  ;;  %v6393_v38 = vsel %vm2206_vm6, %v6220_v61, %v6236_v58  ;;  %v2234_v25 = vadd.f32 %v6385_v6, %v6381_v63  ;;  %v2256_v54 = vmax.f32 %v2247_v3, 0.0 }
 0xf1b   :  { %v2233_v59 = vadd.f32 %v6393_v38, %v6389_v4  ;;  %v2249_v52 = vsub.f32 %v6229_v33, %v6377_v51  ;;  %v2250_v22 = vsub.f32 %v6404_v43, %v6374_v1 }
 0xf1c   :  { %v6408_v61 = vmul.f32 0.5, %v2234_v25  ;;  %v2271_v58 = vsel %vm29_vm0, %v2256_v54, 0.0 }
 0xf1d   :  { %v6411_v18 = vmul.f32 0.5, %v2233_v59  ;;  %2272 = vadd.xlane.f32.xlu0 %v2271_v58  ;;  %v2258_v0 = vmax.f32 %v2249_v52, 0.0  ;;  %v2259_v9 = vmax.f32 %v2250_v22, 0.0 }
 0xf1e   :  { %v2252_v50 = vsub.f32 %v6241_v53, %v6408_v61 }
 0xf1f   :  { %v2277_v60 = vsel %vm29_vm0, %v2258_v0, 0.0  ;;  %v2280_v39 = vsel %vm29_vm0, %v2259_v9, 0.0  ;;  %v2251_v27 = vsub.f32 %v6250_v16, %v6411_v18 }
 0xf20   :  { %2281 = vadd.xlane.f32.xlu1 %v2280_v39  ;;  %v2261_v46 = vmax.f32 %v2252_v50, 0.0 }
 0xf21   :  { %2278 = vadd.xlane.f32.xlu0 %v2277_v60  ;;  %v2260_v57 = vmax.f32 %v2251_v27, 0.0 }
 0xf22   :  { %v2286_v40 = vsel %vm29_vm0, %v2261_v46, 0.0 }
 0xf23   :  { %v2283_v44 = vsel %vm29_vm0, %v2260_v57, 0.0 }
 0xf24   :  { %2287 = vadd.xlane.f32.xlu1 %v2286_v40 }
 0xf25   :  { %2284 = vadd.xlane.f32.xlu0 %v2283_v44 }
 0xf35   :  { %2607 = vperm.xlu1 %2757, %v20_v48  }
 0xf86   :  { %v2264_v55 = vpop.xlane.xlu1 %2263 }
 0xf87   :  { %vm2289_vm7 = vcmp.ge.f32.partialorder %v2264_v55, 1.0 }
 0xf88   :  { %v6426_v35 = vsel %vm2289_vm7, %v6266_v45, %v6258_v31  ;;  %v6430_v12 = vsel %vm2289_vm7, %v6262_v32, %v6266_v45 }
 0xf89   :  { %v2316_v21 = vadd.f32 %v6430_v12, %v6426_v35 }
 0xf8b   :  { %v6434_v8 = vmul.f32 0.5, %v2316_v21 }
 0xf8d   :  { %v2334_v19 = vsub.f32 %v6271_v41, %v6434_v8 }
 0xf8e   :  { %v2270_v10 = vpop.xlane.xlu1 %2269 }
 0xf8f   :  { %vm2291_vm8 = vcmp.ge.f32.partialorder %v2270_v10, 1.0  ;;  %v2343_v42 = vmax.f32 %v2334_v19, 0.0 }
 0xf90   :  { %v6440_v3 = vsel %vm2291_vm8, %v6286_v24, %v6277_v62  ;;  %v6444_v31 = vsel %vm2291_vm8, %v6281_v13, %v6286_v24 }
 0xf91   :  { %v2318_v32 = vadd.f32 %v6444_v31, %v6440_v3  ;;  %v2352_v45 = vsel %vm29_vm0, %v2343_v42, 0.0 }
 0xf92   :  { %v2267_v17 = vpop.xlane.xlu0 %2266  ;;  %2353 = vadd.xlane.f32.xlu0 %v2352_v45 }
 0xf93   :  { %v6449_v11 = vmul.f32 0.5, %v2318_v32  ;;  %vm2290_vm9 = vcmp.ge.f32.partialorder %v2267_v17, 1.0 }
 0xf94   :  { %v6453_v25 = vsel %vm2290_vm9, %v6305_v29, %v6290_v26  ;;  %v6457_v62 = vsel %vm2290_vm9, %v6294_v30, %v6305_v29 }
 0xf95   :  { %v2317_v13 = vadd.f32 %v6457_v62, %v6453_v25  ;;  %v2336_v24 = vsub.f32 %v6301_v14, %v6449_v11 }
 0xf97   :  { %v6463_v54 = vmul.f32 0.5, %v2317_v13  ;;  %v2345_v59 = vmax.f32 %v2336_v24, 0.0 }
 0xf99   :  { %v2358_v52 = vsel %vm29_vm0, %v2345_v59, 0.0  ;;  %v2335_v22 = vsub.f32 %v6310_v36, %v6463_v54 }
 0xf9a   :  { %2359 = vadd.xlane.f32.xlu0 %v2358_v52 }
 0xf9b   :  { %v2344_v26 = vmax.f32 %v2335_v22, 0.0 }
 0xf9d   :  { %v2355_v58 = vsel %vm29_vm0, %v2344_v26, 0.0 }
 0xf9e   :  { %2356 = vadd.xlane.f32.xlu1 %v2355_v58 }
 0xfa6   :  { %v2276_v30 = vpop.xlane.xlu1 %2275 }
 0xfa7   :  { %vm2293_vm10 = vcmp.ge.f32.partialorder %v2276_v30, 1.0 }
 0xfa8   :  { %v6471_v29 = vsel %vm2293_vm10, %v6326_v7, %v6318_v37  ;;  %v6475_v0 = vsel %vm2293_vm10, %v6322_v28, %v6326_v7 }
 0xfa9   :  { %v2320_v9 = vadd.f32 %v6475_v0, %v6471_v29 }
 0xfaa   :  { %v2273_v50 = vpop.xlane.xlu0 %2272 }
 0xfab   :  { %v6479_v60 = vmul.f32 0.5, %v2320_v9  ;;  %vm2292_vm11 = vcmp.ge.f32.partialorder %v2273_v50, 1.0  ;;  %v22_v50 = vld [vmem:[%s6847_s1 + $0x10] sm:$0xff] }
 0xfac   :  { %v6483_v39 = vsel %vm2292_vm11, %v6345_v20, %v6330_v56  ;;  %v6487_v27 = vsel %vm2292_vm11, %v6334_v47, %v6345_v20 }
 0xfad   :  { %v2319_v37 = vadd.f32 %v6487_v27, %v6483_v39  ;;  %v2282_v28 = vpop.xlane.xlu1 %2281  ;;  %v2338_v7 = vsub.f32 %v6341_v34, %v6479_v60 }
 0xfae   :  { %vm2295_vm12 = vcmp.ge.f32.partialorder %v2282_v28, 1.0  ;;  %v2279_v46 = vpop.xlane.xlu0 %2278  ;;  %v21_v28 = vld [vmem:[%s6847_s1 + $0x8] sm:$0xff] }
 0xfaf   :  { %v6493_v57 = vmul.f32 0.5, %v2319_v37  ;;  %v6497_v40 = vsel %vm2295_vm12, %v6374_v1, %v6349_v5  ;;  %v6501_v56 = vsel %vm2295_vm12, %v6353_v49, %v6374_v1  ;;  %vm2294_vm13 = vcmp.ge.f32.partialorder %v2279_v46, 1.0  ;;  %v23_v37 = vld [vmem:[%s6847_s1 + $0x18] sm:$0xff]  ;;  %v25_v46 = vld [vmem:[%s6847_s1 + $0x28] sm:$0xff] }
 0xfb0   :  { %v2322_v47 = vadd.f32 %v6501_v56, %v6497_v40  ;;  %v6507_v20 = vsel %vm2294_vm13, %v6377_v51, %v6357_v15  ;;  %v6511_v44 = vsel %vm2294_vm13, %v6361_v23, %v6377_v51  ;;  %v2347_v48 = vmax.f32 %v2338_v7, 0.0  ;;  %v24_v7 = vld [vmem:[%s6847_s1 + $0x20] sm:$0xff] }
 0xfb1   :  { %v2321_v5 = vadd.f32 %v6511_v44, %v6507_v20  ;;  %v2288_v55 = vpop.xlane.xlu1 %2287  ;;  %v2337_v49 = vsub.f32 %v6370_v2, %v6493_v57 }
 0xfb2   :  { %v6517_v1 = vmul.f32 0.5, %v2322_v47  ;;  %vm2297_vm14 = vcmp.ge.f32.partialorder %v2288_v55, 1.0  ;;  %v2285_v21 = vpop.xlane.xlu0 %2284  ;;  %v2364_v19 = vsel %vm29_vm0, %v2347_v48, 0.0  ;;  %v26_v47 = vld [vmem:[%s6847_s1 + $0x30] sm:$0xff]  ;;  %v27_v48 = vld [vmem:[%s6847_s1 + $0x38] sm:$0xff]  ;;  %v2604_v55 = vlaneseq }
 0xfb3   :  { %v6520_v15 = vmul.f32 0.5, %v2321_v5  ;;  %v6524_v23 = vsel %vm2297_vm14, %v6408_v61, %v6381_v63  ;;  %v6528_v51 = vsel %vm2297_vm14, %v6385_v6, %v6408_v61  ;;  %vm2296_vm15 = vcmp.ge.f32.partialorder %v2285_v21, 1.0  ;;  %2365 = vadd.xlane.f32.xlu0 %v2364_v19  ;;  %v28_v5 = vld [vmem:[%s6847_s1 + $0x40] sm:$0xff] }
 0xfb4   :  { %v2324_v10 = vadd.f32 %v6528_v51, %v6524_v23  ;;  %v6534_v42 = vsel %vm2296_vm15, %v6411_v18, %v6389_v4  ;;  %v6538_v32 = vsel %vm2296_vm15, %v6393_v38, %v6411_v18  ;;  %v2346_v45 = vmax.f32 %v2337_v49, 0.0 }
 0xfb5   :  { %v2323_v63 = vadd.f32 %v6538_v32, %v6534_v42  ;;  %v2340_v6 = vsub.f32 %v6404_v43, %v6517_v1  ;;  %v2339_v61 = vsub.f32 %v6229_v33, %v6520_v15  ;;  %v6583_v49 = vand.u32 127, %v2604_v55  ;;  %v2608_v21 = vpop.permute.xlu1 %2607 }
 0xfb6   :  { %v6546_v17 = vmul.f32 0.5, %v2324_v10  ;;  %v2361_v13 = vsel %vm29_vm0, %v2346_v45, 0.0 }
 0xfb7   :  { %v6549_v4 = vmul.f32 0.5, %v2323_v63  ;;  %2362 = vadd.xlane.f32.xlu1 %v2361_v13  ;;  %v2349_v24 = vmax.f32 %v2340_v6, 0.0  ;;  %v2348_v38 = vmax.f32 %v2339_v61, 0.0  ;;  %vm2633_vm1 = vcmp.eq.s32.totalorder %v6583_v49, %v2608_v21 }
 0xfb8   :  { %v2342_v18 = vsub.f32 %v6241_v53, %v6546_v17  ;;  %v2642_v19 = vsel %vm2633_vm1, %v6271_v41, 0.0 }
 0xfb9   :  { %v2370_v59 = vsel %vm29_vm0, %v2349_v24, 0.0  ;;  %v2367_v52 = vsel %vm29_vm0, %v2348_v38, 0.0  ;;  %v2341_v22 = vsub.f32 %v6250_v16, %v6549_v4  ;;  %v2651_v10 = vsel %vm29_vm0, %v2642_v19, 0.0 }
 0xfba   :  { %2371 = vadd.xlane.f32.xlu0 %v2370_v59  ;;  %v2351_v26 = vmax.f32 %v2342_v18, 0.0 }
 0xfbb   :  { %2368 = vadd.xlane.f32.xlu1 %v2367_v52  ;;  %v2350_v58 = vmax.f32 %v2341_v22, 0.0 }
 0xfbc   :  { %v2376_v30 = vsel %vm29_vm0, %v2351_v26, 0.0 }
 0xfbd   :  { %v2373_v9 = vsel %vm29_vm0, %v2350_v58, 0.0 }
 0xfbe   :  { %2377 = vadd.xlane.f32.xlu0 %v2376_v30 }
 0xfbf   :  { %2374 = vadd.xlane.f32.xlu1 %v2373_v9 }
 0xfd0   :  { %2613 = vperm.xlu1 %2757, %v22_v50  }
 0xfd4   :  { %2616 = vperm.xlu1 %2757, %v23_v37   ;;  %2610 = vperm.xlu0 %2758, %v21_v28  }
 0xfd8   :  { %2619 = vperm.xlu1 %2757, %v24_v7  }
 0xfdc   :  { %2622 = vperm.xlu1 %2757, %v25_v46  }
 0xfe0   :  { %2625 = vperm.xlu1 %2757, %v26_v47  }
 0xfe4   :  { %2628 = vperm.xlu1 %2757, %v27_v48  }
 0xfe8   :  { %2631 = vperm.xlu1 %2757, %v28_v5  }
0x100c   :  { %2652 = vadd.xlane.f32.xlu1 %v2651_v10 }
0x101f   :  { %v2354_v45 = vpop.xlane.xlu0 %2353 }
0x1020   :  { %vm2379_vm3 = vcmp.ge.f32.partialorder %v2354_v45, 1.0 }
0x1021   :  { %v2388_v30 = vsel %vm2379_vm3, %v6434_v8, %v6426_v35  ;;  %v2397_v37 = vsel %vm2379_vm3, %v6430_v12, %v6434_v8 }
0x1022   :  { %v2406_v12 = vadd.f32 %v2397_v37, %v2388_v30 }
0x1024   :  { %v6625_v19 = vmul.f32 0.5, %v2406_v12 }
0x1027   :  { %v2360_v63 = vpop.xlane.xlu0 %2359 }
0x1028   :  { %vm2381_vm4 = vcmp.ge.f32.partialorder %v2360_v63, 1.0 }
0x102b   :  { %v2357_v6 = vpop.xlane.xlu1 %2356 }
0x102c   :  { %vm2380_vm2 = vcmp.ge.f32.partialorder %v2357_v6, 1.0 }
0x102d   :  { %v2389_v22 = vsel %vm2380_vm2, %v6463_v54, %v6453_v25  ;;  %v2398_v26 = vsel %vm2380_vm2, %v6457_v62, %v6463_v54  ;;  %v2390_v25 = vsel %vm2381_vm4, %v6449_v11, %v6440_v3  ;;  %v2399_v54 = vsel %vm2381_vm4, %v6444_v31, %v6449_v11 }
0x102e   :  { %v2407_v28 = vadd.f32 %v2398_v26, %v2389_v22  ;;  %v2408_v46 = vadd.f32 %v2399_v54, %v2390_v25  ;;  %vm2424_vm2 = vcmp.ge.f32.partialorder %v6271_v41, %v6625_v19 }
0x1030   :  { %v6612_v3 = vmul.f32 0.5, %v2407_v28 }
0x1032   :  { %vm2425_vm14 = vcmp.ge.f32.partialorder %v6310_v36, %v6612_v3 }
0x1040   :  { %v2366_v61 = vpop.xlane.xlu0 %2365 }
0x1041   :  { %vm2383_vm7 = vcmp.ge.f32.partialorder %v2366_v61, 1.0 }
0x1042   :  { %v2392_v47 = vsel %vm2383_vm7, %v6479_v60, %v6471_v29  ;;  %v2401_v5 = vsel %vm2383_vm7, %v6475_v0, %v6479_v60 }
0x1044   :  { %v2363_v13 = vpop.xlane.xlu1 %2362 }
0x1045   :  { %vm2382_vm9 = vcmp.ge.f32.partialorder %v2363_v13, 1.0 }
0x1046   :  { %v2391_v31 = vsel %vm2382_vm9, %v6493_v57, %v6483_v39  ;;  %v2400_v11 = vsel %vm2382_vm9, %v6487_v27, %v6493_v57  ;;  %v6628_v39 = vmul.f32 0.5, %v2408_v46  ;;  %v2410_v27 = vadd.f32 %v2401_v5, %v2392_v47 }
0x1047   :  { %v2372_v38 = vpop.xlane.xlu0 %2371  ;;  %v2409_v10 = vadd.f32 %v2400_v11, %v2391_v31  ;;  %v2433_v31 = vsel %vm2424_vm2, %v6271_v41, 0.0  ;;  %v2434_v11 = vsel %vm2425_vm14, %v6310_v36, 0.0 }
0x1048   :  { %v2369_v24 = vpop.xlane.xlu1 %2368  ;;  %vm2385_vm11 = vcmp.ge.f32.partialorder %v2372_v38, 1.0  ;;  %vm2426_vm3 = vcmp.ge.f32.partialorder %v6301_v14, %v6628_v39  ;;  %v2487_v5 = vsel %vm29_vm0, %v2433_v31, 0.0 }
0x1049   :  { %vm2384_vm12 = vcmp.ge.f32.partialorder %v2369_v24, 1.0  ;;  %v2394_v0 = vsel %vm2385_vm11, %v6517_v1, %v6497_v40  ;;  %v2403_v60 = vsel %vm2385_vm11, %v6501_v56, %v6517_v1  ;;  %v6647_v56 = vmul.f32 0.5, %v2409_v10 }
0x104a   :  { %v2393_v45 = vsel %vm2384_vm12, %v6520_v15, %v6507_v20  ;;  %v2402_v63 = vsel %vm2384_vm12, %v6511_v44, %v6520_v15  ;;  %v6649_v1 = vmul.f32 0.5, %v2410_v27  ;;  %v2814_v20 = vmov 0.0  }
0x104b   :  { %v6590_v59 = vpop.xlane.xlu0 %2377  ;;  %v2738_v44 = vsel %vm2425_vm14, 1.0, %v2814_v20  ;;  %v2411_v15 = vadd.f32 %v2402_v63, %v2393_v45  ;;  %v2412_v13 = vadd.f32 %v2403_v60, %v2394_v0 }
0x104c   :  { %v6588_v18 = vpop.xlane.xlu1 %2374  ;;  %vm2387_vm15 = vcmp.ge.f32.partialorder %v6590_v59, 1.0 }
0x104d   :  { %vm2386_vm1 = vcmp.ge.f32.partialorder %v6588_v18, 1.0  ;;  %v2396_v24 = vsel %vm2387_vm15, %v6546_v17, %v6524_v23  ;;  %v2737_v23 = vsel %vm2424_vm2, 1.0, %v2814_v20 }
0x104e   :  { %v2395_v38 = vsel %vm2386_vm1, %v6549_v4, %v6534_v42  ;;  %v2404_v18 = vsel %vm2386_vm1, %v6538_v32, %v6549_v4  ;;  %v2739_v42 = vsel %vm2426_vm3, 1.0, %v2814_v20  ;;  %v2421_v32 = vmul.f32 0.5, %v2412_v13 }
0x104f   :  { %v2460_v59 = vsel %vm29_vm0, %v2737_v23, 0.0  ;;  %v2466_v30 = vsel %vm29_vm0, %v2739_v42, 0.0 }
0x1050   :  { %v2614_v52 = vpop.permute.xlu1 %2613 }
0x1051   :  { %vm2635_vm5 = vcmp.eq.s32.totalorder %v6583_v49, %v2614_v52  ;;  %v2405_v52 = vsel %vm2387_vm15, %v6528_v51, %v6546_v17  ;;  %v2420_v51 = vmul.f32 0.5, %v2411_v15  ;;  %v2413_v17 = vadd.f32 %v2404_v18, %v2395_v38 }
0x1052   :  { %v2644_v58 = vsel %vm2635_vm5, %v6301_v14, 0.0  ;;  %vm2427_vm5 = vcmp.ge.f32.partialorder %v6370_v2, %v6647_v56  ;;  %v2414_v4 = vadd.f32 %v2405_v52, %v2396_v24 }
0x1053   :  { %v2657_v9 = vsel %vm29_vm0, %v2644_v58, 0.0  ;;  %v2611_v50 = vpop.permute.xlu0 %2610  ;;  %v2463_v58 = vsel %vm29_vm0, %v2738_v44, 0.0  ;;  %v2422_v37 = vmul.f32 0.5, %v2413_v17  ;;  %vm2429_vm7 = vcmp.ge.f32.partialorder %v6229_v33, %v2420_v51 }
0x1054   :  { %2658 = vadd.xlane.f32.xlu1 %v2657_v9  ;;  %v2617_v62 = vpop.permute.xlu1 %2616  ;;  %vm2634_vm6 = vcmp.eq.s32.totalorder %v6583_v49, %v2611_v50  ;;  %v2740_v9 = vsel %vm2427_vm5, 1.0, %v2814_v20  ;;  %v2423_v28 = vmul.f32 0.5, %v2414_v4  ;;  %v2742_v54 = vsel %vm2429_vm7, 1.0, %v2814_v20 }
0x1055   :  { %vm2636_vm8 = vcmp.eq.s32.totalorder %v6583_v49, %v2617_v62  ;;  %v2643_v35 = vsel %vm2634_vm6, %v6310_v36, 0.0  ;;  %vm2428_vm6 = vcmp.ge.f32.partialorder %v6341_v34, %v6649_v1  ;;  %v2469_v25 = vsel %vm29_vm0, %v2740_v9, 0.0 }
0x1056   :  { %v2654_v7 = vsel %vm29_vm0, %v2643_v35, 0.0  ;;  %v2645_v8 = vsel %vm2636_vm8, %v6370_v2, 0.0  ;;  %v2741_v50 = vsel %vm2428_vm6, 1.0, %v2814_v20  ;;  %vm2430_vm8 = vcmp.ge.f32.partialorder %v6404_v43, %v2421_v32 }
0x1057   :  { %2655 = vadd.xlane.f32.xlu0 %v2654_v7  ;;  %v2660_v21 = vsel %vm29_vm0, %v2645_v8, 0.0  ;;  %v2472_v62 = vsel %vm29_vm0, %v2741_v50, 0.0  ;;  %v2743_v35 = vsel %vm2430_vm8, 1.0, %v2814_v20  ;;  %vm2431_vm9 = vcmp.ge.f32.partialorder %v6250_v16, %v2422_v37 }
0x1058   :  { %v2620_v48 = vpop.permute.xlu1 %2619  ;;  %v2475_v7 = vsel %vm29_vm0, %v2742_v54, 0.0  ;;  %v2478_v12 = vsel %vm29_vm0, %v2743_v35, 0.0  ;;  %v2744_v8 = vsel %vm2431_vm9, 1.0, %v2814_v20  ;;  %v2436_v19 = vsel %vm2427_vm5, %v6370_v2, 0.0 }
0x1059   :  { %vm2637_vm10 = vcmp.eq.s32.totalorder %v6583_v49, %v2620_v48  ;;  %v2481_v47 = vsel %vm29_vm0, %v2744_v8, 0.0  ;;  %v2496_v3 = vsel %vm29_vm0, %v2436_v19, 0.0  ;;  %v2437_v10 = vsel %vm2428_vm6, %v6341_v34, 0.0 }
0x105a   :  { %v2646_v55 = vsel %vm2637_vm10, %v6341_v34, 0.0  ;;  %vm2432_vm10 = vcmp.ge.f32.partialorder %v6241_v53, %v2423_v28  ;;  %v2438_v39 = vsel %vm2429_vm7, %v6229_v33, 0.0  ;;  %v2499_v27 = vsel %vm29_vm0, %v2437_v10, 0.0 }
0x105b   :  { %v2663_v29 = vsel %vm29_vm0, %v2646_v55, 0.0  ;;  %2661 = vadd.xlane.f32.xlu0 %v2660_v21  ;;  %v2745_v46 = vsel %vm2432_vm10, 1.0, %v2814_v20  ;;  %v2490_v55 = vsel %vm29_vm0, %v2434_v11, 0.0  ;;  %v2435_v21 = vsel %vm2426_vm3, %v6301_v14, 0.0 }
0x105c   :  { %2664 = vadd.xlane.f32.xlu1 %v2663_v29  ;;  %v2623_v57 = vpop.permute.xlu1 %2622  ;;  %v2484_v48 = vsel %vm29_vm0, %v2745_v46, 0.0  ;;  %v2493_v29 = vsel %vm29_vm0, %v2435_v21, 0.0  ;;  %v2439_v0 = vsel %vm2430_vm8, %v6404_v43, 0.0  ;;  %v2440_v60 = vsel %vm2431_vm9, %v6250_v16, 0.0 }
0x105d   :  { %vm2638_vm13 = vcmp.eq.s32.totalorder %v6583_v49, %v2623_v57  ;;  %v2502_v57 = vsel %vm29_vm0, %v2438_v39, 0.0  ;;  %v2505_v45 = vsel %vm29_vm0, %v2439_v0, 0.0  ;;  %v2508_v63 = vsel %vm29_vm0, %v2440_v60, 0.0 }
0x105e   :  { %v2647_v6 = vsel %vm2638_vm13, %v6229_v33, 0.0  ;;  %v2516_v20 = vmul.f32 %v6301_v14, %v2435_v21  ;;  %v2517_v15 = vmul.f32 %v6370_v2, %v2436_v19  ;;  %v2518_v13 = vmul.f32 %v6341_v34, %v2437_v10 }
0x105f   :  { %v2666_v40 = vsel %vm29_vm0, %v2647_v6, 0.0  ;;  %v2514_v6 = vmul.f32 %v6271_v41, %v2433_v31  ;;  %v2520_v14 = vmul.f32 %v6404_v43, %v2439_v0  ;;  %v2521_v34 = vmul.f32 %v6250_v16, %v2440_v60 }
0x1060   :  { %v2626_v61 = vpop.permute.xlu1 %2625  ;;  %2667 = vadd.xlane.f32.xlu0 %v2666_v40  ;;  %v2441_v40 = vsel %vm2432_vm10, %v6241_v53, 0.0  ;;  %v2529_v41 = vsel %vm29_vm0, %v2516_v20, 0.0  ;;  %v2532_v38 = vsel %vm29_vm0, %v2517_v15, 0.0  ;;  %v2535_v18 = vsel %vm29_vm0, %v2518_v13, 0.0 }
0x1061   :  { %vm2639_vm4 = vcmp.eq.s32.totalorder %v6583_v49, %v2626_v61  ;;  %v2511_v56 = vsel %vm29_vm0, %v2441_v40, 0.0  ;;  %v2523_v1 = vsel %vm29_vm0, %v2514_v6, 0.0  ;;  %v2515_v61 = vmul.f32 %v6310_v36, %v2434_v11 }
0x1062   :  { %v2648_v22 = vsel %vm2639_vm4, %v6404_v43, 0.0  ;;  %v2519_v36 = vmul.f32 %v6229_v33, %v2438_v39  ;;  %v2541_v2 = vsel %vm29_vm0, %v2520_v14, 0.0  ;;  %v2544_v33 = vsel %vm29_vm0, %v2521_v34, 0.0 }
0x1063   :  { %v2669_v26 = vsel %vm29_vm0, %v2648_v22, 0.0  ;;  %v2526_v44 = vsel %vm29_vm0, %v2515_v61, 0.0 }
0x1064   :  { %2670 = vadd.xlane.f32.xlu1 %v2669_v26  ;;  %2464 = vadd.xlane.f32.xlu0 %v2463_v58  ;;  %v2629_v24 = vpop.permute.xlu1 %2628  ;;  %v2538_v22 = vsel %vm29_vm0, %v2519_v36, 0.0  ;;  %v2522_v26 = vmul.f32 %v6241_v53, %v2441_v40 }
0x1065   :  { %vm2640_vm11 = vcmp.eq.s32.totalorder %v6583_v49, %v2629_v24 }
0x1066   :  { %v2547_v43 = vsel %vm29_vm0, %v2522_v26, 0.0  ;;  %v2649_v58 = vsel %vm2640_vm11, %v6250_v16, 0.0 }
0x1067   :  { %v2672_v51 = vsel %vm29_vm0, %v2649_v58, 0.0 }
0x1068   :  { %2461 = vadd.xlane.f32.xlu1 %v2460_v59  ;;  %2467 = vadd.xlane.f32.xlu0 %v2466_v30  ;;  %v2632_v52 = vpop.permute.xlu1 %2631 }
0x1069   :  { %vm2641_vm12 = vcmp.eq.s32.totalorder %v6583_v49, %v2632_v52 }
0x106a   :  { %v2650_v23 = vsel %vm2641_vm12, %v6241_v53, 0.0 }
0x106b   :  { %v2675_v42 = vsel %vm29_vm0, %v2650_v23, 0.0  ;;  %vm2714_vm0 = vcmask 7168  }
0x106c   :  { %2470 = vadd.xlane.f32.xlu1 %v2469_v25  ;;  %2473 = vadd.xlane.f32.xlu0 %v2472_v62 }
0x1070   :  { %2476 = vadd.xlane.f32.xlu1 %v2475_v7  ;;  %2479 = vadd.xlane.f32.xlu0 %v2478_v12 }
0x1074   :  { %2482 = vadd.xlane.f32.xlu1 %v2481_v47  ;;  %2485 = vadd.xlane.f32.xlu0 %v2484_v48 }
0x1078   :  { %2488 = vadd.xlane.f32.xlu1 %v2487_v5  ;;  %2491 = vadd.xlane.f32.xlu0 %v2490_v55 }
0x107c   :  { %2494 = vadd.xlane.f32.xlu1 %v2493_v29  ;;  %2497 = vadd.xlane.f32.xlu0 %v2496_v3 }
0x1080   :  { %2500 = vadd.xlane.f32.xlu1 %v2499_v27  ;;  %2503 = vadd.xlane.f32.xlu0 %v2502_v57 }
0x1084   :  { %2506 = vadd.xlane.f32.xlu1 %v2505_v45  ;;  %2509 = vadd.xlane.f32.xlu0 %v2508_v63 }
0x1088   :  { %2512 = vadd.xlane.f32.xlu1 %v2511_v56  ;;  %2524 = vadd.xlane.f32.xlu0 %v2523_v1 }
0x108c   :  { %2527 = vadd.xlane.f32.xlu1 %v2526_v44  ;;  %2530 = vadd.xlane.f32.xlu0 %v2529_v41 }
0x1090   :  { %2533 = vadd.xlane.f32.xlu1 %v2532_v38  ;;  %2536 = vadd.xlane.f32.xlu0 %v2535_v18 }
0x1094   :  { %2539 = vadd.xlane.f32.xlu1 %v2538_v22  ;;  %2542 = vadd.xlane.f32.xlu0 %v2541_v2 }
0x1098   :  { %2545 = vadd.xlane.f32.xlu1 %v2544_v33  ;;  %2548 = vadd.xlane.f32.xlu0 %v2547_v43 }
0x1099   :  { %v6775_v17 = vpop.xlane.xlu1 %2652 }
0x109c   :  { %2676 = vadd.xlane.f32.xlu1 %v2675_v42  ;;  %2673 = vadd.xlane.f32.xlu0 %v2672_v51 }
0x10e1   :  { %v6779_v4 = vpop.xlane.xlu1 %2658 }
0x10e4   :  { %v6773_v32 = vpop.xlane.xlu0 %2655 }
0x10e8   :  { %v6777_v49 = vpop.xlane.xlu0 %2661 }
0x10e9   :  { %v6781_v59 = vpop.xlane.xlu1 %2664 }
0x10ed   :  { %v6783_v16 = vpop.xlane.xlu0 %2667 }
0x10f1   :  { %v6785_v53 = vpop.xlane.xlu1 %2670  ;;  %v2465_v30 = vpop.xlane.xlu0 %2464 }
0x10f5   :  { %v2462_v9 = vpop.xlane.xlu1 %2461  ;;  %v2468_v50 = vpop.xlane.xlu0 %2467 }
0x10f6   :  { %2759 = vrcp.f32 %v2462_v9 }
0x10f7   :  { %2761 = vrcp.f32 %v2465_v30 }
0x10f8   :  { %2763 = vrcp.f32 %v2468_v50 }
0x10f9   :  { %v2471_v37 = vpop.xlane.xlu1 %2470  ;;  %v2474_v28 = vpop.xlane.xlu0 %2473 }
0x10fa   :  { %2765 = vrcp.f32 %v2471_v37 }
0x10fb   :  { %2767 = vrcp.f32 %v2474_v28 }
0x10fd   :  { %v6787_v25 = vpop.xlane.xlu1 %2476  ;;  %v6789_v62 = vpop.xlane.xlu0 %2479 }
0x10fe   :  { %2769 = vrcp.f32 %v6787_v25 }
0x10ff   :  { %2771 = vrcp.f32 %v6789_v62 }
0x1100   :  { %v2760_v48 = vpop.eup %2759 }
0x1101   :  { %v6791_v54 = vpop.xlane.xlu1 %2482  ;;  %v6793_v35 = vpop.xlane.xlu0 %2485 }
0x1102   :  { %v2762_v19 = vpop.eup %2761  ;;  %2773 = vrcp.f32 %v6791_v54 }
0x1103   :  { %v2764_v29 = vpop.eup %2763  ;;  %2775 = vrcp.f32 %v6793_v35 }
0x1104   :  { %v2766_v45 = vpop.eup %2765 }
0x1105   :  { %v2489_v7 = vpop.xlane.xlu1 %2488  ;;  %v2492_v12 = vpop.xlane.xlu0 %2491 }
0x1106   :  { %v2746_v8 = vadd.f32 -1.0, %v2489_v7  ;;  %v2747_v11 = vadd.f32 -1.0, %v2492_v12  ;;  %v2768_v40 = vpop.eup %2767 }
0x1108   :  { %v2560_v31 = vmul.f32 %v2760_v48, %v2746_v8  ;;  %v2562_v10 = vmul.f32 %v2762_v19, %v2747_v11  ;;  %v2770_v13 = vpop.eup %2769 }
0x1109   :  { %v2495_v46 = vpop.xlane.xlu1 %2494  ;;  %v2498_v47 = vpop.xlane.xlu0 %2497 }
0x110a   :  { %v2748_v5 = vadd.f32 -1.0, %v2495_v46  ;;  %v2749_v3 = vadd.f32 -1.0, %v2498_v47  ;;  %v2577_v27 = vmul.f32 %v2560_v31, %v2462_v9  ;;  %v2578_v1 = vmul.f32 %v2562_v10, %v2465_v30  ;;  %v2772_v14 = vpop.eup %2771 }
0x110c   :  { %v2564_v39 = vmul.f32 %v2764_v29, %v2748_v5  ;;  %v2566_v63 = vmul.f32 %v2766_v45, %v2749_v3  ;;  %v2586_v56 = vmul.f32 %v2577_v27, %v2560_v31  ;;  %v2587_v2 = vmul.f32 %v2578_v1, %v2562_v10  ;;  %v2774_v23 = vpop.eup %2773 }
0x110d   :  { %v2501_v55 = vpop.xlane.xlu1 %2500  ;;  %v2504_v21 = vpop.xlane.xlu0 %2503 }
0x110e   :  { %v2750_v57 = vadd.f32 -1.0, %v2501_v55  ;;  %v2751_v6 = vadd.f32 -1.0, %v2504_v21  ;;  %v2579_v61 = vmul.f32 %v2564_v39, %v2468_v50  ;;  %v2580_v36 = vmul.f32 %v2566_v63, %v2471_v37  ;;  %v2776_v9 = vpop.eup %2775 }
0x1110   :  { %v2568_v20 = vmul.f32 %v2768_v40, %v2750_v57  ;;  %v2570_v38 = vmul.f32 %v2770_v13, %v2751_v6  ;;  %v2588_v34 = vmul.f32 %v2579_v61, %v2564_v39  ;;  %v2589_v7 = vmul.f32 %v2580_v36, %v2566_v63 }
0x1111   :  { %v2507_v0 = vpop.xlane.xlu1 %2506  ;;  %v2510_v60 = vpop.xlane.xlu0 %2509 }
0x1112   :  { %v2752_v44 = vadd.f32 -1.0, %v2507_v0  ;;  %v2753_v18 = vadd.f32 -1.0, %v2510_v60  ;;  %v2581_v58 = vmul.f32 %v2568_v20, %v2474_v28  ;;  %v2582_v12 = vmul.f32 %v2570_v38, %v6787_v25 }
0x1114   :  { %v2572_v26 = vmul.f32 %v2772_v14, %v2752_v44  ;;  %v2574_v50 = vmul.f32 %v2774_v23, %v2753_v18  ;;  %v2590_v31 = vmul.f32 %v2581_v58, %v2568_v20  ;;  %v2591_v29 = vmul.f32 %v2582_v12, %v2570_v38 }
0x1115   :  { %v2513_v41 = vpop.xlane.xlu1 %2512  ;;  %v2525_v15 = vpop.xlane.xlu0 %2524 }
0x1116   :  { %v2595_v24 = vsub.f32 %v2525_v15, %v2586_v56  ;;  %v2754_v52 = vadd.f32 -1.0, %v2513_v41  ;;  %v2583_v28 = vmul.f32 %v2572_v26, %v6789_v62  ;;  %v2584_v25 = vmul.f32 %v2574_v50, %v6791_v54 }
0x1118   :  { %v2678_v22 = vmul.f32 0.5, %v2595_v24  ;;  %v2576_v37 = vmul.f32 %v2776_v9, %v2754_v52  ;;  %v2593_v56 = vmul.f32 %v2584_v25, %v2574_v50 }
0x1119   :  { %v2528_v33 = vpop.xlane.xlu1 %2527  ;;  %v2531_v43 = vpop.xlane.xlu0 %2530 }
0x111a   :  { %v2687_v42 = vsub.f32 %v2678_v22, %v6775_v17  ;;  %v2596_v51 = vsub.f32 %v2528_v33, %v2587_v2  ;;  %v2597_v30 = vsub.f32 %v2531_v43, %v2588_v34  ;;  %v2585_v62 = vmul.f32 %v2576_v37, %v6793_v35 }
0x111c   :  { %v2696_v8 = vadd.f32 0.5, %v2687_v42  ;;  %v2679_v46 = vmul.f32 0.5, %v2596_v51  ;;  %v2680_v47 = vmul.f32 0.5, %v2597_v30  ;;  %v2594_v1 = vmul.f32 %v2585_v62, %v2576_v37 }
0x111d   :  { %v2534_v48 = vpop.xlane.xlu1 %2533  ;;  %v2537_v11 = vpop.xlane.xlu0 %2536 }
0x111e   :  { %v2705_v5 = vmax.f32 %v2696_v8, 0.0  ;;  %v2688_v17 = vsub.f32 %v2679_v46, %v6773_v32  ;;  %v2689_v55 = vsub.f32 %v2680_v47, %v6779_v4  ;;  %v2598_v21 = vsub.f32 %v2534_v48, %v2589_v7 }
0x111f   :  { %v2599_v19 = vsub.f32 %v2537_v11, %v2590_v31  ;;  %v2592_v32 = vmul.f32 %v2583_v28, %v2572_v26 }
0x1120   :  { %2715 = vst.msk [vmem:[%s6848_s2] sm:$0xff] %vm2714_vm0, %v2705_v5  ;;  %v2697_v3 = vadd.f32 0.5, %v2688_v17  ;;  %v2698_v10 = vadd.f32 0.5, %v2689_v55  ;;  %v2681_v39 = vmul.f32 0.5, %v2598_v21 }
0x1121   :  { %v2682_v27 = vmul.f32 0.5, %v2599_v19  ;;  %v2540_v57 = vpop.xlane.xlu1 %2539  ;;  %v2543_v0 = vpop.xlane.xlu0 %2542 }
0x1122   :  { %v2706_v4 = vmax.f32 %v2697_v3, 0.0  ;;  %v2707_v60 = vmax.f32 %v2698_v10, 0.0  ;;  %v2690_v45 = vsub.f32 %v2681_v39, %v6777_v49  ;;  %v2600_v63 = vsub.f32 %v2540_v57, %v2591_v29 }
0x1123   :  { %v2691_v54 = vsub.f32 %v2682_v27, %v6781_v59  ;;  %v2601_v6 = vsub.f32 %v2543_v0, %v2592_v32 }
0x1124   :  { %2716 = vst.msk [vmem:[%s6848_s2 + $0x8] sm:$0xff] %vm2714_vm0, %v2706_v4  ;;  %2717 = vst.msk [vmem:[%s6848_s2 + $0x10] sm:$0xff] %vm2714_vm0, %v2707_v60  ;;  %v2699_v35 = vadd.f32 0.5, %v2690_v45  ;;  %v2683_v40 = vmul.f32 0.5, %v2600_v63 }
0x1125   :  { %v2700_v61 = vadd.f32 0.5, %v2691_v54  ;;  %v2684_v49 = vmul.f32 0.5, %v2601_v6  ;;  %v2546_v20 = vpop.xlane.xlu1 %2545  ;;  %v2549_v44 = vpop.xlane.xlu0 %2548 }
0x1126   :  { %v2708_v59 = vmax.f32 %v2699_v35, 0.0  ;;  %v2692_v41 = vsub.f32 %v2683_v40, %v6783_v16  ;;  %v2602_v15 = vsub.f32 %v2546_v20, %v2593_v56  ;;  %v2603_v13 = vsub.f32 %v2549_v44, %v2594_v1 }
0x1127   :  { %v2709_v24 = vmax.f32 %v2700_v61, 0.0  ;;  %v2693_v38 = vsub.f32 %v2684_v49, %v6785_v53 }
0x1128   :  { %2718 = vst.msk [vmem:[%s6848_s2 + $0x18] sm:$0xff] %vm2714_vm0, %v2708_v59  ;;  %v2701_v18 = vadd.f32 0.5, %v2692_v41  ;;  %v2685_v36 = vmul.f32 0.5, %v2602_v15  ;;  %v2686_v14 = vmul.f32 0.5, %v2603_v13 }
0x1129   :  { %2719 = vst.msk [vmem:[%s6848_s2 + $0x20] sm:$0xff] %vm2714_vm0, %v2709_v24  ;;  %v2702_v52 = vadd.f32 0.5, %v2693_v38  ;;  %v2677_v16 = vpop.xlane.xlu1 %2676  ;;  %v2674_v22 = vpop.xlane.xlu0 %2673 }
0x112a   :  { %v2710_v2 = vmax.f32 %v2701_v18, 0.0  ;;  %v2695_v34 = vsub.f32 %v2686_v14, %v2677_v16  ;;  %v2694_v26 = vsub.f32 %v2685_v36, %v2674_v22 }
0x112b   :  { %v2711_v53 = vmax.f32 %v2702_v52, 0.0 }
0x112c   :  { %2720 = vst.msk [vmem:[%s6848_s2 + $0x28] sm:$0xff] %vm2714_vm0, %v2710_v2  ;;  %v2704_v33 = vadd.f32 0.5, %v2695_v34  ;;  %v2703_v43 = vadd.f32 0.5, %v2694_v26 }
0x112d   :  { %2721 = vst.msk [vmem:[%s6848_s2 + $0x30] sm:$0xff] %vm2714_vm0, %v2711_v53 }
0x112e   :  { %v2713_v58 = vmax.f32 %v2704_v33, 0.0  ;;  %v2712_v23 = vmax.f32 %v2703_v43, 0.0 }
0x1130   :  { %2723 = vst.msk [vmem:[%s6848_s2 + $0x40] sm:$0xff] %vm2714_vm0, %v2713_v58  ;;  %2722 = vst.msk [vmem:[%s6848_s2 + $0x38] sm:$0xff] %vm2714_vm0, %v2712_v23 }

</bundles_post_ra>
